<compile_context>
chip_gen: v7x
topology: tpu7x:2x2x1
jax: 0.10.0
libtpu: 0.0.40
codegen_flags: <defaults>
</compile_context>

<pallas_src>
import jax
import jax.numpy as jnp
from jax.experimental import pallas as pl
from jax.experimental.pallas import tpu as pltpu


# ----------------------------------------------------------------------------
# Single fused kernel: conv1 (im2col matmul) + ReLU + pool, conv2 (9 shifted
# taps) + ReLU + pool, CHW-ordered LSTM input matmul, two LSTM cells, Linear.
# ----------------------------------------------------------------------------
def _fused_forward_kernel(p1_ref, w1_ref, b1_ref, w2_ref, b2_ref,
                          wih1_ref, bl1_ref, wih2_ref, bl2_ref,
                          wfc_ref, bfc_ref,
                          out_ref, pool1_scr, pool2_scr):
    # Static shapes (derived from the scratch / weight refs).
    B, Ho, S, C1 = pool1_scr.shape          # Ho = S//2, C1 = 32
    _, H2, Wo, C2 = pool2_scr.shape         # H2 = S//4, Wo = S//2, C2 = 64
    W2 = Wo // 2                            # S//4
    hid = wih2_ref.shape[0]                 # 128

    # ---------------- conv1: one im2col matmul + bias + ReLU ----------------
    a1 = jnp.dot(p1_ref[...], w1_ref[...], preferred_element_type=jnp.float32)
    a1 = jnp.maximum(a1 + b1_ref[...], 0.0)                    # (B*S*S, C1)

    # ---------------- maxpool 2x2 #1 ----------------------------------------
    # H direction: split a major dim and reduce it.
    a1 = a1.reshape(B, Ho, 2, S, C1)
    pool1_scr[...] = jnp.max(a1, axis=2)                       # (B, Ho, S, C1)
    # W direction: sublane-strided reads of even / odd columns.
    h1 = jnp.maximum(pool1_scr[:, :, pl.ds(0, Wo, 2), :],
                     pool1_scr[:, :, pl.ds(1, Wo, 2), :])      # (B, Ho, Wo, C1)

    # ---------------- zero-pad for the second "same" 3x3 conv ---------------
    zw = jnp.zeros((B, Ho, 1, C1), jnp.float32)
    h1p = jnp.concatenate([zw, h1, zw], axis=2)                # (B, Ho, Wo+2, C1)
    zh = jnp.zeros((B, 1, Wo + 2, C1), jnp.float32)
    h1p = jnp.concatenate([zh, h1p, zh], axis=1)               # (B, Ho+2, Wo+2, C1)

    # ---------------- conv2: 9 shifted-tap matmuls (K=32), accumulated ------
    # (A single K=288 im2col matmul would need a lane-dim concatenation of
    #  nine 32-wide taps; the 9 accumulated MXU pushes are negligible here.)
    acc2 = jnp.zeros((B * Ho * Wo, C2), jnp.float32)
    for ky in range(3):
        for kx in range(3):
            tap = h1p[:, ky:ky + Ho, kx:kx + Wo, :]            # (B, Ho, Wo, C1)
            acc2 = acc2 + jnp.dot(tap.reshape(B * Ho * Wo, C1),
                                  w2_ref[ky, kx, :, :],
                                  preferred_element_type=jnp.float32)
    a2 = jnp.maximum(acc2 + b2_ref[...], 0.0)                  # (B*Ho*Wo, C2)

    # ---------------- maxpool 2x2 #2 ----------------------------------------
    a2 = a2.reshape(B, H2, 2, Wo, C2)
    pool2_scr[...] = jnp.max(a2, axis=2)                       # (B, H2, Wo, C2)
    h2 = jnp.maximum(pool2_scr[:, :, pl.ds(0, W2, 2), :],
                     pool2_scr[:, :, pl.ds(1, W2, 2), :])      # (B, H2, W2, C2)

    # ---------------- LSTM layer 1 (seq_len == 1, zero initial state) -------
    # gates = feats @ W_ih1^T + (b_ih1 + b_hh1); the h_prev @ W_hh1 term is
    # exactly zero.  wih1_ref is pre-permuted so block r holds the weight rows
    # of spatial site r (h = r // W2, w = r % W2) for all C2 channels, which
    # reproduces torch's CHW x.view() flatten without an in-kernel transpose.
    gates1 = jnp.zeros((B, 4 * hid), jnp.float32)
    for r in range(H2 * W2):
        feat_r = h2[:, r // W2, r % W2, :]                     # (B, C2)
        gates1 = gates1 + jnp.dot(feat_r, wih1_ref[r, :, :],
                                  preferred_element_type=jnp.float32)
    gates1 = gates1 + bl1_ref[...]

    def half_cell(gates):
        # PyTorch gate order (i, f, g, o); c_prev = 0 so the forget gate and
        # the f * c_prev product are dead and skipped.
        i = 1.0 / (1.0 + jnp.exp(-gates[:, 0 * hid:1 * hid]))
        g = jnp.tanh(gates[:, 2 * hid:3 * hid])
        o = 1.0 / (1.0 + jnp.exp(-gates[:, 3 * hid:4 * hid]))
        return o * jnp.tanh(i * g)

    h_l1 = half_cell(gates1)                                   # (B, hid)

    # ---------------- LSTM layer 2 + final Linear ----------------------------
    gates2 = (jnp.dot(h_l1, wih2_ref[...],
                      preferred_element_type=jnp.float32) + bl2_ref[...])
    h_l2 = half_cell(gates2)                                   # (B, hid)
    out_ref[...] = (jnp.dot(h_l2, wfc_ref[...],
                            preferred_element_type=jnp.float32) + bfc_ref[...])


# ----------------------------------------------------------------------------
# Wrapper: host-side input prep (NCHW->NHWC, pad, im2col patches) + one
# pallas_call for the entire forward.
# ----------------------------------------------------------------------------
def forward(x_nchw, p):
    """x_nchw: (B, Cin, S, S) float32, PyTorch layout."""
    B, cin, S, _ = x_nchw.shape
    Ho, H2 = S // 2, S // 4
    num_out = p["wfc_t"].shape[1]

    # One small XLA fusion over a few-KB input: build the conv1 im2col slab so
    # the kernel's conv1 is a single lane-friendly (B*S*S, 9*Cin) matmul.
    x = jnp.transpose(x_nchw, (0, 2, 3, 1)).astype(jnp.float32)        # NHWC
    xp = jnp.pad(x, ((0, 0), (1, 1), (1, 1), (0, 0)))
    taps = [xp[:, ky:ky + S, kx:kx + S, :]
            for ky in range(3) for kx in range(3)]
    p1 = jnp.concatenate(taps, axis=-1).reshape(B * S * S, 9 * cin)

    vmem = pl.BlockSpec(memory_space=pltpu.MemorySpace.VMEM)
    return pl.pallas_call(
        _fused_forward_kernel,
        out_shape=jax.ShapeDtypeStruct((B, num_out), jnp.float32),
        in_specs=[vmem] * 11,
        out_specs=vmem,
        scratch_shapes=[
            pltpu.VMEM((B, Ho, S, 32), jnp.float32),     # conv1 H-pooled map
            pltpu.VMEM((B, H2, Ho, 64), jnp.float32),    # conv2 H-pooled map
        ],
        cost_estimate=pl.CostEstimate(
            flops=8_000_000, transcendentals=2_048, bytes_accessed=2_600_000),
    )(p1, p["w1"], p["b1"], p["w2"], p["b2"],
      p["wih1_blk"], p["bl1"], p["wih2_t"], p["bl2"], p["wfc_t"], p["bfc"])


# ----------------------------------------------------------------------------
# Parameter construction (kernel-ready layouts; matches the torch module's
# initialization distributions).  W_hh of both LSTM layers is omitted: with
# seq_len == 1 and zero initial state its forward contribution is exactly 0.
# ----------------------------------------------------------------------------
def init_params(key, cin=3, hidden=128, num_out=3, spatial=16):
    s4 = spatial // 4
    feat = 64 * s4 * s4                     # real conv-feature size at this S
    ks = jax.random.split(key, 12)

    def u(k, shape, fan_in):
        bound = float(fan_in) ** -0.5
        return jax.random.uniform(k, shape, jnp.float32, -bound, bound)

    # Conv weights in HWIO (= torch OIHW transposed (2, 3, 1, 0)).
    conv1_w = u(ks[0], (3, 3, cin, 32), 9 * cin)
    conv1_b = u(ks[1], (1, 32), 9 * cin)
    conv2_w = u(ks[2], (3, 3, 32, 64), 9 * 32)
    conv2_b = u(ks[3], (1, 64), 9 * 32)

    # LSTM layer 0: torch W_ih0 is (4H, feat) with CHW-ordered columns; store
    # it transposed (feat, 4H), then re-block to (spatial_site, channel, 4H)
    # so the kernel can consume features in its natural (h, w, c) order.
    wih1_t = u(ks[4], (feat, 4 * hidden), hidden)
    bl1 = u(ks[5], (1, 4 * hidden), hidden) + u(ks[6], (1, 4 * hidden), hidden)
    wih1_blk = wih1_t.reshape(64, s4 * s4, 4 * hidden).transpose(1, 0, 2)

    # LSTM layer 1 and final Linear.
    wih2_t = u(ks[7], (hidden, 4 * hidden), hidden)
    bl2 = u(ks[8], (1, 4 * hidden), hidden) + u(ks[9], (1, 4 * hidden), hidden)
    wfc_t = u(ks[10], (hidden, num_out), hidden)
    bfc = u(ks[11], (1, num_out), hidden)

    return {
        "w1": conv1_w.reshape(9 * cin, 32), "b1": conv1_b,   # im2col (ky,kx,cin)
        "w2": conv2_w, "b2": conv2_b,
        "wih1_blk": wih1_blk, "bl1": bl1,
        "wih2_t": wih2_t, "bl2": bl2,
        "wfc_t": wfc_t, "bfc": bfc,
    }


if __name__ == "__main__":
    B, CIN, S = 2, 3, 16            # small 16x16 RGB images
    HIDDEN, NUM_OUT = 128, 3        # hidden_size=128, num_layers=2, 3 outputs

    key = jax.random.PRNGKey(0)
    k_x, k_p = jax.random.split(key)
    x = jax.random.normal(k_x, (B, CIN, S, S), jnp.float32)   # NCHW, like torch
    params = init_params(k_p, cin=CIN, hidden=HIDDEN, num_out=NUM_OUT, spatial=S)

    out = jax.jit(forward)(x, params)
    out = jax.block_until_ready(out)

    assert out.shape == (B, NUM_OUT), out.shape
    assert bool(jnp.all(jnp.isfinite(out)))
    print("KERNEL_OK")
</pallas_src>

<mosaic_0001>
module attributes {stable_mosaic.version = 11 : i64} {
  func.func @_fused_forward_kernel(%arg0: memref<512x27xf32, #tpu.memory_space<vmem>>, %arg1: memref<27x32xf32, #tpu.memory_space<vmem>>, %arg2: memref<1x32xf32, #tpu.memory_space<vmem>>, %arg3: memref<3x3x32x64xf32, #tpu.memory_space<vmem>>, %arg4: memref<1x64xf32, #tpu.memory_space<vmem>>, %arg5: memref<16x64x512xf32, #tpu.memory_space<vmem>>, %arg6: memref<1x512xf32, #tpu.memory_space<vmem>>, %arg7: memref<128x512xf32, #tpu.memory_space<vmem>>, %arg8: memref<1x512xf32, #tpu.memory_space<vmem>>, %arg9: memref<128x3xf32, #tpu.memory_space<vmem>>, %arg10: memref<1x3xf32, #tpu.memory_space<vmem>>, %arg11: memref<2x3xf32, #tpu.memory_space<vmem>>, %arg12: memref<2x8x16x32xf32, #tpu.memory_space<vmem>>, %arg13: memref<2x4x8x64xf32, #tpu.memory_space<vmem>>) attributes {dimension_semantics = [], scalar_prefetch = 0 : i64, scratch_operands = 2 : i64, tpu.core_type = #tpu.core_type<tc>} {
    %c0 = arith.constant 0 : index
    %c0_0 = arith.constant 0 : index
    %0 = vector.load %arg0[%c0, %c0_0] : memref<512x27xf32, #tpu.memory_space<vmem>>, vector<512x27xf32>
    %c0_1 = arith.constant 0 : index
    %c0_2 = arith.constant 0 : index
    %1 = vector.load %arg1[%c0_1, %c0_2] : memref<27x32xf32, #tpu.memory_space<vmem>>, vector<27x32xf32>
    %cst = arith.constant dense<0.000000e+00> : vector<512x32xf32>
    %2 = tpu.matmul %0, %1, %cst {dimension_numbers = #tpu.dot_dimension_numbers<[1], [0], [0], [1], [0, 0, 1, 1], [], []>} : vector<512x27xf32>, vector<27x32xf32>, vector<512x32xf32> -> vector<512x32xf32>
    %c0_3 = arith.constant 0 : index
    %c0_4 = arith.constant 0 : index
    %3 = vector.load %arg2[%c0_3, %c0_4] : memref<1x32xf32, #tpu.memory_space<vmem>>, vector<1x32xf32>
    %4 = vector.broadcast %3 : vector<1x32xf32> to vector<512x32xf32>
    %5 = arith.addf %2, %4 : vector<512x32xf32>
    %cst_5 = arith.constant 0.000000e+00 : f32
    %6 = vector.broadcast %cst_5 : f32 to vector<512x32xf32>
    %7 = arith.maximumf %5, %6 : vector<512x32xf32>
    %8 = vector.shape_cast %7 : vector<512x32xf32> to vector<2x8x2x16x32xf32>
    %cst_6 = arith.constant dense<0xFF800000> : vector<2x8x16x32xf32>
    %9 = vector.multi_reduction <maximumf>, %8, %cst_6 [2] : vector<2x8x2x16x32xf32> to vector<2x8x16x32xf32>
    %c0_7 = arith.constant 0 : index
    %c0_8 = arith.constant 0 : index
    %c0_9 = arith.constant 0 : index
    %c0_10 = arith.constant 0 : index
    %10 = vector.load %arg12[%c0_7, %c0_8, %c0_9, %c0_10] : memref<2x8x16x32xf32, #tpu.memory_space<vmem>>, vector<2x8x16x32xf32>
    tpu.vector_store %arg12[%c0_7, %c0_8, %c0_9, %c0_10], %9 {strides = array<i32>} : memref<2x8x16x32xf32, #tpu.memory_space<vmem>>, vector<2x8x16x32xf32>,
    %c0_11 = arith.constant 0 : index
    %c0_12 = arith.constant 0 : index
    %c0_13 = arith.constant 0 : index
    %c0_14 = arith.constant 0 : index
    %11 = tpu.strided_load %arg12[%c0_11, %c0_12, %c0_13, %c0_14] {strides = array<i32: 1, 1, 2, 1>} : memref<2x8x16x32xf32, #tpu.memory_space<vmem>>, vector<2x8x8x32xf32>
    %c0_15 = arith.constant 0 : index
    %c0_16 = arith.constant 0 : index
    %c1 = arith.constant 1 : index
    %c0_17 = arith.constant 0 : index
    %12 = tpu.strided_load %arg12[%c0_15, %c0_16, %c1, %c0_17] {strides = array<i32: 1, 1, 2, 1>} : memref<2x8x16x32xf32, #tpu.memory_space<vmem>>, vector<2x8x8x32xf32>
    %13 = arith.maximumf %11, %12 : vector<2x8x8x32xf32>
    %cst_18 = arith.constant 0.000000e+00 : f32
    %14 = vector.broadcast %cst_18 : f32 to vector<2x8x1x32xf32>
    %15 = tpu.concatenate %14, %13, %14 in 2 : vector<2x8x1x32xf32>, vector<2x8x8x32xf32>, vector<2x8x1x32xf32> -> vector<2x8x10x32xf32>
    %cst_19 = arith.constant 0.000000e+00 : f32
    %16 = vector.broadcast %cst_19 : f32 to vector<2x1x10x32xf32>
    %17 = tpu.concatenate %16, %15, %16 in 1 : vector<2x1x10x32xf32>, vector<2x8x10x32xf32>, vector<2x1x10x32xf32> -> vector<2x10x10x32xf32>
    %cst_20 = arith.constant 0.000000e+00 : f32
    %18 = vector.broadcast %cst_20 : f32 to vector<128x64xf32>
    %19 = vector.extract_strided_slice %17 {offsets = [0, 0, 0, 0], sizes = [2, 8, 8, 32], strides = [1, 1, 1, 1]} : vector<2x10x10x32xf32> to vector<2x8x8x32xf32>
    %20 = vector.shape_cast %19 : vector<2x8x8x32xf32> to vector<128x32xf32>
    %c0_21 = arith.constant 0 : index
    %c0_22 = arith.constant 0 : index
    %c0_23 = arith.constant 0 : index
    %c0_24 = arith.constant 0 : index
    %21 = vector.load %arg3[%c0_21, %c0_22, %c0_23, %c0_24] : memref<3x3x32x64xf32, #tpu.memory_space<vmem>>, vector<1x1x32x64xf32>
    %22 = vector.shape_cast %21 : vector<1x1x32x64xf32> to vector<32x64xf32>
    %cst_25 = arith.constant dense<0.000000e+00> : vector<128x64xf32>
    %23 = tpu.matmul %20, %22, %cst_25 {dimension_numbers = #tpu.dot_dimension_numbers<[1], [0], [0], [1], [0, 0, 1, 1], [], []>} : vector<128x32xf32>, vector<32x64xf32>, vector<128x64xf32> -> vector<128x64xf32>
    %24 = arith.addf %18, %23 : vector<128x64xf32>
    %25 = vector.extract_strided_slice %17 {offsets = [0, 0, 1, 0], sizes = [2, 8, 8, 32], strides = [1, 1, 1, 1]} : vector<2x10x10x32xf32> to vector<2x8x8x32xf32>
    %26 = vector.shape_cast %25 : vector<2x8x8x32xf32> to vector<128x32xf32>
    %c0_26 = arith.constant 0 : index
    %c1_27 = arith.constant 1 : index
    %c0_28 = arith.constant 0 : index
    %c0_29 = arith.constant 0 : index
    %27 = vector.load %arg3[%c0_26, %c1_27, %c0_28, %c0_29] : memref<3x3x32x64xf32, #tpu.memory_space<vmem>>, vector<1x1x32x64xf32>
    %28 = vector.shape_cast %27 : vector<1x1x32x64xf32> to vector<32x64xf32>
    %cst_30 = arith.constant dense<0.000000e+00> : vector<128x64xf32>
    %29 = tpu.matmul %26, %28, %cst_30 {dimension_numbers = #tpu.dot_dimension_numbers<[1], [0], [0], [1], [0, 0, 1, 1], [], []>} : vector<128x32xf32>, vector<32x64xf32>, vector<128x64xf32> -> vector<128x64xf32>
    %30 = arith.addf %24, %29 : vector<128x64xf32>
    %31 = vector.extract_strided_slice %17 {offsets = [0, 0, 2, 0], sizes = [2, 8, 8, 32], strides = [1, 1, 1, 1]} : vector<2x10x10x32xf32> to vector<2x8x8x32xf32>
    %32 = vector.shape_cast %31 : vector<2x8x8x32xf32> to vector<128x32xf32>
    %c0_31 = arith.constant 0 : index
    %c2 = arith.constant 2 : index
    %c0_32 = arith.constant 0 : index
    %c0_33 = arith.constant 0 : index
    %33 = vector.load %arg3[%c0_31, %c2, %c0_32, %c0_33] : memref<3x3x32x64xf32, #tpu.memory_space<vmem>>, vector<1x1x32x64xf32>
    %34 = vector.shape_cast %33 : vector<1x1x32x64xf32> to vector<32x64xf32>
    %cst_34 = arith.constant dense<0.000000e+00> : vector<128x64xf32>
    %35 = tpu.matmul %32, %34, %cst_34 {dimension_numbers = #tpu.dot_dimension_numbers<[1], [0], [0], [1], [0, 0, 1, 1], [], []>} : vector<128x32xf32>, vector<32x64xf32>, vector<128x64xf32> -> vector<128x64xf32>
    %36 = arith.addf %30, %35 : vector<128x64xf32>
    %37 = vector.extract_strided_slice %17 {offsets = [0, 1, 0, 0], sizes = [2, 8, 8, 32], strides = [1, 1, 1, 1]} : vector<2x10x10x32xf32> to vector<2x8x8x32xf32>
    %38 = vector.shape_cast %37 : vector<2x8x8x32xf32> to vector<128x32xf32>
    %c1_35 = arith.constant 1 : index
    %c0_36 = arith.constant 0 : index
    %c0_37 = arith.constant 0 : index
    %c0_38 = arith.constant 0 : index
    %39 = vector.load %arg3[%c1_35, %c0_36, %c0_37, %c0_38] : memref<3x3x32x64xf32, #tpu.memory_space<vmem>>, vector<1x1x32x64xf32>
    %40 = vector.shape_cast %39 : vector<1x1x32x64xf32> to vector<32x64xf32>
    %cst_39 = arith.constant dense<0.000000e+00> : vector<128x64xf32>
    %41 = tpu.matmul %38, %40, %cst_39 {dimension_numbers = #tpu.dot_dimension_numbers<[1], [0], [0], [1], [0, 0, 1, 1], [], []>} : vector<128x32xf32>, vector<32x64xf32>, vector<128x64xf32> -> vector<128x64xf32>
    %42 = arith.addf %36, %41 : vector<128x64xf32>
    %43 = vector.extract_strided_slice %17 {offsets = [0, 1, 1, 0], sizes = [2, 8, 8, 32], strides = [1, 1, 1, 1]} : vector<2x10x10x32xf32> to vector<2x8x8x32xf32>
    %44 = vector.shape_cast %43 : vector<2x8x8x32xf32> to vector<128x32xf32>
    %c1_40 = arith.constant 1 : index
    %c1_41 = arith.constant 1 : index
    %c0_42 = arith.constant 0 : index
    %c0_43 = arith.constant 0 : index
    %45 = vector.load %arg3[%c1_40, %c1_41, %c0_42, %c0_43] : memref<3x3x32x64xf32, #tpu.memory_space<vmem>>, vector<1x1x32x64xf32>
    %46 = vector.shape_cast %45 : vector<1x1x32x64xf32> to vector<32x64xf32>
    %cst_44 = arith.constant dense<0.000000e+00> : vector<128x64xf32>
    %47 = tpu.matmul %44, %46, %cst_44 {dimension_numbers = #tpu.dot_dimension_numbers<[1], [0], [0], [1], [0, 0, 1, 1], [], []>} : vector<128x32xf32>, vector<32x64xf32>, vector<128x64xf32> -> vector<128x64xf32>
    %48 = arith.addf %42, %47 : vector<128x64xf32>
    %49 = vector.extract_strided_slice %17 {offsets = [0, 1, 2, 0], sizes = [2, 8, 8, 32], strides = [1, 1, 1, 1]} : vector<2x10x10x32xf32> to vector<2x8x8x32xf32>
    %50 = vector.shape_cast %49 : vector<2x8x8x32xf32> to vector<128x32xf32>
    %c1_45 = arith.constant 1 : index
    %c2_46 = arith.constant 2 : index
    %c0_47 = arith.constant 0 : index
    %c0_48 = arith.constant 0 : index
    %51 = vector.load %arg3[%c1_45, %c2_46, %c0_47, %c0_48] : memref<3x3x32x64xf32, #tpu.memory_space<vmem>>, vector<1x1x32x64xf32>
    %52 = vector.shape_cast %51 : vector<1x1x32x64xf32> to vector<32x64xf32>
    %cst_49 = arith.constant dense<0.000000e+00> : vector<128x64xf32>
    %53 = tpu.matmul %50, %52, %cst_49 {dimension_numbers = #tpu.dot_dimension_numbers<[1], [0], [0], [1], [0, 0, 1, 1], [], []>} : vector<128x32xf32>, vector<32x64xf32>, vector<128x64xf32> -> vector<128x64xf32>
    %54 = arith.addf %48, %53 : vector<128x64xf32>
    %55 = vector.extract_strided_slice %17 {offsets = [0, 2, 0, 0], sizes = [2, 8, 8, 32], strides = [1, 1, 1, 1]} : vector<2x10x10x32xf32> to vector<2x8x8x32xf32>
    %56 = vector.shape_cast %55 : vector<2x8x8x32xf32> to vector<128x32xf32>
    %c2_50 = arith.constant 2 : index
    %c0_51 = arith.constant 0 : index
    %c0_52 = arith.constant 0 : index
    %c0_53 = arith.constant 0 : index
    %57 = vector.load %arg3[%c2_50, %c0_51, %c0_52, %c0_53] : memref<3x3x32x64xf32, #tpu.memory_space<vmem>>, vector<1x1x32x64xf32>
    %58 = vector.shape_cast %57 : vector<1x1x32x64xf32> to vector<32x64xf32>
    %cst_54 = arith.constant dense<0.000000e+00> : vector<128x64xf32>
    %59 = tpu.matmul %56, %58, %cst_54 {dimension_numbers = #tpu.dot_dimension_numbers<[1], [0], [0], [1], [0, 0, 1, 1], [], []>} : vector<128x32xf32>, vector<32x64xf32>, vector<128x64xf32> -> vector<128x64xf32>
    %60 = arith.addf %54, %59 : vector<128x64xf32>
    %61 = vector.extract_strided_slice %17 {offsets = [0, 2, 1, 0], sizes = [2, 8, 8, 32], strides = [1, 1, 1, 1]} : vector<2x10x10x32xf32> to vector<2x8x8x32xf32>
    %62 = vector.shape_cast %61 : vector<2x8x8x32xf32> to vector<128x32xf32>
    %c2_55 = arith.constant 2 : index
    %c1_56 = arith.constant 1 : index
    %c0_57 = arith.constant 0 : index
    %c0_58 = arith.constant 0 : index
    %63 = vector.load %arg3[%c2_55, %c1_56, %c0_57, %c0_58] : memref<3x3x32x64xf32, #tpu.memory_space<vmem>>, vector<1x1x32x64xf32>
    %64 = vector.shape_cast %63 : vector<1x1x32x64xf32> to vector<32x64xf32>
    %cst_59 = arith.constant dense<0.000000e+00> : vector<128x64xf32>
    %65 = tpu.matmul %62, %64, %cst_59 {dimension_numbers = #tpu.dot_dimension_numbers<[1], [0], [0], [1], [0, 0, 1, 1], [], []>} : vector<128x32xf32>, vector<32x64xf32>, vector<128x64xf32> -> vector<128x64xf32>
    %66 = arith.addf %60, %65 : vector<128x64xf32>
    %67 = vector.extract_strided_slice %17 {offsets = [0, 2, 2, 0], sizes = [2, 8, 8, 32], strides = [1, 1, 1, 1]} : vector<2x10x10x32xf32> to vector<2x8x8x32xf32>
    %68 = vector.shape_cast %67 : vector<2x8x8x32xf32> to vector<128x32xf32>
    %c2_60 = arith.constant 2 : index
    %c2_61 = arith.constant 2 : index
    %c0_62 = arith.constant 0 : index
    %c0_63 = arith.constant 0 : index
    %69 = vector.load %arg3[%c2_60, %c2_61, %c0_62, %c0_63] : memref<3x3x32x64xf32, #tpu.memory_space<vmem>>, vector<1x1x32x64xf32>
    %70 = vector.shape_cast %69 : vector<1x1x32x64xf32> to vector<32x64xf32>
    %cst_64 = arith.constant dense<0.000000e+00> : vector<128x64xf32>
    %71 = tpu.matmul %68, %70, %cst_64 {dimension_numbers = #tpu.dot_dimension_numbers<[1], [0], [0], [1], [0, 0, 1, 1], [], []>} : vector<128x32xf32>, vector<32x64xf32>, vector<128x64xf32> -> vector<128x64xf32>
    %72 = arith.addf %66, %71 : vector<128x64xf32>
    %c0_65 = arith.constant 0 : index
    %c0_66 = arith.constant 0 : index
    %73 = vector.load %arg4[%c0_65, %c0_66] : memref<1x64xf32, #tpu.memory_space<vmem>>, vector<1x64xf32>
    %74 = vector.broadcast %73 : vector<1x64xf32> to vector<128x64xf32>
    %75 = arith.addf %72, %74 : vector<128x64xf32>
    %cst_67 = arith.constant 0.000000e+00 : f32
    %76 = vector.broadcast %cst_67 : f32 to vector<128x64xf32>
    %77 = arith.maximumf %75, %76 : vector<128x64xf32>
    %78 = vector.shape_cast %77 : vector<128x64xf32> to vector<2x4x2x8x64xf32>
    %cst_68 = arith.constant dense<0xFF800000> : vector<2x4x8x64xf32>
    %79 = vector.multi_reduction <maximumf>, %78, %cst_68 [2] : vector<2x4x2x8x64xf32> to vector<2x4x8x64xf32>
    %c0_69 = arith.constant 0 : index
    %c0_70 = arith.constant 0 : index
    %c0_71 = arith.constant 0 : index
    %c0_72 = arith.constant 0 : index
    %80 = vector.load %arg13[%c0_69, %c0_70, %c0_71, %c0_72] : memref<2x4x8x64xf32, #tpu.memory_space<vmem>>, vector<2x4x8x64xf32>
    tpu.vector_store %arg13[%c0_69, %c0_70, %c0_71, %c0_72], %79 {strides = array<i32>} : memref<2x4x8x64xf32, #tpu.memory_space<vmem>>, vector<2x4x8x64xf32>,
    %c0_73 = arith.constant 0 : index
    %c0_74 = arith.constant 0 : index
    %c0_75 = arith.constant 0 : index
    %c0_76 = arith.constant 0 : index
    %81 = tpu.strided_load %arg13[%c0_73, %c0_74, %c0_75, %c0_76] {strides = array<i32: 1, 1, 2, 1>} : memref<2x4x8x64xf32, #tpu.memory_space<vmem>>, vector<2x4x4x64xf32>
    %c0_77 = arith.constant 0 : index
    %c0_78 = arith.constant 0 : index
    %c1_79 = arith.constant 1 : index
    %c0_80 = arith.constant 0 : index
    %82 = tpu.strided_load %arg13[%c0_77, %c0_78, %c1_79, %c0_80] {strides = array<i32: 1, 1, 2, 1>} : memref<2x4x8x64xf32, #tpu.memory_space<vmem>>, vector<2x4x4x64xf32>
    %83 = arith.maximumf %81, %82 : vector<2x4x4x64xf32>
    %cst_81 = arith.constant 0.000000e+00 : f32
    %84 = vector.broadcast %cst_81 : f32 to vector<2x512xf32>
    %85 = vector.extract_strided_slice %83 {offsets = [0, 0, 0, 0], sizes = [2, 1, 1, 64], strides = [1, 1, 1, 1]} : vector<2x4x4x64xf32> to vector<2x1x1x64xf32>
    %86 = vector.shape_cast %85 : vector<2x1x1x64xf32> to vector<2x64xf32>
    %c0_82 = arith.constant 0 : index
    %c0_83 = arith.constant 0 : index
    %c0_84 = arith.constant 0 : index
    %87 = vector.load %arg5[%c0_82, %c0_83, %c0_84] : memref<16x64x512xf32, #tpu.memory_space<vmem>>, vector<1x64x512xf32>
    %88 = vector.shape_cast %87 : vector<1x64x512xf32> to vector<64x512xf32>
    %cst_85 = arith.constant dense<0.000000e+00> : vector<2x512xf32>
    %89 = tpu.matmul %86, %88, %cst_85 {dimension_numbers = #tpu.dot_dimension_numbers<[1], [0], [0], [1], [0, 0, 1, 1], [], []>} : vector<2x64xf32>, vector<64x512xf32>, vector<2x512xf32> -> vector<2x512xf32>
    %90 = arith.addf %84, %89 : vector<2x512xf32>
    %91 = vector.extract_strided_slice %83 {offsets = [0, 0, 1, 0], sizes = [2, 1, 1, 64], strides = [1, 1, 1, 1]} : vector<2x4x4x64xf32> to vector<2x1x1x64xf32>
    %92 = vector.shape_cast %91 : vector<2x1x1x64xf32> to vector<2x64xf32>
    %c1_86 = arith.constant 1 : index
    %c0_87 = arith.constant 0 : index
    %c0_88 = arith.constant 0 : index
    %93 = vector.load %arg5[%c1_86, %c0_87, %c0_88] : memref<16x64x512xf32, #tpu.memory_space<vmem>>, vector<1x64x512xf32>
    %94 = vector.shape_cast %93 : vector<1x64x512xf32> to vector<64x512xf32>
    %cst_89 = arith.constant dense<0.000000e+00> : vector<2x512xf32>
    %95 = tpu.matmul %92, %94, %cst_89 {dimension_numbers = #tpu.dot_dimension_numbers<[1], [0], [0], [1], [0, 0, 1, 1], [], []>} : vector<2x64xf32>, vector<64x512xf32>, vector<2x512xf32> -> vector<2x512xf32>
    %96 = arith.addf %90, %95 : vector<2x512xf32>
    %97 = vector.extract_strided_slice %83 {offsets = [0, 0, 2, 0], sizes = [2, 1, 1, 64], strides = [1, 1, 1, 1]} : vector<2x4x4x64xf32> to vector<2x1x1x64xf32>
    %98 = vector.shape_cast %97 : vector<2x1x1x64xf32> to vector<2x64xf32>
    %c2_90 = arith.constant 2 : index
    %c0_91 = arith.constant 0 : index
    %c0_92 = arith.constant 0 : index
    %99 = vector.load %arg5[%c2_90, %c0_91, %c0_92] : memref<16x64x512xf32, #tpu.memory_space<vmem>>, vector<1x64x512xf32>
    %100 = vector.shape_cast %99 : vector<1x64x512xf32> to vector<64x512xf32>
    %cst_93 = arith.constant dense<0.000000e+00> : vector<2x512xf32>
    %101 = tpu.matmul %98, %100, %cst_93 {dimension_numbers = #tpu.dot_dimension_numbers<[1], [0], [0], [1], [0, 0, 1, 1], [], []>} : vector<2x64xf32>, vector<64x512xf32>, vector<2x512xf32> -> vector<2x512xf32>
    %102 = arith.addf %96, %101 : vector<2x512xf32>
    %103 = vector.extract_strided_slice %83 {offsets = [0, 0, 3, 0], sizes = [2, 1, 1, 64], strides = [1, 1, 1, 1]} : vector<2x4x4x64xf32> to vector<2x1x1x64xf32>
    %104 = vector.shape_cast %103 : vector<2x1x1x64xf32> to vector<2x64xf32>
    %c3 = arith.constant 3 : index
    %c0_94 = arith.constant 0 : index
    %c0_95 = arith.constant 0 : index
    %105 = vector.load %arg5[%c3, %c0_94, %c0_95] : memref<16x64x512xf32, #tpu.memory_space<vmem>>, vector<1x64x512xf32>
    %106 = vector.shape_cast %105 : vector<1x64x512xf32> to vector<64x512xf32>
    %cst_96 = arith.constant dense<0.000000e+00> : vector<2x512xf32>
    %107 = tpu.matmul %104, %106, %cst_96 {dimension_numbers = #tpu.dot_dimension_numbers<[1], [0], [0], [1], [0, 0, 1, 1], [], []>} : vector<2x64xf32>, vector<64x512xf32>, vector<2x512xf32> -> vector<2x512xf32>
    %108 = arith.addf %102, %107 : vector<2x512xf32>
    %109 = vector.extract_strided_slice %83 {offsets = [0, 1, 0, 0], sizes = [2, 1, 1, 64], strides = [1, 1, 1, 1]} : vector<2x4x4x64xf32> to vector<2x1x1x64xf32>
    %110 = vector.shape_cast %109 : vector<2x1x1x64xf32> to vector<2x64xf32>
    %c4 = arith.constant 4 : index
    %c0_97 = arith.constant 0 : index
    %c0_98 = arith.constant 0 : index
    %111 = vector.load %arg5[%c4, %c0_97, %c0_98] : memref<16x64x512xf32, #tpu.memory_space<vmem>>, vector<1x64x512xf32>
    %112 = vector.shape_cast %111 : vector<1x64x512xf32> to vector<64x512xf32>
    %cst_99 = arith.constant dense<0.000000e+00> : vector<2x512xf32>
    %113 = tpu.matmul %110, %112, %cst_99 {dimension_numbers = #tpu.dot_dimension_numbers<[1], [0], [0], [1], [0, 0, 1, 1], [], []>} : vector<2x64xf32>, vector<64x512xf32>, vector<2x512xf32> -> vector<2x512xf32>
    %114 = arith.addf %108, %113 : vector<2x512xf32>
    %115 = vector.extract_strided_slice %83 {offsets = [0, 1, 1, 0], sizes = [2, 1, 1, 64], strides = [1, 1, 1, 1]} : vector<2x4x4x64xf32> to vector<2x1x1x64xf32>
    %116 = vector.shape_cast %115 : vector<2x1x1x64xf32> to vector<2x64xf32>
    %c5 = arith.constant 5 : index
    %c0_100 = arith.constant 0 : index
    %c0_101 = arith.constant 0 : index
    %117 = vector.load %arg5[%c5, %c0_100, %c0_101] : memref<16x64x512xf32, #tpu.memory_space<vmem>>, vector<1x64x512xf32>
    %118 = vector.shape_cast %117 : vector<1x64x512xf32> to vector<64x512xf32>
    %cst_102 = arith.constant dense<0.000000e+00> : vector<2x512xf32>
    %119 = tpu.matmul %116, %118, %cst_102 {dimension_numbers = #tpu.dot_dimension_numbers<[1], [0], [0], [1], [0, 0, 1, 1], [], []>} : vector<2x64xf32>, vector<64x512xf32>, vector<2x512xf32> -> vector<2x512xf32>
    %120 = arith.addf %114, %119 : vector<2x512xf32>
    %121 = vector.extract_strided_slice %83 {offsets = [0, 1, 2, 0], sizes = [2, 1, 1, 64], strides = [1, 1, 1, 1]} : vector<2x4x4x64xf32> to vector<2x1x1x64xf32>
    %122 = vector.shape_cast %121 : vector<2x1x1x64xf32> to vector<2x64xf32>
    %c6 = arith.constant 6 : index
    %c0_103 = arith.constant 0 : index
    %c0_104 = arith.constant 0 : index
    %123 = vector.load %arg5[%c6, %c0_103, %c0_104] : memref<16x64x512xf32, #tpu.memory_space<vmem>>, vector<1x64x512xf32>
    %124 = vector.shape_cast %123 : vector<1x64x512xf32> to vector<64x512xf32>
    %cst_105 = arith.constant dense<0.000000e+00> : vector<2x512xf32>
    %125 = tpu.matmul %122, %124, %cst_105 {dimension_numbers = #tpu.dot_dimension_numbers<[1], [0], [0], [1], [0, 0, 1, 1], [], []>} : vector<2x64xf32>, vector<64x512xf32>, vector<2x512xf32> -> vector<2x512xf32>
    %126 = arith.addf %120, %125 : vector<2x512xf32>
    %127 = vector.extract_strided_slice %83 {offsets = [0, 1, 3, 0], sizes = [2, 1, 1, 64], strides = [1, 1, 1, 1]} : vector<2x4x4x64xf32> to vector<2x1x1x64xf32>
    %128 = vector.shape_cast %127 : vector<2x1x1x64xf32> to vector<2x64xf32>
    %c7 = arith.constant 7 : index
    %c0_106 = arith.constant 0 : index
    %c0_107 = arith.constant 0 : index
    %129 = vector.load %arg5[%c7, %c0_106, %c0_107] : memref<16x64x512xf32, #tpu.memory_space<vmem>>, vector<1x64x512xf32>
    %130 = vector.shape_cast %129 : vector<1x64x512xf32> to vector<64x512xf32>
    %cst_108 = arith.constant dense<0.000000e+00> : vector<2x512xf32>
    %131 = tpu.matmul %128, %130, %cst_108 {dimension_numbers = #tpu.dot_dimension_numbers<[1], [0], [0], [1], [0, 0, 1, 1], [], []>} : vector<2x64xf32>, vector<64x512xf32>, vector<2x512xf32> -> vector<2x512xf32>
    %132 = arith.addf %126, %131 : vector<2x512xf32>
    %133 = vector.extract_strided_slice %83 {offsets = [0, 2, 0, 0], sizes = [2, 1, 1, 64], strides = [1, 1, 1, 1]} : vector<2x4x4x64xf32> to vector<2x1x1x64xf32>
    %134 = vector.shape_cast %133 : vector<2x1x1x64xf32> to vector<2x64xf32>
    %c8 = arith.constant 8 : index
    %c0_109 = arith.constant 0 : index
    %c0_110 = arith.constant 0 : index
    %135 = vector.load %arg5[%c8, %c0_109, %c0_110] : memref<16x64x512xf32, #tpu.memory_space<vmem>>, vector<1x64x512xf32>
    %136 = vector.shape_cast %135 : vector<1x64x512xf32> to vector<64x512xf32>
    %cst_111 = arith.constant dense<0.000000e+00> : vector<2x512xf32>
    %137 = tpu.matmul %134, %136, %cst_111 {dimension_numbers = #tpu.dot_dimension_numbers<[1], [0], [0], [1], [0, 0, 1, 1], [], []>} : vector<2x64xf32>, vector<64x512xf32>, vector<2x512xf32> -> vector<2x512xf32>
    %138 = arith.addf %132, %137 : vector<2x512xf32>
    %139 = vector.extract_strided_slice %83 {offsets = [0, 2, 1, 0], sizes = [2, 1, 1, 64], strides = [1, 1, 1, 1]} : vector<2x4x4x64xf32> to vector<2x1x1x64xf32>
    %140 = vector.shape_cast %139 : vector<2x1x1x64xf32> to vector<2x64xf32>
    %c9 = arith.constant 9 : index
    %c0_112 = arith.constant 0 : index
    %c0_113 = arith.constant 0 : index
    %141 = vector.load %arg5[%c9, %c0_112, %c0_113] : memref<16x64x512xf32, #tpu.memory_space<vmem>>, vector<1x64x512xf32>
    %142 = vector.shape_cast %141 : vector<1x64x512xf32> to vector<64x512xf32>
    %cst_114 = arith.constant dense<0.000000e+00> : vector<2x512xf32>
    %143 = tpu.matmul %140, %142, %cst_114 {dimension_numbers = #tpu.dot_dimension_numbers<[1], [0], [0], [1], [0, 0, 1, 1], [], []>} : vector<2x64xf32>, vector<64x512xf32>, vector<2x512xf32> -> vector<2x512xf32>
    %144 = arith.addf %138, %143 : vector<2x512xf32>
    %145 = vector.extract_strided_slice %83 {offsets = [0, 2, 2, 0], sizes = [2, 1, 1, 64], strides = [1, 1, 1, 1]} : vector<2x4x4x64xf32> to vector<2x1x1x64xf32>
    %146 = vector.shape_cast %145 : vector<2x1x1x64xf32> to vector<2x64xf32>
    %c10 = arith.constant 10 : index
    %c0_115 = arith.constant 0 : index
    %c0_116 = arith.constant 0 : index
    %147 = vector.load %arg5[%c10, %c0_115, %c0_116] : memref<16x64x512xf32, #tpu.memory_space<vmem>>, vector<1x64x512xf32>
    %148 = vector.shape_cast %147 : vector<1x64x512xf32> to vector<64x512xf32>
    %cst_117 = arith.constant dense<0.000000e+00> : vector<2x512xf32>
    %149 = tpu.matmul %146, %148, %cst_117 {dimension_numbers = #tpu.dot_dimension_numbers<[1], [0], [0], [1], [0, 0, 1, 1], [], []>} : vector<2x64xf32>, vector<64x512xf32>, vector<2x512xf32> -> vector<2x512xf32>
    %150 = arith.addf %144, %149 : vector<2x512xf32>
    %151 = vector.extract_strided_slice %83 {offsets = [0, 2, 3, 0], sizes = [2, 1, 1, 64], strides = [1, 1, 1, 1]} : vector<2x4x4x64xf32> to vector<2x1x1x64xf32>
    %152 = vector.shape_cast %151 : vector<2x1x1x64xf32> to vector<2x64xf32>
    %c11 = arith.constant 11 : index
    %c0_118 = arith.constant 0 : index
    %c0_119 = arith.constant 0 : index
    %153 = vector.load %arg5[%c11, %c0_118, %c0_119] : memref<16x64x512xf32, #tpu.memory_space<vmem>>, vector<1x64x512xf32>
    %154 = vector.shape_cast %153 : vector<1x64x512xf32> to vector<64x512xf32>
    %cst_120 = arith.constant dense<0.000000e+00> : vector<2x512xf32>
    %155 = tpu.matmul %152, %154, %cst_120 {dimension_numbers = #tpu.dot_dimension_numbers<[1], [0], [0], [1], [0, 0, 1, 1], [], []>} : vector<2x64xf32>, vector<64x512xf32>, vector<2x512xf32> -> vector<2x512xf32>
    %156 = arith.addf %150, %155 : vector<2x512xf32>
    %157 = vector.extract_strided_slice %83 {offsets = [0, 3, 0, 0], sizes = [2, 1, 1, 64], strides = [1, 1, 1, 1]} : vector<2x4x4x64xf32> to vector<2x1x1x64xf32>
    %158 = vector.shape_cast %157 : vector<2x1x1x64xf32> to vector<2x64xf32>
    %c12 = arith.constant 12 : index
    %c0_121 = arith.constant 0 : index
    %c0_122 = arith.constant 0 : index
    %159 = vector.load %arg5[%c12, %c0_121, %c0_122] : memref<16x64x512xf32, #tpu.memory_space<vmem>>, vector<1x64x512xf32>
    %160 = vector.shape_cast %159 : vector<1x64x512xf32> to vector<64x512xf32>
    %cst_123 = arith.constant dense<0.000000e+00> : vector<2x512xf32>
    %161 = tpu.matmul %158, %160, %cst_123 {dimension_numbers = #tpu.dot_dimension_numbers<[1], [0], [0], [1], [0, 0, 1, 1], [], []>} : vector<2x64xf32>, vector<64x512xf32>, vector<2x512xf32> -> vector<2x512xf32>
    %162 = arith.addf %156, %161 : vector<2x512xf32>
    %163 = vector.extract_strided_slice %83 {offsets = [0, 3, 1, 0], sizes = [2, 1, 1, 64], strides = [1, 1, 1, 1]} : vector<2x4x4x64xf32> to vector<2x1x1x64xf32>
    %164 = vector.shape_cast %163 : vector<2x1x1x64xf32> to vector<2x64xf32>
    %c13 = arith.constant 13 : index
    %c0_124 = arith.constant 0 : index
    %c0_125 = arith.constant 0 : index
    %165 = vector.load %arg5[%c13, %c0_124, %c0_125] : memref<16x64x512xf32, #tpu.memory_space<vmem>>, vector<1x64x512xf32>
    %166 = vector.shape_cast %165 : vector<1x64x512xf32> to vector<64x512xf32>
    %cst_126 = arith.constant dense<0.000000e+00> : vector<2x512xf32>
    %167 = tpu.matmul %164, %166, %cst_126 {dimension_numbers = #tpu.dot_dimension_numbers<[1], [0], [0], [1], [0, 0, 1, 1], [], []>} : vector<2x64xf32>, vector<64x512xf32>, vector<2x512xf32> -> vector<2x512xf32>
    %168 = arith.addf %162, %167 : vector<2x512xf32>
    %169 = vector.extract_strided_slice %83 {offsets = [0, 3, 2, 0], sizes = [2, 1, 1, 64], strides = [1, 1, 1, 1]} : vector<2x4x4x64xf32> to vector<2x1x1x64xf32>
    %170 = vector.shape_cast %169 : vector<2x1x1x64xf32> to vector<2x64xf32>
    %c14 = arith.constant 14 : index
    %c0_127 = arith.constant 0 : index
    %c0_128 = arith.constant 0 : index
    %171 = vector.load %arg5[%c14, %c0_127, %c0_128] : memref<16x64x512xf32, #tpu.memory_space<vmem>>, vector<1x64x512xf32>
    %172 = vector.shape_cast %171 : vector<1x64x512xf32> to vector<64x512xf32>
    %cst_129 = arith.constant dense<0.000000e+00> : vector<2x512xf32>
    %173 = tpu.matmul %170, %172, %cst_129 {dimension_numbers = #tpu.dot_dimension_numbers<[1], [0], [0], [1], [0, 0, 1, 1], [], []>} : vector<2x64xf32>, vector<64x512xf32>, vector<2x512xf32> -> vector<2x512xf32>
    %174 = arith.addf %168, %173 : vector<2x512xf32>
    %175 = vector.extract_strided_slice %83 {offsets = [0, 3, 3, 0], sizes = [2, 1, 1, 64], strides = [1, 1, 1, 1]} : vector<2x4x4x64xf32> to vector<2x1x1x64xf32>
    %176 = vector.shape_cast %175 : vector<2x1x1x64xf32> to vector<2x64xf32>
    %c15 = arith.constant 15 : index
    %c0_130 = arith.constant 0 : index
    %c0_131 = arith.constant 0 : index
    %177 = vector.load %arg5[%c15, %c0_130, %c0_131] : memref<16x64x512xf32, #tpu.memory_space<vmem>>, vector<1x64x512xf32>
    %178 = vector.shape_cast %177 : vector<1x64x512xf32> to vector<64x512xf32>
    %cst_132 = arith.constant dense<0.000000e+00> : vector<2x512xf32>
    %179 = tpu.matmul %176, %178, %cst_132 {dimension_numbers = #tpu.dot_dimension_numbers<[1], [0], [0], [1], [0, 0, 1, 1], [], []>} : vector<2x64xf32>, vector<64x512xf32>, vector<2x512xf32> -> vector<2x512xf32>
    %180 = arith.addf %174, %179 : vector<2x512xf32>
    %c0_133 = arith.constant 0 : index
    %c0_134 = arith.constant 0 : index
    %181 = vector.load %arg6[%c0_133, %c0_134] : memref<1x512xf32, #tpu.memory_space<vmem>>, vector<1x512xf32>
    %182 = vector.broadcast %181 : vector<1x512xf32> to vector<2x512xf32>
    %183 = arith.addf %180, %182 : vector<2x512xf32>
    %184 = vector.extract_strided_slice %183 {offsets = [0, 0], sizes = [2, 128], strides = [1, 1]} : vector<2x512xf32> to vector<2x128xf32>
    %cst_135 = arith.constant 0.000000e+00 : f32
    %185 = vector.broadcast %cst_135 : f32 to vector<2x128xf32>
    %186 = arith.subf %185, %184 : vector<2x128xf32>
    %187 = math.exp %186 : vector<2x128xf32>
    %cst_136 = arith.constant 1.000000e+00 : f32
    %188 = vector.broadcast %cst_136 : f32 to vector<2x128xf32>
    %189 = arith.addf %188, %187 : vector<2x128xf32>
    %cst_137 = arith.constant 1.000000e+00 : f32
    %190 = vector.broadcast %cst_137 : f32 to vector<2x128xf32>
    %191 = arith.divf %190, %189 : vector<2x128xf32>
    %192 = vector.extract_strided_slice %183 {offsets = [0, 256], sizes = [2, 128], strides = [1, 1]} : vector<2x512xf32> to vector<2x128xf32>
    %193 = math.tanh %192 : vector<2x128xf32>
    %194 = vector.extract_strided_slice %183 {offsets = [0, 384], sizes = [2, 128], strides = [1, 1]} : vector<2x512xf32> to vector<2x128xf32>
    %cst_138 = arith.constant 0.000000e+00 : f32
    %195 = vector.broadcast %cst_138 : f32 to vector<2x128xf32>
    %196 = arith.subf %195, %194 : vector<2x128xf32>
    %197 = math.exp %196 : vector<2x128xf32>
    %cst_139 = arith.constant 1.000000e+00 : f32
    %198 = vector.broadcast %cst_139 : f32 to vector<2x128xf32>
    %199 = arith.addf %198, %197 : vector<2x128xf32>
    %cst_140 = arith.constant 1.000000e+00 : f32
    %200 = vector.broadcast %cst_140 : f32 to vector<2x128xf32>
    %201 = arith.divf %200, %199 : vector<2x128xf32>
    %202 = arith.mulf %191, %193 : vector<2x128xf32>
    %203 = math.tanh %202 : vector<2x128xf32>
    %204 = arith.mulf %201, %203 : vector<2x128xf32>
    %c0_141 = arith.constant 0 : index
    %c0_142 = arith.constant 0 : index
    %205 = vector.load %arg7[%c0_141, %c0_142] : memref<128x512xf32, #tpu.memory_space<vmem>>, vector<128x512xf32>
    %cst_143 = arith.constant dense<0.000000e+00> : vector<2x512xf32>
    %206 = tpu.matmul %204, %205, %cst_143 {dimension_numbers = #tpu.dot_dimension_numbers<[1], [0], [0], [1], [0, 0, 1, 1], [], []>} : vector<2x128xf32>, vector<128x512xf32>, vector<2x512xf32> -> vector<2x512xf32>
    %c0_144 = arith.constant 0 : index
    %c0_145 = arith.constant 0 : index
    %207 = vector.load %arg8[%c0_144, %c0_145] : memref<1x512xf32, #tpu.memory_space<vmem>>, vector<1x512xf32>
    %208 = vector.broadcast %207 : vector<1x512xf32> to vector<2x512xf32>
    %209 = arith.addf %206, %208 : vector<2x512xf32>
    %210 = vector.extract_strided_slice %209 {offsets = [0, 0], sizes = [2, 128], strides = [1, 1]} : vector<2x512xf32> to vector<2x128xf32>
    %cst_146 = arith.constant 0.000000e+00 : f32
    %211 = vector.broadcast %cst_146 : f32 to vector<2x128xf32>
    %212 = arith.subf %211, %210 : vector<2x128xf32>
    %213 = math.exp %212 : vector<2x128xf32>
    %cst_147 = arith.constant 1.000000e+00 : f32
    %214 = vector.broadcast %cst_147 : f32 to vector<2x128xf32>
    %215 = arith.addf %214, %213 : vector<2x128xf32>
    %cst_148 = arith.constant 1.000000e+00 : f32
    %216 = vector.broadcast %cst_148 : f32 to vector<2x128xf32>
    %217 = arith.divf %216, %215 : vector<2x128xf32>
    %218 = vector.extract_strided_slice %209 {offsets = [0, 256], sizes = [2, 128], strides = [1, 1]} : vector<2x512xf32> to vector<2x128xf32>
    %219 = math.tanh %218 : vector<2x128xf32>
    %220 = vector.extract_strided_slice %209 {offsets = [0, 384], sizes = [2, 128], strides = [1, 1]} : vector<2x512xf32> to vector<2x128xf32>
    %cst_149 = arith.constant 0.000000e+00 : f32
    %221 = vector.broadcast %cst_149 : f32 to vector<2x128xf32>
    %222 = arith.subf %221, %220 : vector<2x128xf32>
    %223 = math.exp %222 : vector<2x128xf32>
    %cst_150 = arith.constant 1.000000e+00 : f32
    %224 = vector.broadcast %cst_150 : f32 to vector<2x128xf32>
    %225 = arith.addf %224, %223 : vector<2x128xf32>
    %cst_151 = arith.constant 1.000000e+00 : f32
    %226 = vector.broadcast %cst_151 : f32 to vector<2x128xf32>
    %227 = arith.divf %226, %225 : vector<2x128xf32>
    %228 = arith.mulf %217, %219 : vector<2x128xf32>
    %229 = math.tanh %228 : vector<2x128xf32>
    %230 = arith.mulf %227, %229 : vector<2x128xf32>
    %c0_152 = arith.constant 0 : index
    %c0_153 = arith.constant 0 : index
    %231 = vector.load %arg9[%c0_152, %c0_153] : memref<128x3xf32, #tpu.memory_space<vmem>>, vector<128x3xf32>
    %cst_154 = arith.constant dense<0.000000e+00> : vector<2x3xf32>
    %232 = tpu.matmul %230, %231, %cst_154 {dimension_numbers = #tpu.dot_dimension_numbers<[1], [0], [0], [1], [0, 0, 1, 1], [], []>} : vector<2x128xf32>, vector<128x3xf32>, vector<2x3xf32> -> vector<2x3xf32>
    %c0_155 = arith.constant 0 : index
    %c0_156 = arith.constant 0 : index
    %233 = vector.load %arg10[%c0_155, %c0_156] : memref<1x3xf32, #tpu.memory_space<vmem>>, vector<1x3xf32>
    %234 = vector.broadcast %233 : vector<1x3xf32> to vector<2x3xf32>
    %235 = arith.addf %232, %234 : vector<2x3xf32>
    %c0_157 = arith.constant 0 : index
    %c0_158 = arith.constant 0 : index
    %236 = vector.load %arg11[%c0_157, %c0_158] : memref<2x3xf32, #tpu.memory_space<vmem>>, vector<2x3xf32>
    tpu.vector_store %arg11[%c0_157, %c0_158], %235 {strides = array<i32>} : memref<2x3xf32, #tpu.memory_space<vmem>>, vector<2x3xf32>,
    return
  }
}

</mosaic_0001>

<bundles_post_ra>
// kernel: forward.1
= control target key start
LH: loop header
LB: loop body
LE: loop exit
PB: predicated region body
PF: predicated region fallthrough
CT: control target
= control target key end

     0   :  { %16 = vsyncpa [#allocation5], 0  ;;  %s9812_s0 = inlined_call_operand.vmem [shape: f32[512,27], index: 0, kind: input, shape index: {}]   ;;  %s9813_s1 = inlined_call_operand.hbm [shape: f32[27,32], index: 1, kind: input, shape index: {}]   ;;  %s9814_s2 = inlined_call_operand.hbm [shape: f32[1,32], index: 2, kind: input, shape index: {}]   ;;  %s9815_s3 = inlined_call_operand.hbm [shape: f32[3,3,32,64], index: 3, kind: input, shape index: {}]   ;;  %s9816_s4 = inlined_call_operand.hbm [shape: f32[1,64], index: 4, kind: input, shape index: {}]   ;;  %s9817_s5 = inlined_call_operand.hbm [shape: f32[16,64,512], index: 5, kind: input, shape index: {}]   ;;  %s9818_s6 = inlined_call_operand.hbm [shape: f32[1,512], index: 6, kind: input, shape index: {}]   ;;  %s9819_s7 = inlined_call_operand.hbm [shape: f32[128,512], index: 7, kind: input, shape index: {}]   ;;  %s9820_s8 = inlined_call_operand.hbm [shape: f32[1,512], index: 8, kind: input, shape index: {}]   ;;  %s9821_s9 = inlined_call_operand.vmem [shape: f32[128,3], index: 9, kind: input, shape index: {}]   ;;  %s9822_s10 = inlined_call_operand.hbm [shape: f32[1,3], index: 10, kind: input, shape index: {}]   ;;  %s9823_s11 = inlined_call_operand.hbm [shape: f32[2,3], index: 11, kind: output, shape index: {}]  }
   0x1   :  { %17 = vsyncpa [#allocation8], 0 }
   0x2   :  { %18 = vsyncpa [#allocation11], 0 }
   0x3   :  { %19 = vsyncpa [#allocation14], 0 }
   0x4   :  { %20 = vsyncpa [#allocation17], 0 }
   0x5   :  { %21 = vsyncpa [#allocation6], 0  ;;  %s8310_s17 = smov [#allocation7]   ;;  %s8311_s19 = smov [#allocation10]  }
   0x6   :  { %s42_s18 = sshll.u32 %s8310_s17, 4  ;;  %s64_s20 = sshll.u32 %s8311_s19, 4  ;;  %s43_s18 = int_to_ptr.vmem [resolvable:$true] %s42_s18  ;;  %s65_s20 = int_to_ptr.vmem [resolvable:$true] %s64_s20 }
   0x7   :  { %s8078_s23 = scalar_lea.hbm %s9814_s2, 16 }
   0x8   :  { %p8079_p0 = scmp.ne.s32.totalorder %s9814_s2, %s8078_s23  ;;  %p8082_p1 = scmp.lt.u32.totalorder %s8078_s23, %s9814_s2 }
   0xa   :  { %p8084_p2 = pnand %p8082_p1, %p8079_p0 }
   0xc   :  { %8087 = shalt.err (!%p8084_p2)
}
   0xd   :  { %s8088_s28 = scalar_lea.vmem %s43_s18, 16  ;;  %s8092_s29 = scalar_lea.vmem %s43_s18, 32 }
   0xe   :  { %p8089_p3 = scmp.ne.s32.totalorder %s43_s18, %s8088_s28  ;;  %p8093_p4 = scmp.lt.s32.totalorder %s43_s18, %s43_s18 }
   0xf   :  { %p8094_p5 = scmp.lt.s32.totalorder %s8092_s29, %s8088_s28 }
  0x11   :  { %p8095_p6 = por %p8094_p5, %p8093_p4 }
  0x13   :  { %p8096_p7 = pnand %p8095_p6, %p8089_p3 }
  0x15   :  { %8099 = shalt.err (!%p8096_p7)
}
  0x16   :  { %45 = dma.hbm_to_vmem [thread:$0]  %s9814_s2, 16, %s43_s18, [#allocation8]  }
  0x17   :  { %s8100_s15 = scalar_lea.hbm %s9816_s4, 16 }
  0x18   :  { %p8101_p8 = scmp.ne.s32.totalorder %s9816_s4, %s8100_s15  ;;  %p8104_p9 = scmp.lt.u32.totalorder %s8100_s15, %s9816_s4 }
  0x1a   :  { %p8106_p10 = pnand %p8104_p9, %p8101_p8 }
  0x1c   :  { %8109 = shalt.err (!%p8106_p10)
}
  0x1d   :  { %s8110_s22 = scalar_lea.vmem %s65_s20, 16  ;;  %s8114_s23 = scalar_lea.vmem %s65_s20, 32 }
  0x1e   :  { %p8111_p11 = scmp.ne.s32.totalorder %s65_s20, %s8110_s22  ;;  %p8115_p12 = scmp.lt.s32.totalorder %s65_s20, %s65_s20 }
  0x1f   :  { %p8116_p13 = scmp.lt.s32.totalorder %s8114_s23, %s8110_s22 }
  0x21   :  { %p8117_p0 = por %p8116_p13, %p8115_p12 }
  0x23   :  { %p8118_p1 = pnand %p8117_p0, %p8111_p11 }
  0x25   :  { %8121 = shalt.err (!%p8118_p1)
}
  0x26   :  { %67 = dma.hbm_to_vmem [thread:$0]  %s9816_s4, 16, %s65_s20, [#allocation11]  }
  0x27   :  { %s8312_s24 = smov [#allocation13]   ;;  %s8313_s26 = smov [#allocation16]  }
  0x28   :  { %s86_s25 = sshll.u32 %s8312_s24, 4  ;;  %s108_s27 = sshll.u32 %s8313_s26, 4  ;;  %s87_s25 = int_to_ptr.vmem [resolvable:$true] %s86_s25  ;;  %s109_s27 = int_to_ptr.vmem [resolvable:$true] %s108_s27 }
  0x29   :  { %s8122_s30 = scalar_lea.hbm %s9818_s6, 64 }
  0x2a   :  { %p8123_p2 = scmp.ne.s32.totalorder %s9818_s6, %s8122_s30  ;;  %p8126_p3 = scmp.lt.u32.totalorder %s8122_s30, %s9818_s6 }
  0x2c   :  { %p8128_p4 = pnand %p8126_p3, %p8123_p2 }
  0x2e   :  { %8131 = shalt.err (!%p8128_p4)
}
  0x2f   :  { %s8132_s4 = scalar_lea.vmem %s87_s25, 64  ;;  %p8137_p6 = scmp.lt.s32.totalorder %s87_s25, %s87_s25 }
  0x30   :  { %p8133_p5 = scmp.ne.s32.totalorder %s87_s25, %s8132_s4  ;;  %p8138_p7 = scmp.lt.s32.totalorder %s8132_s4, %s8132_s4 }
  0x32   :  { %p8139_p8 = por %p8138_p7, %p8137_p6 }
  0x34   :  { %p8140_p9 = pnand %p8139_p8, %p8133_p5 }
  0x36   :  { %8143 = shalt.err (!%p8140_p9)
}
  0x37   :  { %89 = dma.hbm_to_vmem [thread:$0]  %s9818_s6, 64, %s87_s25, [#allocation14]  }
  0x38   :  { %s8144_s21 = scalar_lea.hbm %s9820_s8, 64 }
  0x39   :  { %p8145_p10 = scmp.ne.s32.totalorder %s9820_s8, %s8144_s21  ;;  %p8148_p11 = scmp.lt.u32.totalorder %s8144_s21, %s9820_s8 }
  0x3b   :  { %p8150_p12 = pnand %p8148_p11, %p8145_p10 }
  0x3d   :  { %8153 = shalt.err (!%p8150_p12)
}
  0x3e   :  { %s8154_s24 = scalar_lea.vmem %s109_s27, 64  ;;  %p8159_p0 = scmp.lt.s32.totalorder %s109_s27, %s109_s27 }
  0x3f   :  { %p8155_p13 = scmp.ne.s32.totalorder %s109_s27, %s8154_s24  ;;  %p8160_p1 = scmp.lt.s32.totalorder %s8154_s24, %s8154_s24 }
  0x41   :  { %p8161_p2 = por %p8160_p1, %p8159_p0 }
  0x43   :  { %p8162_p3 = pnand %p8161_p2, %p8155_p13 }
  0x45   :  { %8165 = shalt.err (!%p8162_p3)
}
  0x46   :  { %111 = dma.hbm_to_vmem [thread:$0]  %s9820_s8, 64, %s109_s27, [#allocation17]  }
  0x47   :  { %s8314_s26 = smov [#allocation4]   ;;  %s8166_s12 = scalar_lea.hbm %s9813_s1, 512 }
  0x48   :  { %s29_s28 = sshll.u32 %s8314_s26, 4  ;;  %p8167_p4 = scmp.ne.s32.totalorder %s9813_s1, %s8166_s12  ;;  %s30_s28 = int_to_ptr.vmem [resolvable:$true] %s29_s28 }
  0x49   :  { %p8170_p5 = scmp.lt.u32.totalorder %s8166_s12, %s9813_s1 }
  0x4b   :  { %p8172_p6 = pnand %p8170_p5, %p8167_p4 }
  0x4d   :  { %8175 = shalt.err (!%p8172_p6)
}
  0x4e   :  { %s8176_s20 = scalar_lea.vmem %s30_s28, 512  ;;  %p8181_p8 = scmp.lt.s32.totalorder %s30_s28, %s30_s28 }
  0x4f   :  { %p8177_p7 = scmp.ne.s32.totalorder %s30_s28, %s8176_s20  ;;  %p8182_p9 = scmp.lt.s32.totalorder %s8176_s20, %s8176_s20 }
  0x51   :  { %p8183_p10 = por %p8182_p9, %p8181_p8 }
  0x53   :  { %p8184_p11 = pnand %p8183_p10, %p8177_p7 }
  0x55   :  { %8187 = shalt.err (!%p8184_p11)
}
  0x56   :  { %s8315_s8 = smov 128   ;;  %s8316_s27 = smov 8  }
  0x57   :  { %35 = dma.hbm_to_vmem [thread:$0]  %s9813_s1, 512, %s30_s28, [#allocation5], %s8315_s8, %s8315_s8, %s8316_s27  }
  0x58   :  { %s8317_s19 = smov [#allocation9]   ;;  %s8318_s22 = smov [#allocation12]  }
  0x59   :  { %s51_s21 = sshll.u32 %s8317_s19, 4  ;;  %s73_s23 = sshll.u32 %s8318_s22, 4  ;;  %s52_s21 = int_to_ptr.vmem [resolvable:$true] %s51_s21  ;;  %s74_s23 = int_to_ptr.vmem [resolvable:$true] %s73_s23 }
  0x5a   :  { %s8188_s24 = scalar_lea.hbm %s9815_s3, 4608 }
  0x5b   :  { %p8189_p12 = scmp.ne.s32.totalorder %s9815_s3, %s8188_s24  ;;  %p8192_p13 = scmp.lt.u32.totalorder %s8188_s24, %s9815_s3 }
  0x5d   :  { %p8194_p0 = pnand %p8192_p13, %p8189_p12 }
  0x5f   :  { %8197 = shalt.err (!%p8194_p0)
}
  0x60   :  { %s8198_s1 = scalar_lea.vmem %s52_s21, 4608  ;;  %p8203_p2 = scmp.lt.s32.totalorder %s52_s21, %s52_s21 }
  0x61   :  { %p8199_p1 = scmp.ne.s32.totalorder %s52_s21, %s8198_s1  ;;  %p8204_p3 = scmp.lt.s32.totalorder %s8198_s1, %s8198_s1 }
  0x63   :  { %p8205_p4 = por %p8204_p3, %p8203_p2 }
  0x65   :  { %p8206_p5 = pnand %p8205_p4, %p8199_p1 }
  0x67   :  { %8209 = shalt.err (!%p8206_p5)
}
  0x68   :  { %57 = dma.hbm_to_vmem [thread:$0]  %s9815_s3, 4608, %s52_s21, [#allocation8], %s8315_s8, %s8315_s8, %s8316_s27  }
  0x69   :  { %s8210_s14 = scalar_lea.hbm %s9817_s5, 65536 }
  0x6a   :  { %p8211_p6 = scmp.ne.s32.totalorder %s9817_s5, %s8210_s14  ;;  %p8214_p7 = scmp.lt.u32.totalorder %s8210_s14, %s9817_s5 }
  0x6c   :  { %p8216_p8 = pnand %p8214_p7, %p8211_p6 }
  0x6e   :  { %8219 = shalt.err (!%p8216_p8)
}
  0x6f   :  { %s8220_s17 = scalar_lea.vmem %s74_s23, 65536  ;;  %p8225_p10 = scmp.lt.s32.totalorder %s74_s23, %s74_s23 }
  0x70   :  { %p8221_p9 = scmp.ne.s32.totalorder %s74_s23, %s8220_s17  ;;  %p8226_p11 = scmp.lt.s32.totalorder %s8220_s17, %s8220_s17 }
  0x72   :  { %p8227_p12 = por %p8226_p11, %p8225_p10 }
  0x74   :  { %p8228_p13 = pnand %p8227_p12, %p8221_p9 }
  0x76   :  { %8231 = shalt.err (!%p8228_p13)
}
  0x77   :  { %s8319_s3 = smov 512   ;;  %s8320_s8 = smov 32  }
  0x78   :  { %79 = dma.hbm_to_vmem [thread:$0]  %s9817_s5, 65536, %s74_s23, [#allocation11], %s8319_s3, %s8319_s3, %s8320_s8  }
  0x79   :  { %s8321_s21 = smov [#allocation15]   ;;  %s8322_s2 = smov [#allocation18]  }
  0x7a   :  { %s95_s22 = sshll.u32 %s8321_s21, 4  ;;  %s120_s18 = sshll.u32 %s8322_s2, 4  ;;  %s96_s22 = int_to_ptr.vmem [resolvable:$true] %s95_s22  ;;  %s121_s18 = int_to_ptr.vmem [resolvable:$true] %s120_s18 }
  0x7b   :  { %s8232_s25 = scalar_lea.hbm %s9819_s7, 8192 }
  0x7c   :  { %p8233_p0 = scmp.ne.s32.totalorder %s9819_s7, %s8232_s25  ;;  %p8236_p1 = scmp.lt.u32.totalorder %s8232_s25, %s9819_s7 }
  0x7e   :  { %p8238_p2 = pnand %p8236_p1, %p8233_p0 }
  0x80   :  { %8241 = shalt.err (!%p8238_p2)
}
  0x81   :  { %s8242_s5 = scalar_lea.vmem %s96_s22, 8192  ;;  %p8247_p4 = scmp.lt.s32.totalorder %s96_s22, %s96_s22 }
  0x82   :  { %p8243_p3 = scmp.ne.s32.totalorder %s96_s22, %s8242_s5  ;;  %p8248_p5 = scmp.lt.s32.totalorder %s8242_s5, %s8242_s5 }
  0x84   :  { %p8249_p6 = por %p8248_p5, %p8247_p4 }
  0x86   :  { %p8250_p7 = pnand %p8249_p6, %p8243_p3 }
  0x88   :  { %8253 = shalt.err (!%p8250_p7)
}
  0x89   :  { %101 = dma.hbm_to_vmem [thread:$0]  %s9819_s7, 8192, %s96_s22, [#allocation14], %s8319_s3, %s8319_s3, %s8320_s8  }
  0x8a   :  { %s8254_s14 = scalar_lea.hbm %s9822_s10, 16 }
  0x8b   :  { %p8255_p8 = scmp.ne.s32.totalorder %s9822_s10, %s8254_s14  ;;  %p8258_p9 = scmp.lt.u32.totalorder %s8254_s14, %s9822_s10 }
  0x8d   :  { %p8260_p10 = pnand %p8258_p9, %p8255_p8 }
  0x8f   :  { %8263 = shalt.err (!%p8260_p10)
}
  0x90   :  { %s8264_s17 = scalar_lea.vmem %s121_s18, 16  ;;  %s8268_s27 = scalar_lea.vmem %s121_s18, 32 }
  0x91   :  { %p8265_p11 = scmp.ne.s32.totalorder %s121_s18, %s8264_s17  ;;  %p8269_p12 = scmp.lt.s32.totalorder %s121_s18, %s121_s18 }
  0x92   :  { %p8270_p13 = scmp.lt.s32.totalorder %s8268_s27, %s8264_s17 }
  0x94   :  { %p8271_p0 = por %p8270_p13, %p8269_p12 }
  0x96   :  { %p8272_p1 = pnand %p8271_p0, %p8265_p11 }
  0x98   :  { %8275 = shalt.err (!%p8272_p1)
}
  0x99   :  { %123 = dma.hbm_to_vmem [thread:$0]  %s9822_s10, 16, %s121_s18, [#allocation17]  }
  0x9a   :  { %8298 = dma.done.wait [#allocation5], 512  }
  0x9b   :  { %8299 = vsyncadd [#allocation5], 4294966784 }
  0x9c   :  { %8300 = dma.done.wait [#allocation8], 4624  }
  0x9d   :  { %8301 = vsyncadd [#allocation8], 4294962672 }
  0x9e   :  { %8302 = dma.done.wait [#allocation11], 65552  }
  0x9f   :  { %8303 = vsyncadd [#allocation11], 4294901744 }
  0xa0   :  { %8304 = dma.done.wait [#allocation14], 8256  }
  0xa1   :  { %8305 = vsyncadd [#allocation14], 4294959040 }
  0xa2   :  { %8306 = dma.done.wait [#allocation17], 80  }
  0xa3   :  { %8307 = vsyncadd [#allocation17], 4294967216  ;;  %vm419_vm0 = vcmask 1042432   ;;  %vm226_vm1 = vcmask 220160   ;;  %v215_v0 = vld [vmem:[#allocation4] sm:$0xff]  ;;  %v216_v1 = vld [vmem:[#allocation4 + $0x8] sm:$0xff] }
  0xa4   :  { %v217_v2 = vld [vmem:[#allocation4 + $0x10] sm:$0xff]  ;;  %v7196_v3 = vpack.c.bf16 %v216_v1, %v215_v0  ;;  %v218_v4 = vld [vmem:[#allocation4 + $0x18] sm:$0x7]  ;;  %v151_v5 = vld [vmem:[%s9812_s0] sm:$0xff]  ;;  %vm8323_vm2 = vmmov 1   ;;  %vm872_vm4 = vcmask 261120  }
  0xa5   :  { %v7200_v6 = vpack.c.bf16 %v218_v4, %v217_v2  ;;  %vm7201_vm3 = vmpackc.low %vm419_vm0, %vm8323_vm2  ;;  %6777 = vmatprep.mubr.msk.f32.mxu0 %vm226_vm1, %v151_v5  ;;  %v152_v7 = vld [vmem:[%s9812_s0 + $0x8] sm:$0xff]  ;;  %v153_v8 = vld [vmem:[%s9812_s0 + $0x10] sm:$0xff]  ;;  %vm1128_vm5 = vcmask 1040384   ;;  %vm1194_vm6 = vcmask 1046528   ;;  %vm1594_vm7 = vcmask 1045504  }
  0xa6   :  { %7197 = vmatprep.subr.bf16.mxu0 %v7196_v3  ;;  %v154_v9 = vld [vmem:[%s9812_s0 + $0x18] sm:$0xff]  ;;  %v155_v10 = vld [vmem:[%s9812_s0 + $0x20] sm:$0xff]  ;;  %v156_v11 = vld [vmem:[%s9812_s0 + $0x28] sm:$0xff]  ;;  %vm2898_vm8 = vcmask 523264   ;;  %vm3038_vm9 = vcmask 1041409   ;;  %vm8326_vm10 = vmmov 0  }
  0xa7   :  { %7199 = vmatpush3.bf16.msra.mxu0 %v7196_v3  ;;  %v157_v12 = vld [vmem:[%s9812_s0 + $0x30] sm:$0xff]  ;;  %v158_v13 = vld [vmem:[%s9812_s0 + $0x38] sm:$0xff]  ;;  %v159_v14 = vld [vmem:[%s9812_s0 + $0x40] sm:$0xff]  ;;  %vm6243_vm11 = vcmask 17408  }
  0xa8   :  { %7202 = vmatprep.subr.msk.bf16.mxu0 %vm7201_vm3, %v7200_v6  ;;  %v160_v15 = vld [vmem:[%s9812_s0 + $0x48] sm:$0xff]  ;;  %v161_v16 = vld [vmem:[%s9812_s0 + $0x50] sm:$0xff]  ;;  %v162_v17 = vld [vmem:[%s9812_s0 + $0x58] sm:$0xff] }
  0xa9   :  { %v163_v18 = vld [vmem:[%s9812_s0 + $0x60] sm:$0xff]  ;;  %v164_v19 = vld [vmem:[%s9812_s0 + $0x68] sm:$0xff]  ;;  %v165_v20 = vld [vmem:[%s9812_s0 + $0x70] sm:$0xff] }
  0xaa   :  { %v166_v21 = vld [vmem:[%s9812_s0 + $0x78] sm:$0xff]  ;;  %v167_v22 = vld [vmem:[%s9812_s0 + $0x80] sm:$0xff]  ;;  %v168_v23 = vld [vmem:[%s9812_s0 + $0x88] sm:$0xff] }
  0xab   :  { %7205 = vmatpush3.bf16.msk.msra.mxu0 %vm7201_vm3, %v7200_v6  ;;  %v169_v24 = vld [vmem:[%s9812_s0 + $0x90] sm:$0xff]  ;;  %v170_v25 = vld [vmem:[%s9812_s0 + $0x98] sm:$0xff]  ;;  %v171_v26 = vld [vmem:[%s9812_s0 + $0xa0] sm:$0xff]  ;;  %v9824_v6 = vmov 0.0  }
  0xac   :  { %v172_v27 = vld [vmem:[%s9812_s0 + $0xa8] sm:$0xff]  ;;  %v173_v28 = vld [vmem:[%s9812_s0 + $0xb0] sm:$0xff]  ;;  %v174_v29 = vld [vmem:[%s9812_s0 + $0xb8] sm:$0xff] }
  0xad   :  { %v175_v30 = vld [vmem:[%s9812_s0 + $0xc0] sm:$0xff]  ;;  %v176_v31 = vld [vmem:[%s9812_s0 + $0xc8] sm:$0xff]  ;;  %v177_v32 = vld [vmem:[%s9812_s0 + $0xd0] sm:$0xff] }
  0xae   :  { %6778 = vmatmul.mubr.msk.f32.vlgmr.msra.gmra.mrb[0].mxu0 %vm226_vm1, %v152_v7  ;;  %v178_v33 = vld [vmem:[%s9812_s0 + $0xd8] sm:$0xff]  ;;  %v179_v34 = vld [vmem:[%s9812_s0 + $0xe0] sm:$0xff]  ;;  %v180_v35 = vld [vmem:[%s9812_s0 + $0xe8] sm:$0xff]  ;;  %v8728_v7 = vrot.slane %v9824_v6, 1 }
  0xaf   :  { %6780 = vmatprep.mubr.msk.f32.mxu0 %vm226_vm1, %v153_v8  ;;  %v181_v36 = vld [vmem:[%s9812_s0 + $0xf0] sm:$0xff]  ;;  %v182_v37 = vld [vmem:[%s9812_s0 + $0xf8] sm:$0xff]  ;;  %v183_v38 = vld [vmem:[%s9812_s0 + $0x100] sm:$0xff] }
  0xb0   :  { %v184_v39 = vld [vmem:[%s9812_s0 + $0x108] sm:$0xff]  ;;  %v185_v40 = vld [vmem:[%s9812_s0 + $0x110] sm:$0xff]  ;;  %v186_v41 = vld [vmem:[%s9812_s0 + $0x118] sm:$0xff]  ;;  %6881 = vmatprep.mubr.msk.f32.mxu1 %vm872_vm4, %v8728_v7 }
  0xb1   :  { %v187_v42 = vld [vmem:[%s9812_s0 + $0x120] sm:$0xff]  ;;  %v188_v43 = vld [vmem:[%s9812_s0 + $0x128] sm:$0xff]  ;;  %v189_v44 = vld [vmem:[%s9812_s0 + $0x130] sm:$0xff] }
  0xb2   :  { %6781 = vmatmul.mubr.msk.f32.gmra.mrb[2].mxu0 %vm226_vm1, %v154_v9  ;;  %v190_v45 = vld [vmem:[%s9812_s0 + $0x138] sm:$0xff]  ;;  %v191_v46 = vld [vmem:[%s9812_s0 + $0x140] sm:$0xff]  ;;  %v192_v47 = vld [vmem:[%s9812_s0 + $0x148] sm:$0xff] }
  0xb3   :  { %6783 = vmatprep.mubr.msk.f32.mxu0 %vm226_vm1, %v155_v10  ;;  %v193_v48 = vld [vmem:[%s9812_s0 + $0x150] sm:$0xff]  ;;  %v194_v49 = vld [vmem:[%s9812_s0 + $0x158] sm:$0xff]  ;;  %v195_v50 = vld [vmem:[%s9812_s0 + $0x160] sm:$0xff] }
  0xb4   :  { %v196_v51 = vld [vmem:[%s9812_s0 + $0x168] sm:$0xff]  ;;  %v197_v52 = vld [vmem:[%s9812_s0 + $0x170] sm:$0xff]  ;;  %v198_v53 = vld [vmem:[%s9812_s0 + $0x178] sm:$0xff] }
  0xb5   :  { %v199_v54 = vld [vmem:[%s9812_s0 + $0x180] sm:$0xff]  ;;  %v200_v55 = vld [vmem:[%s9812_s0 + $0x188] sm:$0xff]  ;;  %v201_v56 = vld [vmem:[%s9812_s0 + $0x190] sm:$0xff] }
  0xb6   :  { %6784 = vmatmul.mubr.msk.f32.gmra.mrb[4].mxu0 %vm226_vm1, %v156_v11  ;;  %v202_v57 = vld [vmem:[%s9812_s0 + $0x198] sm:$0xff]  ;;  %v203_v58 = vld [vmem:[%s9812_s0 + $0x1a0] sm:$0xff]  ;;  %v204_v59 = vld [vmem:[%s9812_s0 + $0x1a8] sm:$0xff] }
  0xb7   :  { %6786 = vmatprep.mubr.msk.f32.mxu0 %vm226_vm1, %v157_v12  ;;  %v1240_v60 = vld [vmem:[#allocation9 + $0x20] sm:$0xff]  ;;  %v1241_v61 = vld [vmem:[#allocation9 + $0x28] sm:$0xff]  ;;  %v206_v0 = vld [vmem:[%s9812_s0 + $0x1b8] sm:$0xff] }
  0xb8   :  { %v205_v62 = vld [vmem:[%s9812_s0 + $0x1b0] sm:$0xff]  ;;  %v7206_v63 = vpack.c.bf16 %v1241_v61, %v1240_v60  ;;  %v1243_v2 = vld [vmem:[#allocation9 + $0x38] sm:$0xff]  ;;  %v208_v5 = vld [vmem:[%s9812_s0 + $0x1c8] sm:$0xff] }
  0xb9   :  { %v1242_v1 = vld [vmem:[#allocation9 + $0x30] sm:$0xff]  ;;  %v207_v3 = vld [vmem:[%s9812_s0 + $0x1c0] sm:$0xff]  ;;  %v212_v11 = vld [vmem:[%s9812_s0 + $0x1e8] sm:$0xff] }
  0xba   :  { %6787 = vmatmul.mubr.msk.f32.gmra.mrb[6].mxu0 %vm226_vm1, %v158_v13  ;;  %7207 = vmatprep.subr.bf16.mxu1 %v7206_v63  ;;  %v7210_v4 = vpack.c.bf16 %v1243_v2, %v1242_v1  ;;  %v209_v8 = vld [vmem:[%s9812_s0 + $0x1d0] sm:$0xff]  ;;  %v210_v9 = vld [vmem:[%s9812_s0 + $0x1d8] sm:$0xff]  ;;  %v211_v10 = vld [vmem:[%s9812_s0 + $0x1e0] sm:$0xff] }
  0xbb   :  { %6789 = vmatprep.mubr.msk.f32.mxu0 %vm226_vm1, %v159_v14  ;;  %7209 = vmatpush3.bf16.msra.mxu1 %v7206_v63  ;;  %v213_v12 = vld [vmem:[%s9812_s0 + $0x1f0] sm:$0xff]  ;;  %v214_v13 = vld [vmem:[%s9812_s0 + $0x1f8] sm:$0xff]  ;;  %v1161_v14 = vld [vmem:[#allocation9] sm:$0xff] }
  0xbc   :  { %7211 = vmatprep.subr.bf16.mxu1 %v7210_v4 }
  0xbe   :  { %6790 = vmatmul.mubr.msk.f32.gmra.mrb[8].mxu0 %vm226_vm1, %v160_v15  ;;  %v1162_v15 = vld [vmem:[#allocation9 + $0x8] sm:$0xff] }
  0xbf   :  { %6792 = vmatprep.mubr.msk.f32.mxu0 %vm226_vm1, %v161_v16  ;;  %7213 = vmatpush3.bf16.msra.mxu1 %v7210_v4  ;;  %v8758_v16 = vpack.c.bf16 %v1162_v15, %v1161_v14 }
  0xc1   :  { %7215 = vmatprep.subr.bf16.mxu1 %v8758_v16 }
  0xc2   :  { %6793 = vmatmul.mubr.msk.f32.gmra.mrb[10].mxu0 %vm226_vm1, %v162_v17  ;;  %v8761_v17 = vld [vmem:[#allocation7] ss:$0 sm:$0xff] }
  0xc3   :  { %6795 = vmatprep.mubr.msk.f32.mxu0 %vm226_vm1, %v163_v18 }
  0xc6   :  { %6796 = vmatmul.mubr.msk.f32.gmra.mrb[12].mxu0 %vm226_vm1, %v164_v19 }
  0xc7   :  { %6798 = vmatprep.mubr.msk.f32.mxu0 %vm226_vm1, %v165_v20 }
  0xca   :  { %6799 = vmatmul.mubr.msk.f32.gmra.mrb[14].mxu0 %vm226_vm1, %v166_v21 }
  0xcb   :  { %6801 = vmatprep.mubr.msk.f32.mxu0 %vm226_vm1, %v167_v22 }
  0xce   :  { %6802 = vmatmul.mubr.msk.f32.gmra.mrb[16].mxu0 %vm226_vm1, %v168_v23 }
  0xcf   :  { %6804 = vmatprep.mubr.msk.f32.mxu0 %vm226_vm1, %v169_v24 }
  0xd2   :  { %6805 = vmatmul.mubr.msk.f32.gmra.mrb[18].mxu0 %vm226_vm1, %v170_v25 }
  0xd3   :  { %6807 = vmatprep.mubr.msk.f32.mxu0 %vm226_vm1, %v171_v26 }
  0xd6   :  { %6808 = vmatmul.mubr.msk.f32.gmra.mrb[20].mxu0 %vm226_vm1, %v172_v27 }
  0xd7   :  { %6810 = vmatprep.mubr.msk.f32.mxu0 %vm226_vm1, %v173_v28 }
  0xda   :  { %6811 = vmatmul.mubr.msk.f32.gmra.mrb[22].mxu0 %vm226_vm1, %v174_v29 }
  0xdb   :  { %6813 = vmatprep.mubr.msk.f32.mxu0 %vm226_vm1, %v175_v30 }
  0xde   :  { %6814 = vmatmul.mubr.msk.f32.gmra.mrb[24].mxu0 %vm226_vm1, %v176_v31 }
  0xdf   :  { %6816 = vmatprep.mubr.msk.f32.mxu0 %vm226_vm1, %v177_v32 }
  0xe2   :  { %6817 = vmatmul.mubr.msk.f32.gmra.mrb[26].mxu0 %vm226_vm1, %v178_v33 }
  0xe3   :  { %6819 = vmatprep.mubr.msk.f32.mxu0 %vm226_vm1, %v179_v34 }
  0xe6   :  { %6820 = vmatmul.mubr.msk.f32.gmra.mrb[28].mxu0 %vm226_vm1, %v180_v35 }
  0xe7   :  { %6822 = vmatprep.mubr.msk.f32.mxu0 %vm226_vm1, %v181_v36 }
  0xea   :  { %6823 = vmatmul.mubr.msk.f32.gmra.mrb[30].mxu0 %vm226_vm1, %v182_v37 }
  0xeb   :  { %6825 = vmatprep.mubr.msk.f32.mxu0 %vm226_vm1, %v183_v38 }
  0xee   :  { %6826 = vmatmul.mubr.msk.f32.gmra.mrb[32].mxu0 %vm226_vm1, %v184_v39 }
  0xef   :  { %6828 = vmatprep.mubr.msk.f32.mxu0 %vm226_vm1, %v185_v40 }
  0xf2   :  { %6829 = vmatmul.mubr.msk.f32.gmra.mrb[34].mxu0 %vm226_vm1, %v186_v41 }
  0xf3   :  { %6831 = vmatprep.mubr.msk.f32.mxu0 %vm226_vm1, %v187_v42 }
  0xf6   :  { %6832 = vmatmul.mubr.msk.f32.gmra.mrb[36].mxu0 %vm226_vm1, %v188_v43 }
  0xf7   :  { %6834 = vmatprep.mubr.msk.f32.mxu0 %vm226_vm1, %v189_v44 }
  0xfa   :  { %6835 = vmatmul.mubr.msk.f32.gmra.mrb[38].mxu0 %vm226_vm1, %v190_v45 }
  0xfb   :  { %6837 = vmatprep.mubr.msk.f32.mxu0 %vm226_vm1, %v191_v46 }
  0xfe   :  { %6838 = vmatmul.mubr.msk.f32.gmra.mrb[40].mxu0 %vm226_vm1, %v192_v47 }
  0xff   :  { %6840 = vmatprep.mubr.msk.f32.mxu0 %vm226_vm1, %v193_v48 }
 0x102   :  { %6841 = vmatmul.mubr.msk.f32.gmra.mrb[42].mxu0 %vm226_vm1, %v194_v49 }
 0x103   :  { %6843 = vmatprep.mubr.msk.f32.mxu0 %vm226_vm1, %v195_v50 }
 0x106   :  { %6844 = vmatmul.mubr.msk.f32.gmra.mrb[44].mxu0 %vm226_vm1, %v196_v51 }
 0x107   :  { %6846 = vmatprep.mubr.msk.f32.mxu0 %vm226_vm1, %v197_v52 }
 0x10a   :  { %6847 = vmatmul.mubr.msk.f32.gmra.mrb[46].mxu0 %vm226_vm1, %v198_v53 }
 0x10b   :  { %6849 = vmatprep.mubr.msk.f32.mxu0 %vm226_vm1, %v199_v54 }
 0x10e   :  { %6850 = vmatmul.mubr.msk.f32.gmra.mrb[48].mxu0 %vm226_vm1, %v200_v55 }
 0x10f   :  { %6852 = vmatprep.mubr.msk.f32.mxu0 %vm226_vm1, %v201_v56 }
 0x112   :  { %6853 = vmatmul.mubr.msk.f32.gmra.mrb[50].mxu0 %vm226_vm1, %v202_v57 }
 0x113   :  { %6855 = vmatprep.mubr.msk.f32.mxu0 %vm226_vm1, %v203_v58 }
 0x116   :  { %6856 = vmatmul.mubr.msk.f32.gmra.mrb[52].mxu0 %vm226_vm1, %v204_v59 }
 0x117   :  { %6858 = vmatprep.mubr.msk.f32.mxu0 %vm226_vm1, %v205_v62 }
 0x11a   :  { %6859 = vmatmul.mubr.msk.f32.gmra.mrb[54].mxu0 %vm226_vm1, %v206_v0 }
 0x11b   :  { %6861 = vmatprep.mubr.msk.f32.mxu0 %vm226_vm1, %v207_v3 }
 0x11e   :  { %6862 = vmatmul.mubr.msk.f32.gmra.mrb[56].mxu0 %vm226_vm1, %v208_v5 }
 0x11f   :  { %6864 = vmatprep.mubr.msk.f32.mxu0 %vm226_vm1, %v209_v8 }
 0x122   :  { %6865 = vmatmul.mubr.msk.f32.gmra.mrb[58].mxu0 %vm226_vm1, %v210_v9 }
 0x123   :  { %6867 = vmatprep.mubr.msk.f32.mxu0 %vm226_vm1, %v211_v10 }
 0x126   :  { %6868 = vmatmul.mubr.msk.f32.gmra.mrb[60].mxu0 %vm226_vm1, %v212_v11 }
 0x127   :  { %6870 = vmatprep.mubr.msk.f32.mxu0 %vm226_vm1, %v213_v12 }
 0x12a   :  { %6871 = vmatmul.mubr.msk.f32.gmra.mrb[62].mxu0 %vm226_vm1, %v214_v13 }
 0x12b   :  { %3106 = vmatprep.mubr.f32.mxu0 %v9824_v6 }
 0x181   :  { %v6779_v18 = vpop.f32.mrb[0].mxu0 }
 0x182   :  { %v495_v19 = vadd.f32 %v6779_v18, %v8761_v17  ;;  %v489_v20 = vpop.f32.mrb[1].mxu0  ;;  %v1163_v18 = vld [vmem:[#allocation9 + $0x10] sm:$0xff] }
 0x183   :  { %v490_v21 = vadd.f32 %v8761_v17, %v489_v20 }
 0x184   :  { %v809_v23 = vmax.f32 %v495_v19, 0.0  ;;  %v1164_v19 = vld [vmem:[#allocation9 + $0x18] sm:$0xff] }
 0x185   :  { %v6782_v22 = vpop.f32.mrb[2].mxu0  ;;  %v808_v26 = vmax.f32 %v490_v21, 0.0 }
 0x186   :  { %v505_v24 = vadd.f32 %v6782_v22, %v8761_v17  ;;  %v499_v25 = vpop.f32.mrb[3].mxu0  ;;  %v876_v31 = vsel %vm872_vm4, %v809_v23, -inf }
 0x187   :  { %v500_v27 = vadd.f32 %v8761_v17, %v499_v25  ;;  %v873_v35 = vsel %vm872_vm4, %v808_v26, -inf }
 0x188   :  { %v811_v28 = vmax.f32 %v505_v24, 0.0 }
 0x189   :  { %v810_v29 = vmax.f32 %v500_v27, 0.0  ;;  %v6785_v30 = vpop.f32.mrb[4].mxu0 }
 0x18a   :  { %v877_v32 = vsel %vm872_vm4, %v811_v28, -inf  ;;  %v515_v33 = vadd.f32 %v6785_v30, %v8761_v17  ;;  %v509_v34 = vpop.f32.mrb[5].mxu0 }
 0x18b   :  { %v878_v36 = vmax.f32 %v876_v31, %v877_v32  ;;  %v874_v37 = vsel %vm872_vm4, %v810_v29, -inf  ;;  %v510_v38 = vadd.f32 %v8761_v17, %v509_v34  ;;  %v7218_v31 = vpack.c.bf16 %v1164_v19, %v1163_v18 }
 0x18c   :  { %v875_v39 = vmax.f32 %v873_v35, %v874_v37  ;;  %v813_v41 = vmax.f32 %v515_v33, 0.0  ;;  %v1641_v37 = vld [vmem:[#allocation9 + $0x48] sm:$0xff] }
 0x18d   :  { %970 = vst.msk [vmem:[#allocation2 + $0x8] sm:$0xff] %vm872_vm4, %v878_v36  ;;  %v6788_v40 = vpop.f32.mrb[6].mxu0  ;;  %v812_v44 = vmax.f32 %v510_v38, 0.0  ;;  %v1640_v36 = vld [vmem:[#allocation9 + $0x40] sm:$0xff] }
 0x18e   :  { %969 = vst.msk [vmem:[#allocation2] sm:$0xff] %vm872_vm4, %v875_v39  ;;  %v525_v42 = vadd.f32 %v6788_v40, %v8761_v17  ;;  %v519_v43 = vpop.f32.mrb[7].mxu0  ;;  %v882_v49 = vsel %vm872_vm4, %v813_v41, -inf }
 0x18f   :  { %v520_v45 = vadd.f32 %v8761_v17, %v519_v43  ;;  %v879_v53 = vsel %vm872_vm4, %v812_v44, -inf }
 0x190   :  { %v815_v46 = vmax.f32 %v525_v42, 0.0 }
 0x191   :  { %v814_v47 = vmax.f32 %v520_v45, 0.0  ;;  %v6791_v48 = vpop.f32.mrb[8].mxu0  ;;  %v8813_v45 = vpack.c.bf16 %v1641_v37, %v1640_v36 }
 0x192   :  { %v883_v50 = vsel %vm872_vm4, %v815_v46, -inf  ;;  %v535_v51 = vadd.f32 %v6791_v48, %v8761_v17  ;;  %v529_v52 = vpop.f32.mrb[9].mxu0 }
 0x193   :  { %v884_v54 = vmax.f32 %v882_v49, %v883_v50  ;;  %v880_v55 = vsel %vm872_vm4, %v814_v47, -inf  ;;  %v530_v56 = vadd.f32 %v8761_v17, %v529_v52 }
 0x194   :  { %v881_v57 = vmax.f32 %v879_v53, %v880_v55  ;;  %v817_v58 = vmax.f32 %v535_v51, 0.0 }
 0x195   :  { %972 = vst.msk [vmem:[#allocation2 + $0x18] sm:$0xff] %vm872_vm4, %v884_v54  ;;  %v816_v59 = vmax.f32 %v530_v56, 0.0  ;;  %v6794_v60 = vpop.f32.mrb[10].mxu0  ;;  %v1001_v61 = vld [vmem:[#allocation2] ss:$2 sm:$0xff] }
 0x196   :  { %v1033_v62 = vld [vmem:[#allocation2 + $0x1] ss:$2 sm:$0xff]  ;;  %971 = vst.msk [vmem:[#allocation2 + $0x10] sm:$0xff] %vm872_vm4, %v881_v57  ;;  %v545_v63 = vadd.f32 %v6794_v60, %v8761_v17  ;;  %v539_v0 = vpop.f32.mrb[11].mxu0  ;;  %v888_v5 = vsel %vm872_vm4, %v817_v58, -inf }
 0x197   :  { %v1064_v1 = vmax.f32 %v1001_v61, %v1033_v62  ;;  %v540_v2 = vadd.f32 %v8761_v17, %v539_v0  ;;  %v885_v8 = vsel %vm872_vm4, %v816_v59, -inf }
 0x198   :  { %v819_v3 = vmax.f32 %v545_v63, 0.0 }
 0x199   :  { %v1096_v4 = vrot.slane %v1064_v1, 7  ;;  %v818_v9 = vmax.f32 %v540_v2, 0.0  ;;  %v6797_v10 = vpop.f32.mrb[12].mxu0 }
 0x19a   :  { %v889_v11 = vsel %vm872_vm4, %v819_v3, -inf  ;;  %v555_v12 = vadd.f32 %v6797_v10, %v8761_v17  ;;  %v549_v13 = vpop.f32.mrb[13].mxu0 }
 0x19b   :  { %v8792_v14 = vsel %vm1128_vm5, 0.0, %v1096_v4  ;;  %v8795_v15 = vsel %vm1128_vm5, %v1096_v4, 0.0  ;;  %v890_v20 = vmax.f32 %v888_v5, %v889_v11  ;;  %v886_v21 = vsel %vm872_vm4, %v818_v9, -inf }
 0x19c   :  { %v550_v22 = vadd.f32 %v8761_v17, %v549_v13  ;;  %v1197_v23 = vrot.slane %v8792_v14, 1  ;;  %v887_v24 = vmax.f32 %v885_v8, %v886_v21  ;;  %v821_v25 = vmax.f32 %v555_v12, 0.0 }
 0x19d   :  { %v1198_v26 = vrot.slane %v8795_v15, 1  ;;  %974 = vst.msk [vmem:[#allocation2 + $0x28] sm:$0xff] %vm872_vm4, %v890_v20  ;;  %v6800_v28 = vpop.f32.mrb[14].mxu0  ;;  %v1003_v29 = vld [vmem:[#allocation2 + $0x10] ss:$2 sm:$0xff] }
 0x19e   :  { %v820_v27 = vmax.f32 %v550_v22, 0.0  ;;  %v1035_v30 = vld [vmem:[#allocation2 + $0x11] ss:$2 sm:$0xff]  ;;  %973 = vst.msk [vmem:[#allocation2 + $0x20] sm:$0xff] %vm872_vm4, %v887_v24  ;;  %v565_v32 = vadd.f32 %v6800_v28, %v8761_v17  ;;  %v559_v33 = vpop.f32.mrb[15].mxu0  ;;  %v894_v41 = vsel %vm872_vm4, %v821_v25, -inf }
 0x19f   :  { %v8805_v34 = vsel %vm1194_vm6, %v1197_v23, %v1198_v26  ;;  %v1065_v35 = vmax.f32 %v1003_v29, %v1035_v30  ;;  %v560_v38 = vadd.f32 %v8761_v17, %v559_v33 }
 0x1a0   :  { %6882 = vmatmul.mubr.msk.f32.vlgmr.msra.gmra.mrb[0].mxu1 %vm872_vm4, %v8805_v34  ;;  %v823_v39 = vmax.f32 %v565_v32, 0.0  ;;  %v891_v42 = vsel %vm872_vm4, %v820_v27, -inf }
 0x1a1   :  { %v1097_v40 = vrot.slane %v1065_v35, 7  ;;  %7217 = vmatpush3.bf16.msra.mxu1 %v8758_v16  ;;  %v822_v43 = vmax.f32 %v560_v38, 0.0  ;;  %v6803_v44 = vpop.f32.mrb[16].mxu0 }
 0x1a2   :  { %7219 = vmatprep.subr.bf16.mxu1 %v7218_v31  ;;  %v895_v46 = vsel %vm872_vm4, %v823_v39, -inf  ;;  %v575_v47 = vadd.f32 %v6803_v44, %v8761_v17  ;;  %v569_v48 = vpop.f32.mrb[17].mxu0 }
 0x1a3   :  { %v8818_v49 = vsel %vm1128_vm5, 0.0, %v1097_v40  ;;  %v8821_v50 = vsel %vm1128_vm5, %v1097_v40, 0.0  ;;  %v896_v16 = vmax.f32 %v894_v41, %v895_v46  ;;  %v892_v51 = vsel %vm872_vm4, %v822_v43, -inf }
 0x1a4   :  { %v570_v52 = vadd.f32 %v8761_v17, %v569_v48  ;;  %v1200_v53 = vrot.slane %v8818_v49, 1  ;;  %v893_v54 = vmax.f32 %v891_v42, %v892_v51  ;;  %v825_v55 = vmax.f32 %v575_v47, 0.0 }
 0x1a5   :  { %v1201_v56 = vrot.slane %v8821_v50, 1  ;;  %7221 = vmatpush3.bf16.msra.mxu1 %v7218_v31  ;;  %976 = vst.msk [vmem:[#allocation2 + $0x38] sm:$0xff] %vm872_vm4, %v896_v16  ;;  %v6806_v58 = vpop.f32.mrb[18].mxu0  ;;  %v1005_v59 = vld [vmem:[#allocation2 + $0x20] ss:$2 sm:$0xff] }
 0x1a6   :  { %v824_v57 = vmax.f32 %v570_v52, 0.0  ;;  %v1037_v60 = vld [vmem:[#allocation2 + $0x21] ss:$2 sm:$0xff]  ;;  %7223 = vmatprep.subr.bf16.mxu1 %v8813_v45  ;;  %975 = vst.msk [vmem:[#allocation2 + $0x30] sm:$0xff] %vm872_vm4, %v893_v54  ;;  %v585_v61 = vadd.f32 %v6806_v58, %v8761_v17  ;;  %v579_v62 = vpop.f32.mrb[19].mxu0  ;;  %v900_v4 = vsel %vm872_vm4, %v825_v55, -inf }
 0x1a7   :  { %v8832_v63 = vsel %vm1194_vm6, %v1200_v53, %v1201_v56  ;;  %v1066_v0 = vmax.f32 %v1005_v59, %v1037_v60  ;;  %v580_v1 = vadd.f32 %v8761_v17, %v579_v62 }
 0x1a8   :  { %6884 = vmatprep.mubr.msk.f32.mxu1 %vm872_vm4, %v8832_v63  ;;  %v827_v2 = vmax.f32 %v585_v61, 0.0  ;;  %v897_v5 = vsel %vm872_vm4, %v824_v57, -inf }
 0x1a9   :  { %v1098_v3 = vrot.slane %v1066_v0, 7  ;;  %v826_v8 = vmax.f32 %v580_v1, 0.0  ;;  %v6809_v9 = vpop.f32.mrb[20].mxu0 }
 0x1aa   :  { %v901_v10 = vsel %vm872_vm4, %v827_v2, -inf  ;;  %v595_v11 = vadd.f32 %v6809_v9, %v8761_v17  ;;  %v589_v12 = vpop.f32.mrb[21].mxu0 }
 0x1ab   :  { %v8842_v13 = vsel %vm1128_vm5, 0.0, %v1098_v3  ;;  %v8845_v18 = vsel %vm1128_vm5, %v1098_v3, 0.0  ;;  %v902_v19 = vmax.f32 %v900_v4, %v901_v10  ;;  %v898_v20 = vsel %vm872_vm4, %v826_v8, -inf }
 0x1ac   :  { %v590_v21 = vadd.f32 %v8761_v17, %v589_v12  ;;  %v1203_v22 = vrot.slane %v8842_v13, 1  ;;  %v899_v23 = vmax.f32 %v897_v5, %v898_v20  ;;  %v829_v24 = vmax.f32 %v595_v11, 0.0 }
 0x1ad   :  { %v1204_v25 = vrot.slane %v8845_v18, 1  ;;  %978 = vst.msk [vmem:[#allocation2 + $0x48] sm:$0xff] %vm872_vm4, %v902_v19  ;;  %v6812_v27 = vpop.f32.mrb[22].mxu0  ;;  %v1007_v28 = vld [vmem:[#allocation2 + $0x30] ss:$2 sm:$0xff] }
 0x1ae   :  { %v828_v26 = vmax.f32 %v590_v21, 0.0  ;;  %v1039_v29 = vld [vmem:[#allocation2 + $0x31] ss:$2 sm:$0xff]  ;;  %977 = vst.msk [vmem:[#allocation2 + $0x40] sm:$0xff] %vm872_vm4, %v899_v23  ;;  %v605_v30 = vadd.f32 %v6812_v27, %v8761_v17  ;;  %v599_v31 = vpop.f32.mrb[23].mxu0  ;;  %v906_v38 = vsel %vm872_vm4, %v829_v24, -inf }
 0x1af   :  { %v8855_v32 = vsel %vm1194_vm6, %v1203_v22, %v1204_v25  ;;  %v1067_v33 = vmax.f32 %v1007_v28, %v1039_v29  ;;  %v600_v35 = vadd.f32 %v8761_v17, %v599_v31 }
 0x1b0   :  { %6885 = vmatmul.mubr.msk.f32.gmra.mrb[2].mxu1 %vm872_vm4, %v8855_v32  ;;  %v831_v36 = vmax.f32 %v605_v30, 0.0  ;;  %v903_v39 = vsel %vm872_vm4, %v828_v26, -inf }
 0x1b1   :  { %v1099_v37 = vrot.slane %v1067_v33, 7  ;;  %v830_v40 = vmax.f32 %v600_v35, 0.0  ;;  %v6815_v41 = vpop.f32.mrb[24].mxu0 }
 0x1b2   :  { %v907_v42 = vsel %vm872_vm4, %v831_v36, -inf  ;;  %v615_v43 = vadd.f32 %v6815_v41, %v8761_v17  ;;  %v609_v44 = vpop.f32.mrb[25].mxu0 }
 0x1b3   :  { %v8865_v46 = vsel %vm1128_vm5, 0.0, %v1099_v37  ;;  %v8868_v47 = vsel %vm1128_vm5, %v1099_v37, 0.0  ;;  %v908_v48 = vmax.f32 %v906_v38, %v907_v42  ;;  %v904_v16 = vsel %vm872_vm4, %v830_v40, -inf }
 0x1b4   :  { %v610_v51 = vadd.f32 %v8761_v17, %v609_v44  ;;  %v1206_v52 = vrot.slane %v8865_v46, 1  ;;  %v905_v53 = vmax.f32 %v903_v39, %v904_v16  ;;  %v833_v54 = vmax.f32 %v615_v43, 0.0 }
 0x1b5   :  { %v1207_v55 = vrot.slane %v8868_v47, 1  ;;  %980 = vst.msk [vmem:[#allocation2 + $0x58] sm:$0xff] %vm872_vm4, %v908_v48  ;;  %v6818_v57 = vpop.f32.mrb[26].mxu0  ;;  %v1009_v58 = vld [vmem:[#allocation2 + $0x40] ss:$2 sm:$0xff] }
 0x1b6   :  { %v832_v56 = vmax.f32 %v610_v51, 0.0  ;;  %v1041_v59 = vld [vmem:[#allocation2 + $0x41] ss:$2 sm:$0xff]  ;;  %979 = vst.msk [vmem:[#allocation2 + $0x50] sm:$0xff] %vm872_vm4, %v905_v53  ;;  %v625_v60 = vadd.f32 %v6818_v57, %v8761_v17  ;;  %v619_v61 = vpop.f32.mrb[27].mxu0  ;;  %v912_v4 = vsel %vm872_vm4, %v833_v54, -inf }
 0x1b7   :  { %v8878_v62 = vsel %vm1194_vm6, %v1206_v52, %v1207_v55  ;;  %v1068_v0 = vmax.f32 %v1009_v58, %v1041_v59  ;;  %v620_v1 = vadd.f32 %v8761_v17, %v619_v61 }
 0x1b8   :  { %6887 = vmatprep.mubr.msk.f32.mxu1 %vm872_vm4, %v8878_v62  ;;  %v835_v2 = vmax.f32 %v625_v60, 0.0  ;;  %v909_v5 = vsel %vm872_vm4, %v832_v56, -inf }
 0x1b9   :  { %v1100_v3 = vrot.slane %v1068_v0, 7  ;;  %v834_v8 = vmax.f32 %v620_v1, 0.0  ;;  %v6821_v9 = vpop.f32.mrb[28].mxu0 }
 0x1ba   :  { %v913_v10 = vsel %vm872_vm4, %v835_v2, -inf  ;;  %v635_v11 = vadd.f32 %v6821_v9, %v8761_v17  ;;  %v629_v12 = vpop.f32.mrb[29].mxu0 }
 0x1bb   :  { %v8888_v19 = vsel %vm1128_vm5, 0.0, %v1100_v3  ;;  %v8891_v20 = vsel %vm1128_vm5, %v1100_v3, 0.0  ;;  %v914_v21 = vmax.f32 %v912_v4, %v913_v10  ;;  %v910_v22 = vsel %vm872_vm4, %v834_v8, -inf }
 0x1bc   :  { %v630_v23 = vadd.f32 %v8761_v17, %v629_v12  ;;  %v1209_v24 = vrot.slane %v8888_v19, 1  ;;  %v911_v25 = vmax.f32 %v909_v5, %v910_v22  ;;  %v837_v26 = vmax.f32 %v635_v11, 0.0 }
 0x1bd   :  { %v1210_v27 = vrot.slane %v8891_v20, 1  ;;  %982 = vst.msk [vmem:[#allocation2 + $0x68] sm:$0xff] %vm872_vm4, %v914_v21  ;;  %v6824_v29 = vpop.f32.mrb[30].mxu0  ;;  %v1011_v30 = vld [vmem:[#allocation2 + $0x50] ss:$2 sm:$0xff] }
 0x1be   :  { %v836_v28 = vmax.f32 %v630_v23, 0.0  ;;  %v1043_v31 = vld [vmem:[#allocation2 + $0x51] ss:$2 sm:$0xff]  ;;  %981 = vst.msk [vmem:[#allocation2 + $0x60] sm:$0xff] %vm872_vm4, %v911_v25  ;;  %v645_v33 = vadd.f32 %v6824_v29, %v8761_v17  ;;  %v639_v35 = vpop.f32.mrb[31].mxu0  ;;  %v918_v41 = vsel %vm872_vm4, %v837_v26, -inf }
 0x1bf   :  { %v8901_v36 = vsel %vm1194_vm6, %v1209_v24, %v1210_v27  ;;  %v1069_v37 = vmax.f32 %v1011_v30, %v1043_v31  ;;  %v640_v38 = vadd.f32 %v8761_v17, %v639_v35 }
 0x1c0   :  { %6888 = vmatmul.mubr.msk.f32.gmra.mrb[4].mxu1 %vm872_vm4, %v8901_v36  ;;  %v839_v39 = vmax.f32 %v645_v33, 0.0  ;;  %v915_v42 = vsel %vm872_vm4, %v836_v28, -inf }
 0x1c1   :  { %v1101_v40 = vrot.slane %v1069_v37, 7  ;;  %v838_v43 = vmax.f32 %v640_v38, 0.0  ;;  %v6827_v44 = vpop.f32.mrb[32].mxu0 }
 0x1c2   :  { %v919_v48 = vsel %vm872_vm4, %v839_v39, -inf  ;;  %v655_v16 = vadd.f32 %v6827_v44, %v8761_v17  ;;  %v649_v51 = vpop.f32.mrb[33].mxu0 }
 0x1c3   :  { %v8911_v52 = vsel %vm1128_vm5, 0.0, %v1101_v40  ;;  %v8914_v53 = vsel %vm1128_vm5, %v1101_v40, 0.0  ;;  %v920_v54 = vmax.f32 %v918_v41, %v919_v48  ;;  %v916_v55 = vsel %vm872_vm4, %v838_v43, -inf }
 0x1c4   :  { %v650_v56 = vadd.f32 %v8761_v17, %v649_v51  ;;  %v1212_v57 = vrot.slane %v8911_v52, 1  ;;  %v917_v58 = vmax.f32 %v915_v42, %v916_v55  ;;  %v841_v59 = vmax.f32 %v655_v16, 0.0 }
 0x1c5   :  { %v1213_v60 = vrot.slane %v8914_v53, 1  ;;  %984 = vst.msk [vmem:[#allocation2 + $0x78] sm:$0xff] %vm872_vm4, %v920_v54  ;;  %v6830_v0 = vpop.f32.mrb[34].mxu0  ;;  %v1013_v1 = vld [vmem:[#allocation2 + $0x60] ss:$2 sm:$0xff] }
 0x1c6   :  { %v840_v61 = vmax.f32 %v650_v56, 0.0  ;;  %v1045_v2 = vld [vmem:[#allocation2 + $0x61] ss:$2 sm:$0xff]  ;;  %983 = vst.msk [vmem:[#allocation2 + $0x70] sm:$0xff] %vm872_vm4, %v917_v58  ;;  %v665_v3 = vadd.f32 %v6830_v0, %v8761_v17  ;;  %v659_v4 = vpop.f32.mrb[35].mxu0  ;;  %v924_v12 = vsel %vm872_vm4, %v841_v59, -inf }
 0x1c7   :  { %v8924_v5 = vsel %vm1194_vm6, %v1212_v57, %v1213_v60  ;;  %v1070_v8 = vmax.f32 %v1013_v1, %v1045_v2  ;;  %v660_v9 = vadd.f32 %v8761_v17, %v659_v4 }
 0x1c8   :  { %6890 = vmatprep.mubr.msk.f32.mxu1 %vm872_vm4, %v8924_v5  ;;  %v843_v10 = vmax.f32 %v665_v3, 0.0  ;;  %v921_v21 = vsel %vm872_vm4, %v840_v61, -inf }
 0x1c9   :  { %v1102_v11 = vrot.slane %v1070_v8, 7  ;;  %v842_v22 = vmax.f32 %v660_v9, 0.0  ;;  %v6833_v23 = vpop.f32.mrb[36].mxu0 }
 0x1ca   :  { %v925_v24 = vsel %vm872_vm4, %v843_v10, -inf  ;;  %v675_v25 = vadd.f32 %v6833_v23, %v8761_v17  ;;  %v669_v26 = vpop.f32.mrb[37].mxu0 }
 0x1cb   :  { %v8934_v27 = vsel %vm1128_vm5, 0.0, %v1102_v11  ;;  %v8937_v28 = vsel %vm1128_vm5, %v1102_v11, 0.0  ;;  %v926_v29 = vmax.f32 %v924_v12, %v925_v24  ;;  %v922_v30 = vsel %vm872_vm4, %v842_v22, -inf }
 0x1cc   :  { %v670_v31 = vadd.f32 %v8761_v17, %v669_v26  ;;  %v1215_v33 = vrot.slane %v8934_v27, 1  ;;  %v923_v35 = vmax.f32 %v921_v21, %v922_v30  ;;  %v1216_v37 = vrot.slane %v8937_v28, 1 }
 0x1cd   :  { %986 = vst.msk [vmem:[#allocation2 + $0x88] sm:$0xff] %vm872_vm4, %v926_v29  ;;  %v6836_v38 = vpop.f32.mrb[38].mxu0  ;;  %v845_v39 = vmax.f32 %v675_v25, 0.0 }
 0x1ce   :  { %985 = vst.msk [vmem:[#allocation2 + $0x80] sm:$0xff] %vm872_vm4, %v923_v35  ;;  %v685_v40 = vadd.f32 %v6836_v38, %v8761_v17  ;;  %v679_v41 = vpop.f32.mrb[39].mxu0  ;;  %v8947_v42 = vsel %vm1194_vm6, %v1215_v33, %v1216_v37  ;;  %v844_v43 = vmax.f32 %v670_v31, 0.0 }
 0x1cf   :  { %v680_v44 = vadd.f32 %v8761_v17, %v679_v41  ;;  %6891 = vmatmul.mubr.msk.f32.gmra.mrb[6].mxu1 %vm872_vm4, %v8947_v42  ;;  %v930_v54 = vsel %vm872_vm4, %v845_v39, -inf }
 0x1d0   :  { %v847_v48 = vmax.f32 %v685_v40, 0.0  ;;  %6893 = vmatprep.mubr.msk.f32.mxu1 %vm872_vm4, %v8728_v7  ;;  %v927_v58 = vsel %vm872_vm4, %v844_v43, -inf }
 0x1d1   :  { %v846_v16 = vmax.f32 %v680_v44, 0.0  ;;  %v6839_v51 = vpop.f32.mrb[40].mxu0 }
 0x1d2   :  { %v931_v55 = vsel %vm872_vm4, %v847_v48, -inf  ;;  %v695_v56 = vadd.f32 %v6839_v51, %v8761_v17  ;;  %v689_v57 = vpop.f32.mrb[41].mxu0 }
 0x1d3   :  { %v932_v59 = vmax.f32 %v930_v54, %v931_v55  ;;  %v928_v60 = vsel %vm872_vm4, %v846_v16, -inf  ;;  %v690_v61 = vadd.f32 %v8761_v17, %v689_v57 }
 0x1d4   :  { %v929_v0 = vmax.f32 %v927_v58, %v928_v60  ;;  %v849_v1 = vmax.f32 %v695_v56, 0.0 }
 0x1d5   :  { %988 = vst.msk [vmem:[#allocation2 + $0x98] sm:$0xff] %vm872_vm4, %v932_v59  ;;  %v848_v2 = vmax.f32 %v690_v61, 0.0  ;;  %v6842_v3 = vpop.f32.mrb[42].mxu0  ;;  %v1017_v4 = vld [vmem:[#allocation2 + $0x80] ss:$2 sm:$0xff] }
 0x1d6   :  { %v1049_v8 = vld [vmem:[#allocation2 + $0x81] ss:$2 sm:$0xff]  ;;  %987 = vst.msk [vmem:[#allocation2 + $0x90] sm:$0xff] %vm872_vm4, %v929_v0  ;;  %v705_v9 = vadd.f32 %v6842_v3, %v8761_v17  ;;  %v699_v10 = vpop.f32.mrb[43].mxu0  ;;  %v936_v23 = vsel %vm872_vm4, %v849_v1, -inf }
 0x1d7   :  { %v1072_v11 = vmax.f32 %v1017_v4, %v1049_v8  ;;  %v700_v12 = vadd.f32 %v8761_v17, %v699_v10  ;;  %v933_v24 = vsel %vm872_vm4, %v848_v2, -inf }
 0x1d8   :  { %v851_v21 = vmax.f32 %v705_v9, 0.0 }
 0x1d9   :  { %v1104_v22 = vrot.slane %v1072_v11, 7  ;;  %v850_v25 = vmax.f32 %v700_v12, 0.0  ;;  %v6845_v26 = vpop.f32.mrb[44].mxu0 }
 0x1da   :  { %v937_v29 = vsel %vm872_vm4, %v851_v21, -inf  ;;  %v715_v30 = vadd.f32 %v6845_v26, %v8761_v17  ;;  %v709_v31 = vpop.f32.mrb[45].mxu0 }
 0x1db   :  { %v8969_v33 = vsel %vm1128_vm5, 0.0, %v1104_v22  ;;  %v8972_v35 = vsel %vm1128_vm5, %v1104_v22, 0.0  ;;  %v938_v37 = vmax.f32 %v936_v23, %v937_v29  ;;  %v934_v38 = vsel %vm872_vm4, %v850_v25, -inf }
 0x1dc   :  { %v710_v39 = vadd.f32 %v8761_v17, %v709_v31  ;;  %v1218_v40 = vrot.slane %v8969_v33, 1  ;;  %v935_v41 = vmax.f32 %v933_v24, %v934_v38  ;;  %v853_v43 = vmax.f32 %v715_v30, 0.0 }
 0x1dd   :  { %v1219_v44 = vrot.slane %v8972_v35, 1  ;;  %990 = vst.msk [vmem:[#allocation2 + $0xa8] sm:$0xff] %vm872_vm4, %v938_v37  ;;  %v6848_v16 = vpop.f32.mrb[46].mxu0  ;;  %v1019_v51 = vld [vmem:[#allocation2 + $0x90] ss:$2 sm:$0xff] }
 0x1de   :  { %v852_v48 = vmax.f32 %v710_v39, 0.0  ;;  %v1051_v54 = vld [vmem:[#allocation2 + $0x91] ss:$2 sm:$0xff]  ;;  %989 = vst.msk [vmem:[#allocation2 + $0xa0] sm:$0xff] %vm872_vm4, %v935_v41  ;;  %v725_v55 = vadd.f32 %v6848_v16, %v8761_v17  ;;  %v719_v56 = vpop.f32.mrb[47].mxu0  ;;  %v942_v0 = vsel %vm872_vm4, %v853_v43, -inf }
 0x1df   :  { %v8982_v57 = vsel %vm1194_vm6, %v1218_v40, %v1219_v44  ;;  %v1073_v58 = vmax.f32 %v1019_v51, %v1051_v54  ;;  %v720_v59 = vadd.f32 %v8761_v17, %v719_v56 }
 0x1e0   :  { %6894 = vmatmul.mubr.msk.f32.gmra.mrb[8].mxu1 %vm872_vm4, %v8982_v57  ;;  %v855_v60 = vmax.f32 %v725_v55, 0.0  ;;  %v939_v1 = vsel %vm872_vm4, %v852_v48, -inf }
 0x1e1   :  { %v1105_v61 = vrot.slane %v1073_v58, 7  ;;  %v854_v2 = vmax.f32 %v720_v59, 0.0  ;;  %v6851_v3 = vpop.f32.mrb[48].mxu0 }
 0x1e2   :  { %v943_v4 = vsel %vm872_vm4, %v855_v60, -inf  ;;  %v735_v8 = vadd.f32 %v6851_v3, %v8761_v17  ;;  %v729_v9 = vpop.f32.mrb[49].mxu0 }
 0x1e3   :  { %v8992_v10 = vsel %vm1128_vm5, 0.0, %v1105_v61  ;;  %v8995_v11 = vsel %vm1128_vm5, %v1105_v61, 0.0  ;;  %v944_v12 = vmax.f32 %v942_v0, %v943_v4  ;;  %v940_v21 = vsel %vm872_vm4, %v854_v2, -inf }
 0x1e4   :  { %v730_v22 = vadd.f32 %v8761_v17, %v729_v9  ;;  %v1221_v23 = vrot.slane %v8992_v10, 1  ;;  %v941_v24 = vmax.f32 %v939_v1, %v940_v21  ;;  %v857_v25 = vmax.f32 %v735_v8, 0.0 }
 0x1e5   :  { %v1222_v26 = vrot.slane %v8995_v11, 1  ;;  %992 = vst.msk [vmem:[#allocation2 + $0xb8] sm:$0xff] %vm872_vm4, %v944_v12  ;;  %v6854_v30 = vpop.f32.mrb[50].mxu0  ;;  %v1021_v31 = vld [vmem:[#allocation2 + $0xa0] ss:$2 sm:$0xff] }
 0x1e6   :  { %v856_v29 = vmax.f32 %v730_v22, 0.0  ;;  %v1053_v37 = vld [vmem:[#allocation2 + $0xa1] ss:$2 sm:$0xff]  ;;  %991 = vst.msk [vmem:[#allocation2 + $0xb0] sm:$0xff] %vm872_vm4, %v941_v24  ;;  %v745_v38 = vadd.f32 %v6854_v30, %v8761_v17  ;;  %v739_v39 = vpop.f32.mrb[51].mxu0  ;;  %v948_v16 = vsel %vm872_vm4, %v857_v25, -inf }
 0x1e7   :  { %v9005_v40 = vsel %vm1194_vm6, %v1221_v23, %v1222_v26  ;;  %v1074_v41 = vmax.f32 %v1021_v31, %v1053_v37  ;;  %v740_v43 = vadd.f32 %v8761_v17, %v739_v39 }
 0x1e8   :  { %6896 = vmatprep.mubr.msk.f32.mxu1 %vm872_vm4, %v9005_v40  ;;  %v859_v44 = vmax.f32 %v745_v38, 0.0  ;;  %v945_v51 = vsel %vm872_vm4, %v856_v29, -inf }
 0x1e9   :  { %v1106_v48 = vrot.slane %v1074_v41, 7  ;;  %v858_v54 = vmax.f32 %v740_v43, 0.0  ;;  %v6857_v55 = vpop.f32.mrb[52].mxu0 }
 0x1ea   :  { %v949_v56 = vsel %vm872_vm4, %v859_v44, -inf  ;;  %v755_v58 = vadd.f32 %v6857_v55, %v8761_v17  ;;  %v749_v59 = vpop.f32.mrb[53].mxu0 }
 0x1eb   :  { %v9015_v60 = vsel %vm1128_vm5, 0.0, %v1106_v48  ;;  %v9018_v61 = vsel %vm1128_vm5, %v1106_v48, 0.0  ;;  %v950_v0 = vmax.f32 %v948_v16, %v949_v56  ;;  %v946_v1 = vsel %vm872_vm4, %v858_v54, -inf }
 0x1ec   :  { %v750_v2 = vadd.f32 %v8761_v17, %v749_v59  ;;  %v1224_v3 = vrot.slane %v9015_v60, 1  ;;  %v947_v4 = vmax.f32 %v945_v51, %v946_v1  ;;  %v861_v8 = vmax.f32 %v755_v58, 0.0 }
 0x1ed   :  { %v1225_v9 = vrot.slane %v9018_v61, 1  ;;  %994 = vst.msk [vmem:[#allocation2 + $0xc8] sm:$0xff] %vm872_vm4, %v950_v0  ;;  %v6860_v21 = vpop.f32.mrb[54].mxu0  ;;  %v1023_v22 = vld [vmem:[#allocation2 + $0xb0] ss:$2 sm:$0xff] }
 0x1ee   :  { %v860_v12 = vmax.f32 %v750_v2, 0.0  ;;  %v1055_v23 = vld [vmem:[#allocation2 + $0xb1] ss:$2 sm:$0xff]  ;;  %993 = vst.msk [vmem:[#allocation2 + $0xc0] sm:$0xff] %vm872_vm4, %v947_v4  ;;  %v765_v24 = vadd.f32 %v6860_v21, %v8761_v17  ;;  %v759_v25 = vpop.f32.mrb[55].mxu0  ;;  %v954_v38 = vsel %vm872_vm4, %v861_v8, -inf }
 0x1ef   :  { %v9028_v26 = vsel %vm1194_vm6, %v1224_v3, %v1225_v9  ;;  %v1075_v29 = vmax.f32 %v1023_v22, %v1055_v23  ;;  %v760_v30 = vadd.f32 %v8761_v17, %v759_v25 }
 0x1f0   :  { %6897 = vmatmul.mubr.msk.f32.gmra.mrb[10].mxu1 %vm872_vm4, %v9028_v26  ;;  %v863_v31 = vmax.f32 %v765_v24, 0.0  ;;  %v951_v39 = vsel %vm872_vm4, %v860_v12, -inf }
 0x1f1   :  { %v1107_v37 = vrot.slane %v1075_v29, 7  ;;  %v862_v41 = vmax.f32 %v760_v30, 0.0  ;;  %v6863_v43 = vpop.f32.mrb[56].mxu0 }
 0x1f2   :  { %v955_v44 = vsel %vm872_vm4, %v863_v31, -inf  ;;  %v775_v48 = vadd.f32 %v6863_v43, %v8761_v17  ;;  %v769_v16 = vpop.f32.mrb[57].mxu0 }
 0x1f3   :  { %v9038_v51 = vsel %vm1128_vm5, 0.0, %v1107_v37  ;;  %v9041_v54 = vsel %vm1128_vm5, %v1107_v37, 0.0  ;;  %v956_v55 = vmax.f32 %v954_v38, %v955_v44  ;;  %v952_v56 = vsel %vm872_vm4, %v862_v41, -inf }
 0x1f4   :  { %v770_v58 = vadd.f32 %v8761_v17, %v769_v16  ;;  %v1227_v59 = vrot.slane %v9038_v51, 1  ;;  %v953_v0 = vmax.f32 %v951_v39, %v952_v56  ;;  %v865_v1 = vmax.f32 %v775_v48, 0.0 }
 0x1f5   :  { %v1228_v2 = vrot.slane %v9041_v54, 1  ;;  %996 = vst.msk [vmem:[#allocation2 + $0xd8] sm:$0xff] %vm872_vm4, %v956_v55  ;;  %v6866_v4 = vpop.f32.mrb[58].mxu0  ;;  %v1025_v8 = vld [vmem:[#allocation2 + $0xc0] ss:$2 sm:$0xff] }
 0x1f6   :  { %v864_v3 = vmax.f32 %v770_v58, 0.0  ;;  %v1057_v9 = vld [vmem:[#allocation2 + $0xc1] ss:$2 sm:$0xff]  ;;  %995 = vst.msk [vmem:[#allocation2 + $0xd0] sm:$0xff] %vm872_vm4, %v953_v0  ;;  %v785_v12 = vadd.f32 %v6866_v4, %v8761_v17  ;;  %v779_v21 = vpop.f32.mrb[59].mxu0  ;;  %v960_v30 = vsel %vm872_vm4, %v865_v1, -inf }
 0x1f7   :  { %v9051_v22 = vsel %vm1194_vm6, %v1227_v59, %v1228_v2  ;;  %v1076_v23 = vmax.f32 %v1025_v8, %v1057_v9  ;;  %v780_v24 = vadd.f32 %v8761_v17, %v779_v21 }
 0x1f8   :  { %6899 = vmatprep.mubr.msk.f32.mxu1 %vm872_vm4, %v9051_v22  ;;  %v867_v25 = vmax.f32 %v785_v12, 0.0  ;;  %v957_v31 = vsel %vm872_vm4, %v864_v3, -inf }
 0x1f9   :  { %v1108_v29 = vrot.slane %v1076_v23, 7  ;;  %v866_v37 = vmax.f32 %v780_v24, 0.0  ;;  %v6869_v38 = vpop.f32.mrb[60].mxu0 }
 0x1fa   :  { %v961_v39 = vsel %vm872_vm4, %v867_v25, -inf  ;;  %v795_v44 = vadd.f32 %v6869_v38, %v8761_v17  ;;  %v789_v48 = vpop.f32.mrb[61].mxu0 }
 0x1fb   :  { %v9060_v41 = vsel %vm1128_vm5, 0.0, %v1108_v29  ;;  %v9063_v43 = vsel %vm1128_vm5, %v1108_v29, 0.0  ;;  %v962_v16 = vmax.f32 %v960_v30, %v961_v39  ;;  %v958_v55 = vsel %vm872_vm4, %v866_v37, -inf }
 0x1fc   :  { %v1230_v56 = vrot.slane %v9060_v41, 1  ;;  %v1231_v58 = vrot.slane %v9063_v43, 1  ;;  %v959_v59 = vmax.f32 %v957_v31, %v958_v55  ;;  %v869_v3 = vmax.f32 %v795_v44, 0.0 }
 0x1fd   :  { %998 = vst.msk [vmem:[#allocation2 + $0xe8] sm:$0xff] %vm872_vm4, %v962_v16  ;;  %v1027_v1 = vld [vmem:[#allocation2 + $0xd0] ss:$2 sm:$0xff]  ;;  %v1059_v2 = vld [vmem:[#allocation2 + $0xd1] ss:$2 sm:$0xff]  ;;  %v790_v4 = vadd.f32 %v8761_v17, %v789_v48  ;;  %v6872_v8 = vpop.f32.mrb[62].mxu0 }
 0x1fe   :  { %v9071_v0 = vsel %vm1194_vm6, %v1230_v56, %v1231_v58  ;;  %997 = vst.msk [vmem:[#allocation2 + $0xe0] sm:$0xff] %vm872_vm4, %v959_v59  ;;  %v1077_v9 = vmax.f32 %v1027_v1, %v1059_v2  ;;  %v805_v12 = vadd.f32 %v6872_v8, %v8761_v17  ;;  %v799_v21 = vpop.f32.mrb[63].mxu0  ;;  %v966_v30 = vsel %vm872_vm4, %v869_v3, -inf }
 0x1ff   :  { %6900 = vmatmul.mubr.msk.f32.gmra.mrb[12].mxu1 %vm872_vm4, %v9071_v0  ;;  %v868_v23 = vmax.f32 %v790_v4, 0.0  ;;  %v800_v24 = vadd.f32 %v8761_v17, %v799_v21 }
 0x200   :  { %v1109_v25 = vrot.slane %v1077_v9, 7  ;;  %v871_v29 = vmax.f32 %v805_v12, 0.0 }
 0x201   :  { %v870_v31 = vmax.f32 %v800_v24, 0.0  ;;  %v963_v39 = vsel %vm872_vm4, %v868_v23, -inf  ;;  %v1642_v23 = vld [vmem:[#allocation9 + $0x50] sm:$0xff]  ;;  %v1643_v24 = vld [vmem:[#allocation9 + $0x58] sm:$0xff] }
 0x202   :  { %v9081_v37 = vsel %vm1128_vm5, 0.0, %v1109_v25  ;;  %v9084_v38 = vsel %vm1128_vm5, %v1109_v25, 0.0  ;;  %v967_v44 = vsel %vm872_vm4, %v871_v29, -inf  ;;  %v7226_v25 = vpack.c.bf16 %v1643_v24, %v1642_v23  ;;  %v1836_v29 = vld [vmem:[#allocation9 + $0x60] sm:$0xff] }
 0x203   :  { %v1233_v48 = vrot.slane %v9081_v37, 1  ;;  %v1234_v16 = vrot.slane %v9084_v38, 1  ;;  %v968_v17 = vmax.f32 %v966_v30, %v967_v44  ;;  %v964_v55 = vsel %vm872_vm4, %v870_v31, -inf  ;;  %v1837_v30 = vld [vmem:[#allocation9 + $0x68] sm:$0xff] }
 0x204   :  { %v965_v1 = vmax.f32 %v963_v39, %v964_v55  ;;  %v7230_v31 = vpack.c.bf16 %v1837_v30, %v1836_v29  ;;  %v1598_v39 = vrot.slane %v8795_v15, 2  ;;  %v1597_v44 = vrot.slane %v8792_v14, 2 }
 0x205   :  { %v9092_v56 = vsel %vm1194_vm6, %v1233_v48, %v1234_v16  ;;  %v1029_v58 = vld [vmem:[#allocation2 + $0xe0] ss:$2 sm:$0xff]  ;;  %v1061_v59 = vld [vmem:[#allocation2 + $0xe1] ss:$2 sm:$0xff]  ;;  %1000 = vst.msk [vmem:[#allocation2 + $0xf8] sm:$0xff] %vm872_vm4, %v968_v17  ;;  %v1838_v48 = vld [vmem:[#allocation9 + $0x70] sm:$0xff] }
 0x206   :  { %6902 = vmatprep.mubr.msk.f32.mxu1 %vm872_vm4, %v9092_v56  ;;  %v1078_v2 = vmax.f32 %v1029_v58, %v1061_v59  ;;  %999 = vst.msk [vmem:[#allocation2 + $0xf0] sm:$0xff] %vm872_vm4, %v965_v1  ;;  %v1839_v16 = vld [vmem:[#allocation9 + $0x78] sm:$0xff]  ;;  %v1600_v17 = vrot.slane %v8818_v49, 2  ;;  %v1601_v55 = vrot.slane %v8821_v50, 2  ;;  %v9152_v59 = vsel %vm1594_vm7, %v1597_v44, %v1598_v39 }
 0x207   :  { %v7234_v58 = vpack.c.bf16 %v1839_v16, %v1838_v48  ;;  %v1603_v15 = vrot.slane %v8842_v13, 2  ;;  %v1604_v1 = vrot.slane %v8845_v18, 2  ;;  %v1606_v50 = vrot.slane %v8865_v46, 2 }
 0x208   :  { %v1110_v3 = vrot.slane %v1078_v2, 7  ;;  %v2016_v2 = vld [vmem:[#allocation9 + $0x80] sm:$0xff]  ;;  %v1609_v24 = vrot.slane %v8888_v19, 2  ;;  %v1613_v30 = vrot.slane %v8914_v53, 2  ;;  %v1616_v39 = vrot.slane %v8937_v28, 2 }
 0x209   :  { %v9166_v18 = vsel %vm1594_vm7, %v1603_v15, %v1604_v1  ;;  %v1618_v48 = vrot.slane %v8969_v33, 2  ;;  %v1619_v16 = vrot.slane %v8972_v35, 2  ;;  %v1621_v28 = vrot.slane %v8992_v10, 2 }
 0x20a   :  { %v9099_v4 = vsel %vm1128_vm5, 0.0, %v1110_v3  ;;  %v9102_v8 = vsel %vm1128_vm5, %v1110_v3, 0.0  ;;  %v2017_v3 = vld [vmem:[#allocation9 + $0x88] sm:$0xff]  ;;  %v1625_v15 = vrot.slane %v9018_v61, 2  ;;  %v1627_v1 = vrot.slane %v9038_v51, 2 }
 0x20b   :  { %v1236_v9 = vrot.slane %v9099_v4, 1  ;;  %v1237_v12 = vrot.slane %v9102_v8, 1  ;;  %v7238_v23 = vpack.c.bf16 %v2017_v3, %v2016_v2  ;;  %v1630_v3 = vrot.slane %v9060_v41, 2 }
 0x20c   :  { %v1631_v61 = vrot.slane %v9063_v43, 2  ;;  %v1637_v43 = vrot.slane %v9102_v8, 2 }
 0x20d   :  { %v9107_v21 = vsel %vm1194_vm6, %v1236_v9, %v1237_v12  ;;  %v9159_v9 = vsel %vm1594_vm7, %v1600_v17, %v1601_v55  ;;  %v1607_v12 = vrot.slane %v8868_v47, 2  ;;  %v1612_v47 = vrot.slane %v8911_v52, 2 }
 0x20e   :  { %6903 = vmatmul.mubr.msk.f32.gmra.mrb[14].mxu1 %vm872_vm4, %v9107_v21  ;;  %v1622_v17 = vrot.slane %v8995_v11, 2  ;;  %v9203_v55 = vsel %vm1594_vm7, %v1618_v48, %v1619_v16  ;;  %v1628_v11 = vrot.slane %v9041_v54, 2  ;;  %v1634_v54 = vrot.slane %v9084_v38, 2  ;;  %v2193_v48 = vld [vmem:[#allocation9 + $0xa8] sm:$0xff] }
 0x20f   :  { %6913 = vmatprep.mubr.f32.mxu1 %v9824_v6  ;;  %v9173_v29 = vsel %vm1594_vm7, %v1606_v50, %v1607_v12  ;;  %v9187_v44 = vsel %vm1594_vm7, %v1612_v47, %v1613_v30  ;;  %v1633_v12 = vrot.slane %v9081_v37, 2  ;;  %v2018_v30 = vld [vmem:[#allocation9 + $0x90] sm:$0xff] }
 0x210   :  { %v9210_v35 = vsel %vm1594_vm7, %v1621_v28, %v1622_v17  ;;  %v9224_v50 = vsel %vm1594_vm7, %v1627_v1, %v1628_v11  ;;  %v1015_v16 = vld [vmem:[#allocation2 + $0x70] ss:$2 sm:$0xff]  ;;  %v1047_v28 = vld [vmem:[#allocation2 + $0x71] ss:$2 sm:$0xff] }
 0x211   :  { %v9238_v47 = vsel %vm1594_vm7, %v1633_v12, %v1634_v54  ;;  %v1063_v1 = vld [vmem:[#allocation2 + $0xf1] ss:$2 sm:$0xff] }
 0x212   :  { %6914 = vmatmul.mubr.msk.f32.vlgmr.msra.gmra.mrb[0].mxu1 %vm872_vm4, %v8792_v14  ;;  %v2195_v12 = vld [vmem:[#allocation9 + $0xb8] sm:$0xff] }
 0x213   :  { %7225 = vmatpush3.bf16.msra.mxu1 %v8813_v45  ;;  %6916 = vmatprep.mubr.msk.f32.mxu1 %vm872_vm4, %v8818_v49  ;;  %v9141_v45 = vrot.slane %v9824_v6, 2 }
 0x214   :  { %7227 = vmatprep.subr.bf16.mxu1 %v7226_v25 }
 0x215   :  { %9829 = vst [vmem:[#allocation26_spill] sm:$0xff] %v9141_v45 }
 0x216   :  { %6917 = vmatmul.mubr.msk.f32.gmra.mrb[2].mxu1 %vm872_vm4, %v8842_v13 }
 0x217   :  { %6919 = vmatprep.mubr.msk.f32.mxu1 %vm872_vm4, %v8865_v46  ;;  %7229 = vmatpush3.bf16.msra.mxu1 %v7226_v25  ;;  %v1610_v25 = vrot.slane %v8891_v20, 2  ;;  %v1615_v20 = vrot.slane %v8934_v27, 2 }
 0x218   :  { %7231 = vmatprep.subr.bf16.mxu1 %v7230_v31 }
 0x219   :  { %v9192_v53 = vsel %vm1594_vm7, %v1615_v20, %v1616_v39  ;;  %v2019_v20 = vld [vmem:[#allocation9 + $0x98] sm:$0xff]  ;;  %v2192_v39 = vld [vmem:[#allocation9 + $0xa0] sm:$0xff] }
 0x21a   :  { %6920 = vmatmul.mubr.msk.f32.gmra.mrb[4].mxu1 %vm872_vm4, %v8888_v19  ;;  %v7242_v8 = vpack.c.bf16 %v2019_v20, %v2018_v30  ;;  %v7246_v17 = vpack.c.bf16 %v2193_v48, %v2192_v39 }
 0x21b   :  { %6922 = vmatprep.mubr.msk.f32.mxu1 %vm872_vm4, %v8911_v52 }
 0x21e   :  { %6923 = vmatmul.mubr.msk.f32.gmra.mrb[6].mxu1 %vm872_vm4, %v8934_v27 }
 0x21f   :  { %6925 = vmatprep.mubr.f32.mxu1 %v9824_v6  ;;  %v3020_v6 = vld [vmem:[#allocation12 + $0x188] sm:$0xff] }
 0x222   :  { %6926 = vmatmul.mubr.msk.f32.gmra.mrb[8].mxu1 %vm872_vm4, %v8969_v33 }
 0x223   :  { %6928 = vmatprep.mubr.msk.f32.mxu1 %vm872_vm4, %v8992_v10 }
 0x226   :  { %6929 = vmatmul.mubr.msk.f32.gmra.mrb[10].mxu1 %vm872_vm4, %v9015_v60 }
 0x227   :  { %6931 = vmatprep.mubr.msk.f32.mxu1 %vm872_vm4, %v9038_v51 }
 0x22a   :  { %6932 = vmatmul.mubr.msk.f32.gmra.mrb[12].mxu1 %vm872_vm4, %v9060_v41 }
 0x22b   :  { %6934 = vmatprep.mubr.msk.f32.mxu1 %vm872_vm4, %v9081_v37 }
 0x22e   :  { %6935 = vmatmul.mubr.msk.f32.gmra.mrb[14].mxu1 %vm872_vm4, %v9099_v4 }
 0x22f   :  { %6945 = vmatprep.mubr.msk.f32.mxu1 %vm872_vm4, %v9141_v45 }
 0x232   :  { %6946 = vmatmul.mubr.msk.f32.vlgmr.msra.gmra.mrb[0].mxu1 %vm872_vm4, %v9152_v59 }
 0x233   :  { %7233 = vmatpush3.bf16.msra.mxu1 %v7230_v31  ;;  %6948 = vmatprep.mubr.msk.f32.mxu1 %vm872_vm4, %v9159_v9  ;;  %v9180_v31 = vsel %vm1594_vm7, %v1609_v24, %v1610_v25  ;;  %v9231_v24 = vsel %vm1594_vm7, %v1630_v3, %v1631_v61  ;;  %v1636_v25 = vrot.slane %v9099_v4, 2  ;;  %v2194_v61 = vld [vmem:[#allocation9 + $0xb0] sm:$0xff] }
 0x234   :  { %7235 = vmatprep.subr.bf16.mxu1 %v7234_v58  ;;  %v7250_v54 = vpack.c.bf16 %v2195_v12, %v2194_v61  ;;  %v3012_v61 = vld [vmem:[#allocation12 + $0x148] sm:$0xff] }
 0x235   :  { %v9243_v38 = vsel %vm1594_vm7, %v1636_v25, %v1637_v43  ;;  %v2362_v25 = vld [vmem:[#allocation9 + $0xc0] sm:$0xff]  ;;  %v2363_v43 = vld [vmem:[#allocation9 + $0xc8] sm:$0xff] }
 0x236   :  { %6949 = vmatmul.mubr.msk.f32.gmra.mrb[2].mxu1 %vm872_vm4, %v9166_v18  ;;  %v7254_v30 = vpack.c.bf16 %v2363_v43, %v2362_v25  ;;  %v3016_v12 = vld [vmem:[#allocation12 + $0x168] sm:$0xff]  ;;  %v2528_v25 = vld [vmem:[#allocation9 + $0xe0] sm:$0xff] }
 0x237   :  { %6951 = vmatprep.mubr.msk.f32.mxu1 %vm872_vm4, %v9173_v29  ;;  %7237 = vmatpush3.bf16.msra.mxu1 %v7234_v58  ;;  %v1624_v58 = vrot.slane %v9015_v60, 2 }
 0x238   :  { %7239 = vmatprep.subr.bf16.mxu1 %v7238_v23 }
 0x239   :  { %v9217_v2 = vsel %vm1594_vm7, %v1624_v58, %v1625_v15  ;;  %v1071_v58 = vmax.f32 %v1015_v16, %v1047_v28  ;;  %v1031_v15 = vld [vmem:[#allocation2 + $0xf0] ss:$2 sm:$0xff] }
 0x23a   :  { %6952 = vmatmul.mubr.msk.f32.gmra.mrb[4].mxu1 %vm872_vm4, %v9180_v31  ;;  %v1079_v11 = vmax.f32 %v1031_v15, %v1063_v1  ;;  %v3008_v15 = vld [vmem:[#allocation12 + $0x128] sm:$0xff]  ;;  %v3003_v1 = vld [vmem:[#allocation12 + $0x100] sm:$0xff] }
 0x23b   :  { %6954 = vmatprep.mubr.msk.f32.mxu1 %vm872_vm4, %v9187_v44 }
 0x23c   :  { %v1111_v3 = vrot.slane %v1079_v11, 7 }
 0x23e   :  { %6955 = vmatmul.mubr.msk.f32.gmra.mrb[6].mxu1 %vm872_vm4, %v9192_v53  ;;  %v9316_v48 = vsel %vm1128_vm5, %v1111_v3, 0.0 }
 0x23f   :  { %6957 = vmatprep.mubr.msk.f32.mxu1 %vm872_vm4, %v9141_v45  ;;  %v2013_v28 = vrot.slane %v9316_v48, 1  ;;  %v3024_v45 = vld [vmem:[#allocation12 + $0x1a8] sm:$0xff] }
 0x242   :  { %6958 = vmatmul.mubr.msk.f32.gmra.mrb[8].mxu1 %vm872_vm4, %v9203_v55 }
 0x243   :  { %6960 = vmatprep.mubr.msk.f32.mxu1 %vm872_vm4, %v9210_v35 }
 0x246   :  { %6961 = vmatmul.mubr.msk.f32.gmra.mrb[10].mxu1 %vm872_vm4, %v9217_v2 }
 0x247   :  { %6963 = vmatprep.mubr.msk.f32.mxu1 %vm872_vm4, %v9224_v50 }
 0x24a   :  { %6964 = vmatmul.mubr.msk.f32.gmra.mrb[12].mxu1 %vm872_vm4, %v9231_v24 }
 0x24b   :  { %6966 = vmatprep.mubr.msk.f32.mxu1 %vm872_vm4, %v9238_v47 }
 0x24e   :  { %6967 = vmatmul.mubr.msk.f32.gmra.mrb[14].mxu1 %vm872_vm4, %v9243_v38 }
 0x24f   :  { %6977 = vmatprep.mubr.msk.f32.mxu1 %vm872_vm4, %v8792_v14  ;;  %v1103_v14 = vrot.slane %v1071_v58, 7  ;;  %v2365_v58 = vld [vmem:[#allocation9 + $0xd8] sm:$0xff] }
 0x251   :  { %v9292_v20 = vsel %vm1128_vm5, %v1103_v14, 0.0 }
 0x252   :  { %6978 = vmatmul.mubr.msk.f32.vlgmr.msra.gmra.mrb[0].mxu1 %vm872_vm4, %v8818_v49 }
 0x253   :  { %7241 = vmatpush3.bf16.msra.mxu1 %v7238_v23  ;;  %6980 = vmatprep.mubr.msk.f32.mxu1 %vm872_vm4, %v8842_v13  ;;  %v9262_v23 = vsel %vm1128_vm5, 0.0, %v1103_v14  ;;  %v3004_v14 = vld [vmem:[#allocation12 + $0x108] sm:$0xff] }
 0x254   :  { %7243 = vmatprep.subr.bf16.mxu1 %v7242_v8  ;;  %v7278_v11 = vpack.c.bf16 %v3008_v15, %v3004_v14  ;;  %v7286_v14 = vpack.c.bf16 %v3024_v45, %v3020_v6 }
 0x256   :  { %6981 = vmatmul.mubr.msk.f32.gmra.mrb[2].mxu1 %vm872_vm4, %v8865_v46  ;;  %7279 = vmatprep.subr.bf16.mxu0 %v7278_v11  ;;  %v2531_v11 = vld [vmem:[#allocation9 + $0xf8] sm:$0xff] }
 0x257   :  { %6983 = vmatprep.mubr.msk.f32.mxu1 %vm872_vm4, %v8888_v19  ;;  %7245 = vmatpush3.bf16.msra.mxu1 %v7242_v8  ;;  %v2010_v8 = vrot.slane %v9292_v20, 1 }
 0x258   :  { %7247 = vmatprep.subr.bf16.mxu1 %v7246_v17 }
 0x25a   :  { %6984 = vmatmul.mubr.msk.f32.gmra.mrb[4].mxu1 %vm872_vm4, %v8911_v52 }
 0x25b   :  { %6986 = vmatprep.mubr.msk.f32.mxu1 %vm872_vm4, %v8934_v27 }
 0x25e   :  { %6987 = vmatmul.mubr.msk.f32.gmra.mrb[6].mxu1 %vm872_vm4, %v9262_v23 }
 0x25f   :  { %6989 = vmatprep.mubr.msk.f32.mxu1 %vm872_vm4, %v8969_v33  ;;  %v9281_v33 = vsel %vm1128_vm5, 0.0, %v1111_v3  ;;  %v3007_v3 = vld [vmem:[#allocation12 + $0x120] sm:$0xff] }
 0x260   :  { %v2012_v16 = vrot.slane %v9281_v33, 1  ;;  %v7280_v43 = vpack.c.bf16 %v3007_v3, %v3003_v1  ;;  %v2186_v1 = vrot.slane %v9292_v20, 2  ;;  %v2188_v45 = vrot.slane %v9281_v33, 2 }
 0x261   :  { %v2189_v20 = vrot.slane %v9316_v48, 2  ;;  %v2695_v48 = vld [vmem:[#allocation9 + $0x108] sm:$0xff] }
 0x262   :  { %6990 = vmatmul.mubr.msk.f32.gmra.mrb[8].mxu1 %vm872_vm4, %v8992_v10  ;;  %7281 = vmatpush1.bf16.msra.mxu0 %v7280_v43  ;;  %v9470_v43 = vld [vmem:[#allocation10] ss:$0 sm:$0xff] }
 0x263   :  { %6992 = vmatprep.mubr.msk.f32.mxu1 %vm872_vm4, %v9015_v60 }
 0x266   :  { %6993 = vmatmul.mubr.msk.f32.gmra.mrb[10].mxu1 %vm872_vm4, %v9038_v51 }
 0x267   :  { %6995 = vmatprep.mubr.msk.f32.mxu1 %vm872_vm4, %v9060_v41 }
 0x26a   :  { %6996 = vmatmul.mubr.msk.f32.gmra.mrb[12].mxu1 %vm872_vm4, %v9081_v37 }
 0x26b   :  { %6998 = vmatprep.mubr.msk.f32.mxu1 %vm872_vm4, %v9099_v4 }
 0x26e   :  { %6999 = vmatmul.mubr.msk.f32.gmra.mrb[14].mxu1 %vm872_vm4, %v9281_v33 }
 0x26f   :  { %7009 = vmatprep.mubr.msk.f32.mxu1 %vm872_vm4, %v8805_v34  ;;  %v2009_v34 = vrot.slane %v9262_v23, 1 }
 0x271   :  { %v9305_v39 = vsel %vm1194_vm6, %v2009_v34, %v2010_v8  ;;  %v7282_v34 = vpack.c.bf16 %v3016_v12, %v3012_v61  ;;  %v3011_v8 = vld [vmem:[#allocation12 + $0x140] sm:$0xff] }
 0x272   :  { %7010 = vmatmul.mubr.msk.f32.vlgmr.msra.gmra.mrb[0].mxu1 %vm872_vm4, %v8832_v63  ;;  %v2694_v61 = vld [vmem:[#allocation9 + $0x100] sm:$0xff] }
 0x273   :  { %7249 = vmatpush3.bf16.msra.mxu1 %v7246_v17  ;;  %7012 = vmatprep.mubr.msk.f32.mxu1 %vm872_vm4, %v8855_v32  ;;  %v2364_v17 = vld [vmem:[#allocation9 + $0xd0] sm:$0xff]  ;;  %v7270_v12 = vpack.c.bf16 %v2695_v48, %v2694_v61 }
 0x274   :  { %7251 = vmatprep.subr.bf16.mxu1 %v7250_v54  ;;  %7283 = vmatprep.subr.bf16.mxu0 %v7282_v34 }
 0x276   :  { %7013 = vmatmul.mubr.msk.f32.gmra.mrb[2].mxu1 %vm872_vm4, %v8878_v62 }
 0x277   :  { %7015 = vmatprep.mubr.msk.f32.mxu1 %vm872_vm4, %v8901_v36  ;;  %7253 = vmatpush3.bf16.msra.mxu1 %v7250_v54  ;;  %v7258_v54 = vpack.c.bf16 %v2365_v58, %v2364_v17  ;;  %v3023_v17 = vld [vmem:[#allocation12 + $0x1a0] sm:$0xff] }
 0x278   :  { %7255 = vmatprep.subr.bf16.mxu1 %v7254_v30 }
 0x27a   :  { %7016 = vmatmul.mubr.msk.f32.gmra.mrb[4].mxu1 %vm872_vm4, %v8924_v5 }
 0x27b   :  { %7018 = vmatprep.mubr.msk.f32.mxu1 %vm872_vm4, %v8947_v42 }
 0x27e   :  { %7019 = vmatmul.mubr.msk.f32.gmra.mrb[6].mxu1 %vm872_vm4, %v9305_v39 }
 0x27f   :  { %7021 = vmatprep.mubr.msk.f32.mxu1 %vm872_vm4, %v8982_v57  ;;  %v9329_v57 = vsel %vm1194_vm6, %v2012_v16, %v2013_v28  ;;  %v3015_v16 = vld [vmem:[#allocation12 + $0x160] sm:$0xff] }
 0x280   :  { %9830 = vst [vmem:[#allocation27_spill] sm:$0xff] %v9329_v57  ;;  %v2529_v28 = vld [vmem:[#allocation9 + $0xe8] sm:$0xff] }
 0x281   :  { %v7262_v58 = vpack.c.bf16 %v2529_v28, %v2528_v25 }
 0x282   :  { %7022 = vmatmul.mubr.msk.f32.gmra.mrb[8].mxu1 %vm872_vm4, %v9005_v40 }
 0x283   :  { %7024 = vmatprep.mubr.msk.f32.mxu1 %vm872_vm4, %v9028_v26 }
 0x286   :  { %7025 = vmatmul.mubr.msk.f32.gmra.mrb[10].mxu1 %vm872_vm4, %v9051_v22 }
 0x287   :  { %7027 = vmatprep.mubr.msk.f32.mxu1 %vm872_vm4, %v9071_v0 }
 0x28a   :  { %7028 = vmatmul.mubr.msk.f32.gmra.mrb[12].mxu1 %vm872_vm4, %v9092_v56 }
 0x28b   :  { %7030 = vmatprep.mubr.msk.f32.mxu1 %vm872_vm4, %v9107_v21 }
 0x28e   :  { %7031 = vmatmul.mubr.msk.f32.gmra.mrb[14].mxu1 %vm872_vm4, %v9329_v57  ;;  %v7284_v57 = vpack.c.bf16 %v3015_v16, %v3011_v8 }
 0x28f   :  { %7041 = vmatprep.mubr.msk.f32.mxu1 %vm872_vm4, %v9152_v59  ;;  %v3019_v59 = vld [vmem:[#allocation12 + $0x180] sm:$0xff] }
 0x290   :  { %7285 = vmatpush1.bf16.msra.mxu0 %v7284_v57  ;;  %v7288_v15 = vpack.c.bf16 %v3023_v17, %v3019_v59  ;;  %v2530_v57 = vld [vmem:[#allocation9 + $0xf0] sm:$0xff] }
 0x291   :  { %7287 = vmatprep.subr.bf16.mxu0 %v7286_v14  ;;  %v7266_v3 = vpack.c.bf16 %v2531_v11, %v2530_v57 }
 0x292   :  { %7042 = vmatmul.mubr.msk.f32.vlgmr.msra.gmra.mrb[0].mxu1 %vm872_vm4, %v9159_v9 }
 0x293   :  { %7257 = vmatpush3.bf16.msra.mxu1 %v7254_v30  ;;  %7044 = vmatprep.mubr.msk.f32.mxu1 %vm872_vm4, %v9166_v18  ;;  %v2185_v30 = vrot.slane %v9262_v23, 2 }
 0x294   :  { %7259 = vmatprep.subr.bf16.mxu1 %v7258_v54  ;;  %7289 = vmatpush1.bf16.msra.mxu0 %v7288_v15 }
 0x295   :  { %v9350_v6 = vsel %vm1594_vm7, %v2185_v30, %v2186_v1 }
 0x296   :  { %7045 = vmatmul.mubr.msk.f32.gmra.mrb[2].mxu1 %vm872_vm4, %v9173_v29 }
 0x297   :  { %7047 = vmatprep.mubr.msk.f32.mxu1 %vm872_vm4, %v9180_v31  ;;  %7261 = vmatpush3.bf16.msra.mxu1 %v7258_v54  ;;  %v4244_v54 = vld [vmem:[#allocation12 + $0x728] sm:$0xff] }
 0x298   :  { %7263 = vmatprep.subr.bf16.mxu1 %v7262_v58 }
 0x29a   :  { %7048 = vmatmul.mubr.msk.f32.gmra.mrb[4].mxu1 %vm872_vm4, %v9187_v44 }
 0x29b   :  { %7050 = vmatprep.mubr.msk.f32.mxu1 %vm872_vm4, %v9192_v53 }
 0x29e   :  { %7051 = vmatmul.mubr.msk.f32.gmra.mrb[6].mxu1 %vm872_vm4, %v9350_v6 }
 0x29f   :  { %7053 = vmatprep.mubr.msk.f32.mxu1 %vm872_vm4, %v9203_v55  ;;  %v9371_v55 = vsel %vm1594_vm7, %v2188_v45, %v2189_v20 }
 0x2a2   :  { %7054 = vmatmul.mubr.msk.f32.gmra.mrb[8].mxu1 %vm872_vm4, %v9210_v35 }
 0x2a3   :  { %7056 = vmatprep.mubr.msk.f32.mxu1 %vm872_vm4, %v9217_v2 }
 0x2a6   :  { %7057 = vmatmul.mubr.msk.f32.gmra.mrb[10].mxu1 %vm872_vm4, %v9224_v50 }
 0x2a7   :  { %7059 = vmatprep.mubr.msk.f32.mxu1 %vm872_vm4, %v9231_v24 }
 0x2aa   :  { %7060 = vmatmul.mubr.msk.f32.gmra.mrb[12].mxu1 %vm872_vm4, %v9238_v47 }
 0x2ab   :  { %7062 = vmatprep.mubr.msk.f32.mxu1 %vm872_vm4, %v9243_v38 }
 0x2ae   :  { %7063 = vmatmul.mubr.msk.f32.gmra.mrb[14].mxu1 %vm872_vm4, %v9371_v55 }
 0x2af   :  { %7073 = vmatprep.mubr.msk.f32.mxu1 %vm872_vm4, %v8818_v49  ;;  %v9831_v49 = vmov 0.0  }
 0x2b2   :  { %7074 = vmatmul.mubr.msk.f32.vlgmr.msra.gmra.mrb[0].mxu1 %vm872_vm4, %v8842_v13  ;;  %v2696_v13 = vld [vmem:[#allocation9 + $0x110] sm:$0xff] }
 0x2b3   :  { %7265 = vmatpush3.bf16.msra.mxu1 %v7262_v58  ;;  %7076 = vmatprep.mubr.msk.f32.mxu1 %vm872_vm4, %v8865_v46  ;;  %v2697_v46 = vld [vmem:[#allocation9 + $0x118] sm:$0xff] }
 0x2b4   :  { %7267 = vmatprep.subr.bf16.mxu1 %v7266_v3 }
 0x2b6   :  { %7077 = vmatmul.mubr.msk.f32.gmra.mrb[2].mxu1 %vm872_vm4, %v8888_v19  ;;  %v7274_v19 = vpack.c.bf16 %v2697_v46, %v2696_v13 }
 0x2b7   :  { %7079 = vmatprep.mubr.msk.f32.mxu1 %vm872_vm4, %v8911_v52  ;;  %7269 = vmatpush3.bf16.msra.mxu1 %v7266_v3 }
 0x2b8   :  { %7271 = vmatprep.subr.bf16.mxu1 %v7270_v12 }
 0x2ba   :  { %7080 = vmatmul.mubr.msk.f32.gmra.mrb[4].mxu1 %vm872_vm4, %v8934_v27 }
 0x2bb   :  { %7082 = vmatprep.mubr.msk.f32.mxu1 %vm872_vm4, %v9262_v23  ;;  %v4085_v23 = vld [vmem:[#allocation12 + $0x6e0] sm:$0xff] }
 0x2be   :  { %7083 = vmatmul.mubr.f32.gmra.mrb[6].mxu1 %v9831_v49 }
 0x2bf   :  { %7085 = vmatprep.mubr.msk.f32.mxu1 %vm872_vm4, %v8992_v10  ;;  %v4062_v10 = vld [vmem:[#allocation12 + $0x628] sm:$0xff] }
 0x2c2   :  { %7086 = vmatmul.mubr.msk.f32.gmra.mrb[8].mxu1 %vm872_vm4, %v9015_v60  ;;  %v4057_v60 = vld [vmem:[#allocation12 + $0x600] sm:$0xff] }
 0x2c3   :  { %7088 = vmatprep.mubr.msk.f32.mxu1 %vm872_vm4, %v9038_v51 }
 0x2c6   :  { %7089 = vmatmul.mubr.msk.f32.gmra.mrb[10].mxu1 %vm872_vm4, %v9060_v41  ;;  %v4070_v41 = vld [vmem:[#allocation12 + $0x668] sm:$0xff] }
 0x2c7   :  { %7091 = vmatprep.mubr.msk.f32.mxu1 %vm872_vm4, %v9081_v37  ;;  %v4065_v37 = vld [vmem:[#allocation12 + $0x640] sm:$0xff] }
 0x2ca   :  { %7092 = vmatmul.mubr.msk.f32.gmra.mrb[12].mxu1 %vm872_vm4, %v9099_v4 }
 0x2cb   :  { %7094 = vmatprep.mubr.msk.f32.mxu1 %vm872_vm4, %v9281_v33 }
 0x2ce   :  { %7095 = vmatmul.mubr.f32.gmra.mrb[14].mxu1 %v9831_v49 }
 0x2cf   :  { %7105 = vmatprep.mubr.msk.f32.mxu1 %vm872_vm4, %v8832_v63  ;;  %v9832_v63 = vld [vmem:[#allocation27_spill] sm:$0xff] }
 0x2d2   :  { %7106 = vmatmul.mubr.msk.f32.vlgmr.msra.gmra.mrb[0].mxu1 %vm872_vm4, %v8855_v32  ;;  %v3028_v32 = vld [vmem:[#allocation12 + $0x1c8] sm:$0xff] }
 0x2d3   :  { %7273 = vmatpush3.bf16.msra.mxu1 %v7270_v12  ;;  %7108 = vmatprep.mubr.msk.f32.mxu1 %vm872_vm4, %v8878_v62  ;;  %v3032_v62 = vld [vmem:[#allocation12 + $0x1e8] sm:$0xff] }
 0x2d4   :  { %7275 = vmatprep.subr.bf16.mxu1 %v7274_v19  ;;  %v7290_v52 = vpack.c.bf16 %v3032_v62, %v3028_v32 }
 0x2d6   :  { %7109 = vmatmul.mubr.msk.f32.gmra.mrb[2].mxu1 %vm872_vm4, %v8901_v36  ;;  %v3027_v36 = vld [vmem:[#allocation12 + $0x1c0] sm:$0xff]  ;;  %7291 = vmatprep.subr.bf16.mxu0 %v7290_v52 }
 0x2d7   :  { %7111 = vmatprep.mubr.msk.f32.mxu1 %vm872_vm4, %v8924_v5  ;;  %7277 = vmatpush3.bf16.msra.mxu1 %v7274_v19  ;;  %v3031_v5 = vld [vmem:[#allocation12 + $0x1e0] sm:$0xff] }
 0x2d8   :  { %v7292_v27 = vpack.c.bf16 %v3031_v5, %v3027_v36 }
 0x2da   :  { %7112 = vmatmul.mubr.msk.f32.gmra.mrb[4].mxu1 %vm872_vm4, %v8947_v42  ;;  %7293 = vmatpush1.bf16.msra.mxu0 %v7292_v27  ;;  %v4058_v42 = vld [vmem:[#allocation12 + $0x608] sm:$0xff] }
 0x2db   :  { %7114 = vmatprep.mubr.msk.f32.mxu1 %vm872_vm4, %v9305_v39  ;;  %v4240_v39 = vld [vmem:[#allocation12 + $0x708] sm:$0xff] }
 0x2dc   :  { %v7502_v25 = vpack.c.bf16 %v4244_v54, %v4240_v39 }
 0x2de   :  { %7115 = vmatmul.mubr.msk.f32.gmra.mrb[6].mxu1 %vm872_vm4, %v8728_v7 }
 0x2df   :  { %7117 = vmatprep.mubr.msk.f32.mxu1 %vm872_vm4, %v9005_v40  ;;  %v7470_v40 = vpack.c.bf16 %v4062_v10, %v4058_v42 }
 0x2e1   :  { %7471 = vmatprep.subr.bf16.mxu1 %v7470_v40 }
 0x2e2   :  { %7118 = vmatmul.mubr.msk.f32.gmra.mrb[8].mxu1 %vm872_vm4, %v9028_v26  ;;  %v4061_v26 = vld [vmem:[#allocation12 + $0x620] sm:$0xff] }
 0x2e3   :  { %7120 = vmatprep.mubr.msk.f32.mxu1 %vm872_vm4, %v9051_v22  ;;  %v7472_v51 = vpack.c.bf16 %v4061_v26, %v4057_v60  ;;  %v4066_v22 = vld [vmem:[#allocation12 + $0x648] sm:$0xff] }
 0x2e6   :  { %7121 = vmatmul.mubr.msk.f32.gmra.mrb[10].mxu1 %vm872_vm4, %v9071_v0  ;;  %v7474_v0 = vpack.c.bf16 %v4070_v41, %v4066_v22 }
 0x2e7   :  { %7123 = vmatprep.mubr.msk.f32.mxu1 %vm872_vm4, %v9092_v56  ;;  %v4069_v56 = vld [vmem:[#allocation12 + $0x660] sm:$0xff] }
 0x2e8   :  { %v7476_v4 = vpack.c.bf16 %v4069_v56, %v4065_v37 }
 0x2ea   :  { %7124 = vmatmul.mubr.msk.f32.gmra.mrb[12].mxu1 %vm872_vm4, %v9107_v21  ;;  %v4074_v21 = vld [vmem:[#allocation12 + $0x688] sm:$0xff] }
 0x2eb   :  { %7126 = vmatprep.mubr.msk.f32.mxu1 %vm872_vm4, %v9832_v63 }
 0x2ee   :  { %7127 = vmatmul.mubr.msk.f32.gmra.mrb[14].mxu1 %vm872_vm4, %v8728_v7  ;;  %v9833_v7 = vld [vmem:[#allocation26_spill] sm:$0xff] }
 0x2ef   :  { %7137 = vmatprep.mubr.msk.f32.mxu1 %vm872_vm4, %v9159_v9  ;;  %v4078_v9 = vld [vmem:[#allocation12 + $0x6a8] sm:$0xff] }
 0x2f2   :  { %7138 = vmatmul.mubr.msk.f32.vlgmr.msra.gmra.mrb[0].mxu1 %vm872_vm4, %v9166_v18  ;;  %v7478_v18 = vpack.c.bf16 %v4078_v9, %v4074_v21 }
 0x2f3   :  { %7140 = vmatprep.mubr.msk.f32.mxu1 %vm872_vm4, %v9173_v29  ;;  %7473 = vmatpush1.bf16.msra.mxu1 %v7472_v51  ;;  %v4073_v29 = vld [vmem:[#allocation12 + $0x680] sm:$0xff] }
 0x2f4   :  { %7475 = vmatprep.subr.bf16.mxu1 %v7474_v0 }
 0x2f6   :  { %7141 = vmatmul.mubr.msk.f32.gmra.mrb[2].mxu1 %vm872_vm4, %v9180_v31  ;;  %v4077_v31 = vld [vmem:[#allocation12 + $0x6a0] sm:$0xff] }
 0x2f7   :  { %7143 = vmatprep.mubr.msk.f32.mxu1 %vm872_vm4, %v9187_v44  ;;  %7477 = vmatpush1.bf16.msra.mxu1 %v7476_v4  ;;  %v7480_v44 = vpack.c.bf16 %v4077_v31, %v4073_v29 }
 0x2f8   :  { %7479 = vmatprep.subr.bf16.mxu1 %v7478_v18 }
 0x2fa   :  { %7144 = vmatmul.mubr.msk.f32.gmra.mrb[4].mxu1 %vm872_vm4, %v9192_v53  ;;  %v3006_v53 = vld [vmem:[#allocation12 + $0x118] sm:$0xff] }
 0x2fb   :  { %7146 = vmatprep.mubr.msk.f32.mxu1 %vm872_vm4, %v9350_v6  ;;  %7481 = vmatpush1.bf16.msra.mxu1 %v7480_v44 }
 0x2fe   :  { %7147 = vmatmul.mubr.msk.f32.gmra.mrb[6].mxu1 %vm872_vm4, %v9833_v7 }
 0x2ff   :  { %7149 = vmatprep.mubr.msk.f32.mxu1 %vm872_vm4, %v9210_v35  ;;  %v3010_v35 = vld [vmem:[#allocation12 + $0x138] sm:$0xff] }
 0x302   :  { %7150 = vmatmul.mubr.msk.f32.gmra.mrb[8].mxu1 %vm872_vm4, %v9217_v2  ;;  %v7294_v2 = vpack.c.bf16 %v3010_v35, %v3006_v53 }
 0x303   :  { %7152 = vmatprep.mubr.msk.f32.mxu1 %vm872_vm4, %v9224_v50  ;;  %v4082_v50 = vld [vmem:[#allocation12 + $0x6c8] sm:$0xff] }
 0x304   :  { %7295 = vmatprep.subr.bf16.mxu0 %v7294_v2 }
 0x306   :  { %7153 = vmatmul.mubr.msk.f32.gmra.mrb[10].mxu1 %vm872_vm4, %v9231_v24  ;;  %v4086_v24 = vld [vmem:[#allocation12 + $0x6e8] sm:$0xff] }
 0x307   :  { %7155 = vmatprep.mubr.msk.f32.mxu1 %vm872_vm4, %v9238_v47  ;;  %v4081_v47 = vld [vmem:[#allocation12 + $0x6c0] sm:$0xff] }
 0x308   :  { %v7484_v33 = vpack.c.bf16 %v4085_v23, %v4081_v47 }
 0x30a   :  { %7156 = vmatmul.mubr.msk.f32.gmra.mrb[12].mxu1 %vm872_vm4, %v9243_v38  ;;  %v7482_v38 = vpack.c.bf16 %v4086_v24, %v4082_v50 }
 0x30b   :  { %7158 = vmatprep.mubr.msk.f32.mxu1 %vm872_vm4, %v9371_v55 }
 0x30c   :  { %7483 = vmatprep.subr.bf16.mxu1 %v7482_v38 }
 0x30d   :  { %7485 = vmatpush1.bf16.msra.mxu1 %v7484_v33 }
 0x30e   :  { %7159 = vmatmul.mubr.msk.f32.gmra.mrb[14].mxu1 %vm872_vm4, %v9833_v7  ;;  %7503 = vmatprep.subr.bf16.mxu1 %v7502_v25 }
 0x30f   :  { %4158 = vmatprep.mubr.f32.mxu1 %v9831_v49 }
 0x3c5   :  { %v7139_v34 = vpop.f32.mrb[0].mxu1 }
 0x3c6   :  { %v2867_v8 = vadd.f32 %v7139_v34, %v9470_v43  ;;  %v2764_v16 = vpop.f32.mrb[1].mxu1 }
 0x3c7   :  { %v2866_v28 = vadd.f32 %v9470_v43, %v2764_v16 }
 0x3c8   :  { %v2883_v59 = vmax.f32 %v2867_v8, 0.0 }
 0x3c9   :  { %v2882_v17 = vmax.f32 %v2866_v28, 0.0  ;;  %v7142_v58 = vpop.f32.mrb[2].mxu1 }
 0x3ca   :  { %v2900_v14 = vsel %vm2898_vm8, %v2883_v59, -inf  ;;  %v2869_v15 = vadd.f32 %v7142_v58, %v9470_v43  ;;  %v2774_v30 = vpop.f32.mrb[3].mxu1 }
 0x3cb   :  { %v2899_v1 = vsel %vm2898_vm8, %v2882_v17, -inf  ;;  %v2868_v6 = vadd.f32 %v9470_v43, %v2774_v30 }
 0x3cc   :  { %v2901_v45 = vmax.f32 %v2899_v1, %v2900_v14  ;;  %v2885_v20 = vmax.f32 %v2869_v15, 0.0  ;;  %v3005_v1 = vld [vmem:[#allocation12 + $0x110] sm:$0xff] }
 0x3cd   :  { %v2884_v55 = vmax.f32 %v2868_v6, 0.0  ;;  %v7145_v57 = vpop.f32.mrb[4].mxu1  ;;  %v3009_v6 = vld [vmem:[#allocation12 + $0x130] sm:$0xff] }
 0x3ce   :  { %2923 = vst.msk [vmem:[#allocation3] sm:$0xff] %vm2898_vm8, %v2901_v45  ;;  %v2903_v11 = vsel %vm2898_vm8, %v2885_v20, -inf  ;;  %v2871_v3 = vadd.f32 %v7145_v57, %v9470_v43  ;;  %v2784_v61 = vpop.f32.mrb[5].mxu1  ;;  %v3014_v57 = vld [vmem:[#allocation12 + $0x158] sm:$0xff] }
 0x3cf   :  { %v2902_v48 = vsel %vm2898_vm8, %v2884_v55, -inf  ;;  %v2870_v12 = vadd.f32 %v9470_v43, %v2784_v61 }
 0x3d0   :  { %v2904_v13 = vmax.f32 %v2902_v48, %v2903_v11  ;;  %v2887_v46 = vmax.f32 %v2871_v3, 0.0  ;;  %v3018_v11 = vld [vmem:[#allocation12 + $0x178] sm:$0xff] }
 0x3d1   :  { %v2886_v19 = vmax.f32 %v2870_v12, 0.0  ;;  %v7148_v63 = vpop.f32.mrb[6].mxu1 }
 0x3d2   :  { %2924 = vst.msk [vmem:[#allocation3 + $0x8] sm:$0xff] %vm2898_vm8, %v2904_v13  ;;  %v2906_v7 = vsel %vm2898_vm8, %v2887_v46, -inf  ;;  %v2873_v32 = vadd.f32 %v7148_v63, %v9470_v43  ;;  %v2794_v62 = vpop.f32.mrb[7].mxu1  ;;  %v7296_v13 = vpack.c.bf16 %v3009_v6, %v3005_v1  ;;  %v3013_v46 = vld [vmem:[#allocation12 + $0x150] sm:$0xff]  ;;  %v4239_v63 = vld [vmem:[#allocation12 + $0x700] sm:$0xff]  ;;  %v4264_v6 = vld [vmem:[#allocation12 + $0x7c8] sm:$0xff] }
 0x3d3   :  { %v2905_v36 = vsel %vm2898_vm8, %v2886_v19, -inf  ;;  %v2872_v52 = vadd.f32 %v9470_v43, %v2794_v62  ;;  %v3017_v19 = vld [vmem:[#allocation12 + $0x170] sm:$0xff] }
 0x3d4   :  { %v2907_v5 = vmax.f32 %v2905_v36, %v2906_v7  ;;  %v2889_v27 = vmax.f32 %v2873_v32, 0.0  ;;  %v7298_v32 = vpack.c.bf16 %v3018_v11, %v3014_v57  ;;  %v4243_v36 = vld [vmem:[#allocation12 + $0x720] sm:$0xff] }
 0x3d5   :  { %v2888_v42 = vmax.f32 %v2872_v52, 0.0  ;;  %v7151_v10 = vpop.f32.mrb[8].mxu1  ;;  %v2931_v23 = vld [vmem:[#allocation3] ss:$2 sm:$0xf] }
 0x3d6   :  { %2925 = vst.msk [vmem:[#allocation3 + $0x10] sm:$0xff] %vm2898_vm8, %v2907_v5  ;;  %v2909_v40 = vsel %vm2898_vm8, %v2889_v27, -inf  ;;  %v2875_v60 = vadd.f32 %v7151_v10, %v9470_v43  ;;  %v2804_v26 = vpop.f32.mrb[9].mxu1  ;;  %v2947_v54 = vld [vmem:[#allocation3 + $0x1] ss:$2 sm:$0xf] }
 0x3d7   :  { %v2908_v51 = vsel %vm2898_vm8, %v2888_v42, -inf  ;;  %v2874_v22 = vadd.f32 %v9470_v43, %v2804_v26  ;;  %v9508_v58 = vmax.f32 %v2931_v23, %v2947_v54  ;;  %v3022_v52 = vld [vmem:[#allocation12 + $0x198] sm:$0xff]  ;;  %v4252_v26 = vld [vmem:[#allocation12 + $0x768] sm:$0xff]  ;;  %v2970_v11 = vld [vmem:[#allocation12] sm:$0xff] }
 0x3d8   :  { %v2910_v41 = vmax.f32 %v2908_v51, %v2909_v40  ;;  %v2891_v0 = vmax.f32 %v2875_v60, 0.0  ;;  %v3026_v5 = vld [vmem:[#allocation12 + $0x1b8] sm:$0xff]  ;;  %v4248_v60 = vld [vmem:[#allocation12 + $0x748] sm:$0xff] }
 0x3d9   :  { %v2890_v37 = vmax.f32 %v2874_v22, 0.0  ;;  %v7154_v56 = vpop.f32.mrb[10].mxu1  ;;  %v2933_v14 = vld [vmem:[#allocation3 + $0x8] ss:$2 sm:$0xf]  ;;  %v3037_v12 = vrot.slane %v9508_v58, 1 }
 0x3da   :  { %2926 = vst.msk [vmem:[#allocation3 + $0x18] sm:$0xff] %vm2898_vm8, %v2910_v41  ;;  %v2912_v4 = vsel %vm2898_vm8, %v2891_v0, -inf  ;;  %v2877_v21 = vadd.f32 %v7154_v56, %v9470_v43  ;;  %v2814_v9 = vpop.f32.mrb[11].mxu1  ;;  %v2949_v45 = vld [vmem:[#allocation3 + $0x9] ss:$2 sm:$0xf]  ;;  %v7300_v0 = vpack.c.bf16 %v3017_v19, %v3013_v46 }
 0x3db   :  { %v2911_v18 = vsel %vm2898_vm8, %v2890_v37, -inf  ;;  %v2876_v29 = vadd.f32 %v9470_v43, %v2814_v9  ;;  %v9516_v62 = vmax.f32 %v2933_v14, %v2949_v45  ;;  %v3361_v51 = vrot.slane %v9508_v58, 2  ;;  %v4256_v23 = vld [vmem:[#allocation12 + $0x788] sm:$0xff]  ;;  %v4259_v14 = vld [vmem:[#allocation12 + $0x7a0] sm:$0xff] }
 0x3dc   :  { %v2913_v31 = vmax.f32 %v2911_v18, %v2912_v4  ;;  %v2893_v44 = vmax.f32 %v2877_v21, 0.0  ;;  %v7504_v37 = vpack.c.bf16 %v4243_v36, %v4239_v63  ;;  %v3543_v56 = vrot.slane %v9508_v58, 3  ;;  %v3021_v18 = vld [vmem:[#allocation12 + $0x190] sm:$0xff]  ;;  %v4268_v45 = vld [vmem:[#allocation12 + $0x7e8] sm:$0xff] }
 0x3dd   :  { %v2892_v53 = vmax.f32 %v2876_v29, 0.0  ;;  %v7157_v35 = vpop.f32.mrb[12].mxu1  ;;  %v4089_v4 = vrot.slane %v9516_v62, 2  ;;  %v7302_v9 = vpack.c.bf16 %v3026_v5, %v3022_v52  ;;  %v3025_v29 = vld [vmem:[#allocation12 + $0x1b0] sm:$0xff]  ;;  %v2983_v46 = vld [vmem:[#allocation12 + $0x68] sm:$0xff]  ;;  %v2978_v52 = vld [vmem:[#allocation12 + $0x40] sm:$0xff] }
 0x3de   :  { %2927 = vst.msk [vmem:[#allocation3 + $0x20] sm:$0xff] %vm2898_vm8, %v2913_v31  ;;  %v2915_v2 = vsel %vm2898_vm8, %v2893_v44, -inf  ;;  %v2879_v50 = vadd.f32 %v7157_v35, %v9470_v43  ;;  %v2824_v24 = vpop.f32.mrb[13].mxu1  ;;  %v4247_v31 = vld [vmem:[#allocation12 + $0x740] sm:$0xff]  ;;  %v7304_v54 = vpack.c.bf16 %v3025_v29, %v3021_v18  ;;  %v4422_v19 = vld [vmem:[#allocation12 + $0x808] sm:$0xff] }
 0x3df   :  { %v2914_v47 = vsel %vm2898_vm8, %v2892_v53, -inf  ;;  %v2878_v38 = vadd.f32 %v9470_v43, %v2824_v24  ;;  %v7506_v53 = vpack.c.bf16 %v4252_v26, %v4248_v60  ;;  %v4251_v35 = vld [vmem:[#allocation12 + $0x760] sm:$0xff]  ;;  %v4426_v63 = vld [vmem:[#allocation12 + $0x828] sm:$0xff] }
 0x3e0   :  { %v2916_v33 = vmax.f32 %v2914_v47, %v2915_v2  ;;  %v2895_v39 = vmax.f32 %v2879_v50, 0.0  ;;  %v3030_v2 = vld [vmem:[#allocation12 + $0x1d8] sm:$0xff]  ;;  %v3908_v47 = vrot.slane %v9516_v62, 1  ;;  %v2982_v5 = vld [vmem:[#allocation12 + $0x60] sm:$0xff]  ;;  %v2987_v26 = vld [vmem:[#allocation12 + $0x88] sm:$0xff] }
 0x3e1   :  { %v2894_v25 = vmax.f32 %v2878_v38, 0.0  ;;  %v7160_v34 = vpop.f32.mrb[14].mxu1  ;;  %v3034_v50 = vld [vmem:[#allocation12 + $0x1f8] sm:$0xff]  ;;  %v4425_v60 = vld [vmem:[#allocation12 + $0x820] sm:$0xff] }
 0x3e2   :  { %2928 = vst.msk [vmem:[#allocation3 + $0x28] sm:$0xff] %vm2898_vm8, %v2916_v33  ;;  %v2918_v8 = vsel %vm2898_vm8, %v2895_v39, -inf  ;;  %v2881_v16 = vadd.f32 %v7160_v34, %v9470_v43  ;;  %v2834_v28 = vpop.f32.mrb[15].mxu1  ;;  %v4260_v33 = vld [vmem:[#allocation12 + $0x7a8] sm:$0xff]  ;;  %v7508_v34 = vpack.c.bf16 %v4251_v35, %v4247_v31  ;;  %v2990_v18 = vld [vmem:[#allocation12 + $0xa0] sm:$0xff] }
 0x3e3   :  { %v2917_v59 = vsel %vm2898_vm8, %v2894_v25, -inf  ;;  %v2880_v17 = vadd.f32 %v9470_v43, %v2834_v28  ;;  %v3033_v28 = vld [vmem:[#allocation12 + $0x1f0] sm:$0xff]  ;;  %v4429_v29 = vld [vmem:[#allocation12 + $0x840] sm:$0xff] }
 0x3e4   :  { %v2919_v15 = vmax.f32 %v2917_v59, %v2918_v8  ;;  %v2897_v30 = vmax.f32 %v2881_v16, 0.0  ;;  %v7306_v8 = vpack.c.bf16 %v3034_v50, %v3030_v2  ;;  %v3029_v16 = vld [vmem:[#allocation12 + $0x1d0] sm:$0xff]  ;;  %v4255_v59 = vld [vmem:[#allocation12 + $0x780] sm:$0xff]  ;;  %v4438_v2 = vld [vmem:[#allocation12 + $0x888] sm:$0xff] }
 0x3e5   :  { %v2896_v20 = vmax.f32 %v2880_v17, 0.0  ;;  %v2939_v55 = vld [vmem:[#allocation3 + $0x20] ss:$2 sm:$0xf]  ;;  %v7510_v17 = vpack.c.bf16 %v4260_v33, %v4256_v23  ;;  %v4442_v50 = vld [vmem:[#allocation12 + $0x8a8] sm:$0xff] }
 0x3e6   :  { %2929 = vst.msk [vmem:[#allocation3 + $0x30] sm:$0xff] %vm2898_vm8, %v2919_v15  ;;  %v2921_v3 = vsel %vm2898_vm8, %v2897_v30, -inf  ;;  %v2955_v61 = vld [vmem:[#allocation3 + $0x21] ss:$2 sm:$0xf]  ;;  %v2971_v15 = vld [vmem:[#allocation12 + $0x8] sm:$0xff] }
 0x3e7   :  { %v2920_v43 = vsel %vm2898_vm8, %v2896_v20, -inf  ;;  %v9513_v48 = vmax.f32 %v2939_v55, %v2955_v61  ;;  %v2975_v30 = vld [vmem:[#allocation12 + $0x28] sm:$0xff]  ;;  %v7308_v20 = vpack.c.bf16 %v3033_v28, %v3029_v16  ;;  %v7512_v55 = vpack.c.bf16 %v4259_v14, %v4255_v59  ;;  %v4263_v61 = vld [vmem:[#allocation12 + $0x7c0] sm:$0xff]  ;;  %v2973_v16 = vld [vmem:[#allocation12 + $0x18] sm:$0xff] }
 0x3e8   :  { %v2922_v7 = vmax.f32 %v2920_v43, %v2921_v3  ;;  %v7310_v57 = vpack.c.bf16 %v2975_v30, %v2971_v15  ;;  %v2974_v3 = vld [vmem:[#allocation12 + $0x20] sm:$0xff]  ;;  %v7514_v43 = vpack.c.bf16 %v4268_v45, %v4264_v6  ;;  %v2977_v28 = vld [vmem:[#allocation12 + $0x38] sm:$0xff]  ;;  %v4446_v59 = vld [vmem:[#allocation12 + $0x8c8] sm:$0xff] }
 0x3e9   :  { %v9520_v27 = vsel %vm3038_vm9, %v9513_v48, %v3037_v12  ;;  %v2941_v42 = vld [vmem:[#allocation3 + $0x28] ss:$2 sm:$0xf]  ;;  %v2957_v10 = vld [vmem:[#allocation3 + $0x29] ss:$2 sm:$0xf]  ;;  %v7326_v45 = vpack.c.bf16 %v2977_v28, %v2973_v16 }
 0x3ea   :  { %2930 = vst.msk [vmem:[#allocation3 + $0x38] sm:$0xff] %vm2898_vm8, %v2922_v7  ;;  %6471 = vmatmul.mubr.msk.f32.vlgmr.msra.gmra.mrb[64].mxu0 %vm2898_vm8, %v9520_v27  ;;  %v9525_v40 = vmax.f32 %v2941_v42, %v2957_v10  ;;  %v3362_v22 = vrot.slane %v9513_v48, 1  ;;  %v3544_v41 = vrot.slane %v9513_v48, 2  ;;  %v4267_v12 = vld [vmem:[#allocation12 + $0x7e0] sm:$0xff]  ;;  %v7312_v7 = vpack.c.bf16 %v2974_v3, %v2970_v11  ;;  %v3330_v28 = vld [vmem:[#allocation12 + $0x208] sm:$0xff] }
 0x3eb   :  { %7297 = vmatpush1.bf16.msra.mxu0 %v7296_v13  ;;  %3176 = vmatprep.mubr.f32.mxu0 %v9831_v49  ;;  %v2979_v13 = vld [vmem:[#allocation12 + $0x48] sm:$0xff]  ;;  %v4421_v42 = vld [vmem:[#allocation12 + $0x800] sm:$0xff]  ;;  %v7534_v10 = vpack.c.bf16 %v4426_v63, %v4422_v19  ;;  %v3183_v11 = vrot.slane %v9513_v48, 7  ;;  %v2993_v48 = vld [vmem:[#allocation12 + $0xb8] sm:$0xff] }
 0x3ec   :  { %7299 = vmatprep.subr.bf16.mxu0 %v7298_v32  ;;  %v4090_v21 = vrot.slane %v9525_v40, 1  ;;  %v9535_v44 = vsel %vm3038_vm9, %v3362_v22, %v3361_v51  ;;  %v9538_v24 = vsel %vm3038_vm9, %v3544_v41, %v3543_v56  ;;  %v3727_v39 = vrot.slane %v9525_v40, 7  ;;  %v2991_v51 = vld [vmem:[#allocation12 + $0xa8] sm:$0xff]  ;;  %v2994_v33 = vld [vmem:[#allocation12 + $0xc0] sm:$0xff] }
 0x3ed   :  { %v9549_v25 = vsel %vm3038_vm9, %v9525_v40, %v3908_v47  ;;  %v7516_v32 = vpack.c.bf16 %v4267_v12, %v4263_v61  ;;  %v7314_v36 = vpack.c.bf16 %v2983_v46, %v2979_v13  ;;  %v4272_v22 = vrot.slane %v9525_v40, 2  ;;  %v4430_v41 = vld [vmem:[#allocation12 + $0x848] sm:$0xff]  ;;  %v4449_v61 = vld [vmem:[#allocation12 + $0x8e0] sm:$0xff]  ;;  %v2985_v12 = vld [vmem:[#allocation12 + $0x78] sm:$0xff] }
 0x3ee   :  { %v9542_v38 = vsel %vm3038_vm9, %v4090_v21, %v4089_v4  ;;  %v9554_v1 = vsel %vm3038_vm9, %v3727_v39, %v9516_v62  ;;  %v4271_v56 = vrot.slane %v9516_v62, 3  ;;  %v7536_v4 = vpack.c.bf16 %v4425_v60, %v4421_v42  ;;  %v2999_v40 = vld [vmem:[#allocation12 + $0xe8] sm:$0xff]  ;;  %v2998_v39 = vld [vmem:[#allocation12 + $0xe0] sm:$0xff] }
 0x3ef   :  { %7301 = vmatpush1.bf16.msra.mxu0 %v7300_v0  ;;  %6483 = vmatmul.mubr.msk.f32.vlgmr.msra.gmra.mrb[16].mxu1 %vm2898_vm8, %v9542_v38  ;;  %v4434_v0 = vld [vmem:[#allocation12 + $0x868] sm:$0xff]  ;;  %v7318_v21 = vpack.c.bf16 %v2991_v51, %v2987_v26  ;;  %v7324_v14 = vpack.c.bf16 %v2998_v39, %v2994_v33  ;;  %v4608_v42 = vld [vmem:[#allocation12 + $0x920] sm:$0xff]  ;;  %v9572_v60 = vsel %vm3038_vm9, %v3183_v11, %v9508_v58  ;;  %v2996_v39 = vld [vmem:[#allocation12 + $0xd0] sm:$0xff] }
 0x3f0   :  { %7505 = vmatpush1.bf16.msra.mxu1 %v7504_v37  ;;  %7303 = vmatprep.subr.bf16.mxu0 %v7302_v9  ;;  %v7316_v37 = vpack.c.bf16 %v2982_v5, %v2978_v52  ;;  %v2986_v9 = vld [vmem:[#allocation12 + $0x80] sm:$0xff]  ;;  %v7538_v31 = vpack.c.bf16 %v4434_v0, %v4430_v41  ;;  %v9562_v35 = vsel %vm3038_vm9, %v4272_v22, %v4271_v56  ;;  %v2943_v15 = vld [vmem:[#allocation3 + $0x30] ss:$2 sm:$0xf] }
 0x3f1   :  { %7507 = vmatprep.subr.bf16.mxu1 %v7506_v53  ;;  %4340 = vmatprep.mubr.f32.mxu1 %v9831_v49  ;;  %v2995_v53 = vld [vmem:[#allocation12 + $0xc8] sm:$0xff]  ;;  %v7320_v62 = vpack.c.bf16 %v2990_v18, %v2986_v9  ;;  %v2988_v9 = vld [vmem:[#allocation12 + $0x90] sm:$0xff]  ;;  %v4624_v16 = vld [vmem:[#allocation12 + $0x9a0] sm:$0xff] }
 0x3f2   :  { %v7322_v23 = vpack.c.bf16 %v2999_v40, %v2995_v53  ;;  %v2959_v30 = vld [vmem:[#allocation3 + $0x31] ss:$2 sm:$0xf]  ;;  %v2935_v26 = vld [vmem:[#allocation3 + $0x10] ss:$2 sm:$0xf] }
 0x3f3   :  { %7305 = vmatpush1.bf16.msra.mxu0 %v7304_v54  ;;  %v4437_v54 = vld [vmem:[#allocation12 + $0x880] sm:$0xff]  ;;  %v9568_v13 = vmax.f32 %v2943_v15, %v2959_v30  ;;  %v4605_v46 = vld [vmem:[#allocation12 + $0x908] sm:$0xff]  ;;  %v2992_v18 = vld [vmem:[#allocation12 + $0xb0] sm:$0xff] }
 0x3f4   :  { %7509 = vmatpush1.bf16.msra.mxu1 %v7508_v34  ;;  %7307 = vmatprep.subr.bf16.mxu0 %v7306_v8  ;;  %v7542_v34 = vpack.c.bf16 %v4442_v50, %v4438_v2  ;;  %v4441_v8 = vld [vmem:[#allocation12 + $0x8a0] sm:$0xff]  ;;  %v4609_v19 = vld [vmem:[#allocation12 + $0x928] sm:$0xff]  ;;  %v2997_v53 = vld [vmem:[#allocation12 + $0xd8] sm:$0xff] }
 0x3f5   :  { %7511 = vmatprep.subr.bf16.mxu1 %v7510_v17  ;;  %v4450_v17 = vld [vmem:[#allocation12 + $0x8e8] sm:$0xff]  ;;  %v7544_v6 = vpack.c.bf16 %v4441_v8, %v4437_v54  ;;  %v7566_v22 = vpack.c.bf16 %v4609_v19, %v4605_v46  ;;  %v4455_v41 = vrot.slane %v9568_v13, 7  ;;  %v3001_v40 = vld [vmem:[#allocation12 + $0xf8] sm:$0xff]  ;;  %v3000_v54 = vld [vmem:[#allocation12 + $0xf0] sm:$0xff] }
 0x3f6   :  { %v7546_v3 = vpack.c.bf16 %v4450_v17, %v4446_v59  ;;  %v2951_v51 = vld [vmem:[#allocation3 + $0x11] ss:$2 sm:$0xf]  ;;  %v7338_v33 = vpack.c.bf16 %v3001_v40, %v2997_v53  ;;  %v7340_v15 = vpack.c.bf16 %v3000_v54, %v2996_v39  ;;  %v4632_v11 = vld [vmem:[#allocation12 + $0x9e0] sm:$0xff]  ;;  %v3332_v54 = vld [vmem:[#allocation12 + $0x218] sm:$0xff] }
 0x3f7   :  { %7309 = vmatpush1.bf16.msra.mxu0 %v7308_v20  ;;  %v2972_v20 = vld [vmem:[#allocation12 + $0x10] sm:$0xff]  ;;  %v4613_v0 = vld [vmem:[#allocation12 + $0x948] sm:$0xff]  ;;  %v4805_v39 = vld [vmem:[#allocation12 + $0xaa0] sm:$0xff] }
 0x3f8   :  { %7513 = vmatpush1.bf16.msra.mxu1 %v7512_v55  ;;  %7311 = vmatprep.subr.bf16.mxu0 %v7310_v57  ;;  %v2976_v55 = vld [vmem:[#allocation12 + $0x30] sm:$0xff]  ;;  %v4445_v57 = vld [vmem:[#allocation12 + $0x8c0] sm:$0xff]  ;;  %v4621_v50 = vld [vmem:[#allocation12 + $0x988] sm:$0xff] }
 0x3f9   :  { %7515 = vmatprep.subr.bf16.mxu1 %v7514_v43  ;;  %v2981_v43 = vld [vmem:[#allocation12 + $0x58] sm:$0xff]  ;;  %v7328_v63 = vpack.c.bf16 %v2976_v55, %v2972_v20  ;;  %v7548_v52 = vpack.c.bf16 %v4449_v61, %v4445_v57  ;;  %v3334_v59 = vld [vmem:[#allocation12 + $0x228] sm:$0xff]  ;;  %v3333_v20 = vld [vmem:[#allocation12 + $0x220] sm:$0xff] }
 0x3fa   :  { %6472 = vmatmul.mubr.msk.f32.vlgmr.msra.gmra.mrb[66].mxu0 %vm2898_vm8, %v9520_v27  ;;  %v4433_v27 = vld [vmem:[#allocation12 + $0x860] sm:$0xff]  ;;  %v7330_v5 = vpack.c.bf16 %v2985_v12, %v2981_v43  ;;  %v4629_v17 = vld [vmem:[#allocation12 + $0x9c8] sm:$0xff] }
 0x3fb   :  { %7313 = vmatpush1.bf16.msra.mxu0 %v7312_v7  ;;  %3251 = vmatprep.mubr.f32.mxu0 %v9831_v49  ;;  %v7540_v47 = vpack.c.bf16 %v4433_v27, %v4429_v29  ;;  %v2980_v7 = vld [vmem:[#allocation12 + $0x50] sm:$0xff]  ;;  %v4612_v29 = vld [vmem:[#allocation12 + $0x940] sm:$0xff]  ;;  %v3342_v61 = vld [vmem:[#allocation12 + $0x268] sm:$0xff] }
 0x3fc   :  { %7517 = vmatpush1.bf16.msra.mxu1 %v7516_v32  ;;  %7315 = vmatprep.subr.bf16.mxu0 %v7314_v36  ;;  %v2984_v32 = vld [vmem:[#allocation12 + $0x70] sm:$0xff]  ;;  %v4604_v36 = vld [vmem:[#allocation12 + $0x900] sm:$0xff]  ;;  %v4786_v43 = vld [vmem:[#allocation12 + $0xa08] sm:$0xff] }
 0x3fd   :  { %7535 = vmatprep.subr.bf16.mxu1 %v7534_v10  ;;  %v2989_v10 = vld [vmem:[#allocation12 + $0x98] sm:$0xff]  ;;  %v7332_v56 = vpack.c.bf16 %v2984_v32, %v2980_v7  ;;  %v7568_v58 = vpack.c.bf16 %v4608_v42, %v4604_v36  ;;  %v4616_v27 = vld [vmem:[#allocation12 + $0x960] sm:$0xff]  ;;  %v4790_v12 = vld [vmem:[#allocation12 + $0xa28] sm:$0xff] }
 0x3fe   :  { %v4628_v55 = vld [vmem:[#allocation12 + $0x9c0] sm:$0xff]  ;;  %v3346_v42 = vld [vmem:[#allocation12 + $0x288] sm:$0xff] }
 0x3ff   :  { %7317 = vmatpush1.bf16.msra.mxu0 %v7316_v37  ;;  %6485 = vmatmul.mubr.msk.f32.vlgmr.msra.gmra.mrb[18].mxu1 %vm2898_vm8, %v9562_v35  ;;  %v4617_v37 = vld [vmem:[#allocation12 + $0x968] sm:$0xff]  ;;  %v7580_v19 = vpack.c.bf16 %v4632_v11, %v4628_v55  ;;  %v3337_v7 = vld [vmem:[#allocation12 + $0x240] sm:$0xff]  ;;  %v3344_v55 = vld [vmem:[#allocation12 + $0x278] sm:$0xff] }
 0x400   :  { %7537 = vmatpush1.bf16.msra.mxu1 %v7536_v4  ;;  %7319 = vmatprep.subr.bf16.mxu0 %v7318_v21  ;;  %v9578_v4 = vmax.f32 %v2935_v26, %v2951_v51  ;;  %v7334_v21 = vpack.c.bf16 %v2993_v48, %v2989_v10  ;;  %v3341_v32 = vld [vmem:[#allocation12 + $0x260] sm:$0xff]  ;;  %v3350_v10 = vld [vmem:[#allocation12 + $0x2a8] sm:$0xff] }
 0x401   :  { %7539 = vmatprep.subr.bf16.mxu1 %v7538_v31  ;;  %4523 = vmatprep.mubr.f32.mxu1 %v9831_v49  ;;  %v7570_v31 = vpack.c.bf16 %v4617_v37, %v4613_v0  ;;  %v4785_v36 = vld [vmem:[#allocation12 + $0xa00] sm:$0xff]  ;;  %v4794_v48 = vld [vmem:[#allocation12 + $0xa48] sm:$0xff]  ;;  %v7348_v51 = vpack.c.bf16 %v3341_v32, %v3337_v7  ;;  %v7350_v0 = vpack.c.bf16 %v3350_v10, %v3346_v42  ;;  %v3348_v32 = vld [vmem:[#allocation12 + $0x298] sm:$0xff] }
 0x402   :  { %v9582_v2 = vsel %vm3038_vm9, %v4455_v41, %v9578_v4  ;;  %v4798_v26 = vld [vmem:[#allocation12 + $0xa68] sm:$0xff]  ;;  %v3345_v37 = vld [vmem:[#allocation12 + $0x280] sm:$0xff] }
 0x403   :  { %7321 = vmatpush1.bf16.msra.mxu0 %v7320_v62  ;;  %v4625_v62 = vld [vmem:[#allocation12 + $0x9a8] sm:$0xff]  ;;  %v4971_v7 = vld [vmem:[#allocation12 + $0xb20] sm:$0xff] }
 0x404   :  { %7541 = vmatpush1.bf16.msra.mxu1 %v7540_v47  ;;  %7323 = vmatprep.subr.bf16.mxu0 %v7322_v23  ;;  %v7336_v47 = vpack.c.bf16 %v2992_v18, %v2988_v9  ;;  %v7572_v23 = vpack.c.bf16 %v4616_v27, %v4612_v29  ;;  %v7574_v8 = vpack.c.bf16 %v4625_v62, %v4621_v50  ;;  %v4797_v9 = vld [vmem:[#allocation12 + $0xa60] sm:$0xff]  ;;  %v3354_v18 = vld [vmem:[#allocation12 + $0x2c8] sm:$0xff] }
 0x405   :  { %7543 = vmatprep.subr.bf16.mxu1 %v7542_v34  ;;  %v4620_v34 = vld [vmem:[#allocation12 + $0x980] sm:$0xff]  ;;  %v4806_v27 = vld [vmem:[#allocation12 + $0xaa8] sm:$0xff] }
 0x406   :  { %v7576_v30 = vpack.c.bf16 %v4624_v16, %v4620_v34  ;;  %v3353_v62 = vld [vmem:[#allocation12 + $0x2c0] sm:$0xff]  ;;  %v3336_v34 = vld [vmem:[#allocation12 + $0x238] sm:$0xff]  ;;  %v4814_v16 = vld [vmem:[#allocation12 + $0xae8] sm:$0xff] }
 0x407   :  { %7325 = vmatpush1.bf16.msra.mxu0 %v7324_v14  ;;  %v4633_v14 = vld [vmem:[#allocation12 + $0x9e8] sm:$0xff] }
 0x408   :  { %7545 = vmatpush1.bf16.msra.mxu1 %v7544_v6  ;;  %7327 = vmatprep.subr.bf16.mxu0 %v7326_v45  ;;  %v7342_v6 = vpack.c.bf16 %v3334_v59, %v3330_v28  ;;  %v3329_v45 = vld [vmem:[#allocation12 + $0x200] sm:$0xff]  ;;  %v7578_v57 = vpack.c.bf16 %v4633_v14, %v4629_v17  ;;  %v7358_v17 = vpack.c.bf16 %v3336_v34, %v3332_v54  ;;  %v3331_v14 = vld [vmem:[#allocation12 + $0x210] sm:$0xff]  ;;  %v4972_v11 = vld [vmem:[#allocation12 + $0xb28] sm:$0xff] }
 0x409   :  { %7547 = vmatprep.subr.bf16.mxu1 %v7546_v3  ;;  %v3338_v3 = vld [vmem:[#allocation12 + $0x248] sm:$0xff]  ;;  %v7344_v46 = vpack.c.bf16 %v3333_v20, %v3329_v45  ;;  %v4813_v45 = vld [vmem:[#allocation12 + $0xae0] sm:$0xff]  ;;  %v3340_v20 = vld [vmem:[#allocation12 + $0x258] sm:$0xff] }
 0x40a   :  { %6473 = vmatmul.mubr.msk.f32.vlgmr.msra.gmra.mrb[68].mxu0 %vm2898_vm8, %v9572_v60  ;;  %v4980_v42 = vld [vmem:[#allocation12 + $0xb68] sm:$0xff] }
 0x40b   :  { %7329 = vmatpush1.bf16.msra.mxu0 %v7328_v63  ;;  %3321 = vmatprep.mubr.f32.mxu0 %v9831_v49  ;;  %v7346_v63 = vpack.c.bf16 %v3342_v61, %v3338_v3  ;;  %v4992_v54 = vld [vmem:[#allocation12 + $0xbc8] sm:$0xff] }
 0x40c   :  { %7549 = vmatpush1.bf16.msra.mxu1 %v7548_v52  ;;  %7331 = vmatprep.subr.bf16.mxu0 %v7330_v5  ;;  %v7598_v52 = vpack.c.bf16 %v4790_v12, %v4786_v43  ;;  %v4789_v5 = vld [vmem:[#allocation12 + $0xa20] sm:$0xff]  ;;  %v7362_v43 = vpack.c.bf16 %v3344_v55, %v3340_v20  ;;  %v3339_v12 = vld [vmem:[#allocation12 + $0x250] sm:$0xff]  ;;  %v4996_v34 = vld [vmem:[#allocation12 + $0xbe8] sm:$0xff] }
 0x40d   :  { %7567 = vmatprep.subr.bf16.mxu1 %v7566_v22  ;;  %v4636_v22 = vrot.slane %v9578_v4, 1  ;;  %v7600_v41 = vpack.c.bf16 %v4789_v5, %v4785_v36  ;;  %v3352_v36 = vld [vmem:[#allocation12 + $0x2b8] sm:$0xff]  ;;  %v4976_v5 = vld [vmem:[#allocation12 + $0xb48] sm:$0xff] }
 0x40e   :  { %v5150_v20 = vld [vmem:[#allocation12 + $0xc08] sm:$0xff] }
 0x40f   :  { %7333 = vmatpush1.bf16.msra.mxu0 %v7332_v56  ;;  %6487 = vmatmul.mubr.msk.f32.vlgmr.msra.gmra.mrb[20].mxu1 %vm2898_vm8, %v9582_v2  ;;  %v3349_v56 = vld [vmem:[#allocation12 + $0x2a0] sm:$0xff]  ;;  %v9593_v29 = vsel %vm3038_vm9, %v9568_v13, %v4636_v22  ;;  %v3347_v22 = vld [vmem:[#allocation12 + $0x290] sm:$0xff]  ;;  %v5154_v55 = vld [vmem:[#allocation12 + $0xc28] sm:$0xff] }
 0x410   :  { %7569 = vmatpush1.bf16.msra.mxu1 %v7568_v58  ;;  %7335 = vmatprep.subr.bf16.mxu0 %v7334_v21  ;;  %v4793_v58 = vld [vmem:[#allocation12 + $0xa40] sm:$0xff]  ;;  %v7602_v21 = vpack.c.bf16 %v4798_v26, %v4794_v48  ;;  %v7352_v53 = vpack.c.bf16 %v3349_v56, %v3345_v37  ;;  %v4817_v48 = vrot.slane %v9578_v4, 2  ;;  %v7634_v37 = vpack.c.bf16 %v4980_v42, %v4976_v5 }
 0x411   :  { %7571 = vmatprep.subr.bf16.mxu1 %v7570_v31  ;;  %4704 = vmatprep.mubr.f32.mxu1 %v9831_v49  ;;  %v4802_v31 = vld [vmem:[#allocation12 + $0xa88] sm:$0xff]  ;;  %v7604_v40 = vpack.c.bf16 %v4797_v9, %v4793_v58  ;;  %v4979_v56 = vld [vmem:[#allocation12 + $0xb60] sm:$0xff]  ;;  %v3356_v58 = vld [vmem:[#allocation12 + $0x2d8] sm:$0xff]  ;;  %v4999_v42 = vrot.slane %v9578_v4, 3 }
 0x413   :  { %7337 = vmatpush1.bf16.msra.mxu0 %v7336_v47  ;;  %v3357_v47 = vld [vmem:[#allocation12 + $0x2e0] sm:$0xff] }
 0x414   :  { %7573 = vmatpush1.bf16.msra.mxu1 %v7572_v23  ;;  %7339 = vmatprep.subr.bf16.mxu0 %v7338_v33  ;;  %v4801_v23 = vld [vmem:[#allocation12 + $0xa80] sm:$0xff]  ;;  %v7606_v33 = vpack.c.bf16 %v4806_v27, %v4802_v31  ;;  %v7356_v28 = vpack.c.bf16 %v3357_v47, %v3353_v62 }
 0x415   :  { %7575 = vmatprep.subr.bf16.mxu1 %v7574_v8  ;;  %v4810_v8 = vld [vmem:[#allocation12 + $0xac8] sm:$0xff]  ;;  %v7608_v59 = vpack.c.bf16 %v4805_v39, %v4801_v23  ;;  %v4983_v62 = vld [vmem:[#allocation12 + $0xb80] sm:$0xff] }
 0x416   :  { %v4987_v23 = vld [vmem:[#allocation12 + $0xba0] sm:$0xff]  ;;  %v3516_v39 = vld [vmem:[#allocation12 + $0x328] sm:$0xff] }
 0x417   :  { %7341 = vmatpush1.bf16.msra.mxu0 %v7340_v15  ;;  %v3335_v15 = vld [vmem:[#allocation12 + $0x230] sm:$0xff] }
 0x418   :  { %7577 = vmatpush1.bf16.msra.mxu1 %v7576_v30  ;;  %7343 = vmatprep.subr.bf16.mxu0 %v7342_v6  ;;  %v4809_v30 = vld [vmem:[#allocation12 + $0xac0] sm:$0xff]  ;;  %v7610_v6 = vpack.c.bf16 %v4814_v16, %v4810_v8  ;;  %v7360_v3 = vpack.c.bf16 %v3335_v15, %v3331_v14  ;;  %v7640_v16 = vpack.c.bf16 %v4987_v23, %v4983_v62  ;;  %v3518_v62 = vld [vmem:[#allocation12 + $0x338] sm:$0xff]  ;;  %v5178_v23 = vld [vmem:[#allocation12 + $0xce8] sm:$0xff] }
 0x419   :  { %7579 = vmatprep.subr.bf16.mxu1 %v7578_v57  ;;  %v4968_v57 = vld [vmem:[#allocation12 + $0xb08] sm:$0xff]  ;;  %v7612_v61 = vpack.c.bf16 %v4813_v45, %v4809_v30  ;;  %v4991_v14 = vld [vmem:[#allocation12 + $0xbc0] sm:$0xff]  ;;  %v7642_v15 = vpack.c.bf16 %v4996_v34, %v4992_v54  ;;  %v2961_v54 = vld [vmem:[#allocation3 + $0x39] ss:$2 sm:$0xf] }
 0x41a   :  { %6474 = vmatmul.mubr.msk.f32.vlgmr.msra.gmra.mrb[66].mxu0 %vm2898_vm8, %v9572_v60  ;;  %v3358_v60 = vld [vmem:[#allocation12 + $0x2e8] sm:$0xff]  ;;  %v4995_v30 = vld [vmem:[#allocation12 + $0xbe0] sm:$0xff] }
 0x41b   :  { %7345 = vmatpush1.bf16.msra.mxu0 %v7344_v46  ;;  %3430 = vmatprep.mubr.f32.mxu0 %v9831_v49  ;;  %v7354_v50 = vpack.c.bf16 %v3358_v60, %v3354_v18  ;;  %v3343_v46 = vld [vmem:[#allocation12 + $0x270] sm:$0xff]  ;;  %v4984_v18 = vld [vmem:[#allocation12 + $0xb88] sm:$0xff] }
 0x41c   :  { %7581 = vmatpush1.bf16.msra.mxu1 %v7580_v19  ;;  %7347 = vmatprep.subr.bf16.mxu0 %v7346_v63  ;;  %v4967_v19 = vld [vmem:[#allocation12 + $0xb00] sm:$0xff]  ;;  %v7630_v63 = vpack.c.bf16 %v4972_v11, %v4968_v57  ;;  %v7364_v10 = vpack.c.bf16 %v3343_v46, %v3339_v12  ;;  %v4988_v60 = vld [vmem:[#allocation12 + $0xba8] sm:$0xff]  ;;  %v7644_v11 = vpack.c.bf16 %v4995_v30, %v4991_v14  ;;  %v3526_v30 = vld [vmem:[#allocation12 + $0x378] sm:$0xff] }
 0x41d   :  { %7599 = vmatprep.subr.bf16.mxu1 %v7598_v52  ;;  %v4818_v52 = vrot.slane %v9568_v13, 1  ;;  %v7632_v26 = vpack.c.bf16 %v4971_v7, %v4967_v19  ;;  %v7638_v47 = vpack.c.bf16 %v4988_v60, %v4984_v18  ;;  %v3524_v45 = vld [vmem:[#allocation12 + $0x368] sm:$0xff]  ;;  %v5149_v12 = vld [vmem:[#allocation12 + $0xc00] sm:$0xff]  ;;  %v7662_v46 = vpack.c.bf16 %v5154_v55, %v5150_v20 }
 0x41e   :  { %v5153_v19 = vld [vmem:[#allocation12 + $0xc20] sm:$0xff]  ;;  %v3532_v7 = vld [vmem:[#allocation12 + $0x3a8] sm:$0xff] }
 0x41f   :  { %7349 = vmatpush1.bf16.msra.mxu0 %v7348_v51  ;;  %6489 = vmatmul.mubr.msk.f32.vlgmr.msra.gmra.mrb[22].mxu1 %vm2898_vm8, %v9593_v29  ;;  %v7366_v51 = vpack.c.bf16 %v3352_v36, %v3348_v32  ;;  %v9604_v9 = vsel %vm3038_vm9, %v4818_v52, %v4817_v48  ;;  %v5000_v32 = vrot.slane %v9568_v13, 2  ;;  %v5158_v36 = vld [vmem:[#allocation12 + $0xc48] sm:$0xff]  ;;  %v3535_v60 = vld [vmem:[#allocation12 + $0x3c0] sm:$0xff] }
 0x420   :  { %7601 = vmatpush1.bf16.msra.mxu1 %v7600_v41  ;;  %7351 = vmatprep.subr.bf16.mxu0 %v7350_v0  ;;  %v3351_v41 = vld [vmem:[#allocation12 + $0x2b0] sm:$0xff]  ;;  %v4975_v0 = vld [vmem:[#allocation12 + $0xb40] sm:$0xff]  ;;  %v5162_v52 = vld [vmem:[#allocation12 + $0xc68] sm:$0xff] }
 0x421   :  { %7603 = vmatprep.subr.bf16.mxu1 %v7602_v21  ;;  %4886 = vmatprep.mubr.f32.mxu1 %v9831_v49  ;;  %v3360_v21 = vld [vmem:[#allocation12 + $0x2f8] sm:$0xff]  ;;  %v7368_v31 = vpack.c.bf16 %v3351_v41, %v3347_v22  ;;  %v7636_v27 = vpack.c.bf16 %v4979_v56, %v4975_v0  ;;  %v5157_v22 = vld [vmem:[#allocation12 + $0xc40] sm:$0xff]  ;;  %v7666_v41 = vpack.c.bf16 %v5162_v52, %v5158_v36  ;;  %v3536_v0 = vld [vmem:[#allocation12 + $0x3c8] sm:$0xff] }
 0x422   :  { %v3540_v13 = vld [vmem:[#allocation12 + $0x3e8] sm:$0xff]  ;;  %v5177_v14 = vld [vmem:[#allocation12 + $0xce0] sm:$0xff] }
 0x423   :  { %7353 = vmatpush1.bf16.msra.mxu0 %v7352_v53  ;;  %v7370_v53 = vpack.c.bf16 %v3360_v21, %v3356_v58  ;;  %v5166_v56 = vld [vmem:[#allocation12 + $0xc88] sm:$0xff]  ;;  %v7386_v18 = vpack.c.bf16 %v3540_v13, %v3536_v0  ;;  %v5344_v0 = vld [vmem:[#allocation12 + $0xd60] sm:$0xff]  ;;  %v3538_v13 = vld [vmem:[#allocation12 + $0x3d8] sm:$0xff] }
 0x424   :  { %7605 = vmatpush1.bf16.msra.mxu1 %v7604_v40  ;;  %7355 = vmatprep.subr.bf16.mxu0 %v7354_v50  ;;  %v3355_v40 = vld [vmem:[#allocation12 + $0x2d0] sm:$0xff]  ;;  %v5170_v58 = vld [vmem:[#allocation12 + $0xca8] sm:$0xff] }
 0x425   :  { %7607 = vmatprep.subr.bf16.mxu1 %v7606_v33  ;;  %v3359_v50 = vld [vmem:[#allocation12 + $0x2f0] sm:$0xff]  ;;  %v3512_v33 = vld [vmem:[#allocation12 + $0x308] sm:$0xff] }
 0x426   :  { %v7372_v8 = vpack.c.bf16 %v3359_v50, %v3355_v40  ;;  %v5169_v40 = vld [vmem:[#allocation12 + $0xca0] sm:$0xff]  ;;  %v3514_v50 = vld [vmem:[#allocation12 + $0x318] sm:$0xff]  ;;  %v5337_v20 = vld [vmem:[#allocation12 + $0xd28] sm:$0xff] }
 0x427   :  { %7357 = vmatpush1.bf16.msra.mxu0 %v7356_v28  ;;  %v7374_v28 = vpack.c.bf16 %v3516_v39, %v3512_v33  ;;  %v2945_v39 = vld [vmem:[#allocation3 + $0x38] ss:$2 sm:$0xf]  ;;  %v5341_v52 = vld [vmem:[#allocation12 + $0xd48] sm:$0xff] }
 0x428   :  { %7609 = vmatpush1.bf16.msra.mxu1 %v7608_v59  ;;  %7359 = vmatprep.subr.bf16.mxu0 %v7358_v17  ;;  %v3511_v59 = vld [vmem:[#allocation12 + $0x300] sm:$0xff] }
 0x429   :  { %7611 = vmatprep.subr.bf16.mxu1 %v7610_v6  ;;  %v3515_v17 = vld [vmem:[#allocation12 + $0x320] sm:$0xff]  ;;  %v3520_v6 = vld [vmem:[#allocation12 + $0x348] sm:$0xff] }
 0x42a   :  { %6475 = vmatmul.mubr.msk.f32.vlgmr.msra.gmra.mrb[70].mxu0 %vm2898_vm8, %v9535_v44  ;;  %v7376_v57 = vpack.c.bf16 %v3515_v17, %v3511_v59  ;;  %v5173_v59 = vld [vmem:[#allocation12 + $0xcc0] sm:$0xff] }
 0x42b   :  { %7361 = vmatpush1.bf16.msra.mxu0 %v7360_v3  ;;  %3500 = vmatprep.mubr.f32.mxu0 %v9831_v49  ;;  %v7378_v3 = vpack.c.bf16 %v3524_v45, %v3520_v6  ;;  %v9620_v6 = vmax.f32 %v2945_v39, %v2961_v54  ;;  %v5333_v45 = vld [vmem:[#allocation12 + $0xd08] sm:$0xff] }
 0x42c   :  { %7613 = vmatpush1.bf16.msra.mxu1 %v7612_v61  ;;  %7363 = vmatprep.subr.bf16.mxu0 %v7362_v43  ;;  %v3519_v61 = vld [vmem:[#allocation12 + $0x340] sm:$0xff]  ;;  %v5361_v39 = vld [vmem:[#allocation12 + $0xde8] sm:$0xff] }
 0x42d   :  { %7631 = vmatprep.subr.bf16.mxu1 %v7630_v63  ;;  %v3523_v43 = vld [vmem:[#allocation12 + $0x360] sm:$0xff]  ;;  %v3528_v63 = vld [vmem:[#allocation12 + $0x388] sm:$0xff]  ;;  %v5183_v36 = vrot.slane %v9620_v6, 7 }
 0x42e   :  { %v7380_v5 = vpack.c.bf16 %v3523_v43, %v3519_v61  ;;  %v7382_v48 = vpack.c.bf16 %v3532_v7, %v3528_v63  ;;  %v7676_v61 = vpack.c.bf16 %v5177_v14, %v5173_v59  ;;  %v2937_v63 = vld [vmem:[#allocation3 + $0x18] ss:$2 sm:$0xf]  ;;  %v2953_v7 = vld [vmem:[#allocation3 + $0x19] ss:$2 sm:$0xf] }
 0x42f   :  { %7365 = vmatpush1.bf16.msra.mxu0 %v7364_v10  ;;  %6491 = vmatmul.mubr.msk.f32.vlgmr.msra.gmra.mrb[24].mxu1 %vm2898_vm8, %v9604_v9  ;;  %v7664_v10 = vpack.c.bf16 %v5153_v19, %v5149_v12  ;;  %v5336_v12 = vld [vmem:[#allocation12 + $0xd20] sm:$0xff]  ;;  %v3534_v19 = vld [vmem:[#allocation12 + $0x3b8] sm:$0xff] }
 0x430   :  { %7633 = vmatpush1.bf16.msra.mxu1 %v7632_v26  ;;  %7367 = vmatprep.subr.bf16.mxu0 %v7366_v51  ;;  %v3527_v26 = vld [vmem:[#allocation12 + $0x380] sm:$0xff] }
 0x431   :  { %7635 = vmatprep.subr.bf16.mxu1 %v7634_v37  ;;  %5068 = vmatprep.mubr.f32.mxu1 %v9831_v49  ;;  %v3531_v51 = vld [vmem:[#allocation12 + $0x3a0] sm:$0xff]  ;;  %v9615_v37 = vsel %vm3038_vm9, %v5000_v32, %v4999_v42  ;;  %v7694_v32 = vpack.c.bf16 %v5337_v20, %v5333_v45  ;;  %v5514_v45 = vld [vmem:[#allocation12 + $0xe08] sm:$0xff] }
 0x432   :  { %v7384_v4 = vpack.c.bf16 %v3531_v51, %v3527_v26  ;;  %v3529_v51 = vld [vmem:[#allocation12 + $0x390] sm:$0xff]  ;;  %v5356_v59 = vld [vmem:[#allocation12 + $0xdc0] sm:$0xff]  ;;  %v5518_v20 = vld [vmem:[#allocation12 + $0xe28] sm:$0xff] }
 0x433   :  { %7369 = vmatpush1.bf16.msra.mxu0 %v7368_v31  ;;  %v3539_v31 = vld [vmem:[#allocation12 + $0x3e0] sm:$0xff] }
 0x434   :  { %7637 = vmatpush1.bf16.msra.mxu1 %v7636_v27  ;;  %7371 = vmatprep.subr.bf16.mxu0 %v7370_v53  ;;  %v5165_v27 = vld [vmem:[#allocation12 + $0xc80] sm:$0xff]  ;;  %v7670_v53 = vpack.c.bf16 %v5170_v58, %v5166_v56  ;;  %v7388_v33 = vpack.c.bf16 %v3539_v31, %v3535_v60  ;;  %v3542_v56 = vld [vmem:[#allocation12 + $0x3f8] sm:$0xff] }
 0x435   :  { %7639 = vmatprep.subr.bf16.mxu1 %v7638_v47  ;;  %v5174_v47 = vld [vmem:[#allocation12 + $0xcc8] sm:$0xff]  ;;  %v7672_v34 = vpack.c.bf16 %v5169_v40, %v5165_v27  ;;  %v7402_v31 = vpack.c.bf16 %v3542_v56, %v3538_v13  ;;  %v3537_v27 = vld [vmem:[#allocation12 + $0x3d0] sm:$0xff]  ;;  %v5348_v40 = vld [vmem:[#allocation12 + $0xd80] sm:$0xff] }
 0x436   :  { %v7674_v17 = vpack.c.bf16 %v5178_v23, %v5174_v47  ;;  %v3694_v47 = vld [vmem:[#allocation12 + $0x408] sm:$0xff]  ;;  %v5360_v14 = vld [vmem:[#allocation12 + $0xde0] sm:$0xff] }
 0x437   :  { %7373 = vmatpush1.bf16.msra.mxu0 %v7372_v8  ;;  %v7390_v8 = vpack.c.bf16 %v3518_v62, %v3514_v50  ;;  %v5352_v62 = vld [vmem:[#allocation12 + $0xda0] sm:$0xff]  ;;  %v3698_v23 = vld [vmem:[#allocation12 + $0x428] sm:$0xff] }
 0x438   :  { %7641 = vmatpush1.bf16.msra.mxu1 %v7640_v16  ;;  %7375 = vmatprep.subr.bf16.mxu0 %v7374_v28  ;;  %v3513_v16 = vld [vmem:[#allocation12 + $0x310] sm:$0xff]  ;;  %v5530_v13 = vld [vmem:[#allocation12 + $0xe88] sm:$0xff] }
 0x439   :  { %7643 = vmatprep.subr.bf16.mxu1 %v7642_v15  ;;  %v3517_v28 = vld [vmem:[#allocation12 + $0x330] sm:$0xff]  ;;  %v3522_v15 = vld [vmem:[#allocation12 + $0x358] sm:$0xff]  ;;  %v5534_v56 = vld [vmem:[#allocation12 + $0xea8] sm:$0xff] }
 0x43a   :  { %6476 = vmatmul.mubr.msk.f32.vlgmr.msra.gmra.mrb[66].mxu0 %vm2898_vm8, %v9535_v44  ;;  %v5161_v44 = vld [vmem:[#allocation12 + $0xc60] sm:$0xff]  ;;  %v7392_v55 = vpack.c.bf16 %v3517_v28, %v3513_v16  ;;  %v7394_v43 = vpack.c.bf16 %v3526_v30, %v3522_v15  ;;  %v3702_v15 = vld [vmem:[#allocation12 + $0x448] sm:$0xff] }
 0x43b   :  { %7377 = vmatpush1.bf16.msra.mxu0 %v7376_v57  ;;  %3612 = vmatprep.mubr.f32.mxu0 %v9831_v49  ;;  %v7668_v21 = vpack.c.bf16 %v5161_v44, %v5157_v22  ;;  %v3521_v57 = vld [vmem:[#allocation12 + $0x350] sm:$0xff]  ;;  %v3693_v16 = vld [vmem:[#allocation12 + $0x400] sm:$0xff]  ;;  %v3706_v30 = vld [vmem:[#allocation12 + $0x468] sm:$0xff] }
 0x43c   :  { %7645 = vmatpush1.bf16.msra.mxu1 %v7644_v11  ;;  %7379 = vmatprep.subr.bf16.mxu0 %v7378_v3  ;;  %v3525_v11 = vld [vmem:[#allocation12 + $0x370] sm:$0xff]  ;;  %v5332_v3 = vld [vmem:[#allocation12 + $0xd00] sm:$0xff] }
 0x43d   :  { %7663 = vmatprep.subr.bf16.mxu1 %v7662_v46  ;;  %v3530_v46 = vld [vmem:[#allocation12 + $0x398] sm:$0xff]  ;;  %v7396_v42 = vpack.c.bf16 %v3525_v11, %v3521_v57  ;;  %v3533_v22 = vld [vmem:[#allocation12 + $0x3b0] sm:$0xff]  ;;  %v3697_v28 = vld [vmem:[#allocation12 + $0x420] sm:$0xff]  ;;  %v7708_v57 = vpack.c.bf16 %v5360_v14, %v5356_v59  ;;  %v7410_v11 = vpack.c.bf16 %v3706_v30, %v3702_v15 }
 0x43e   :  { %v7398_v26 = vpack.c.bf16 %v3534_v19, %v3530_v46  ;;  %v5517_v46 = vld [vmem:[#allocation12 + $0xe20] sm:$0xff]  ;;  %v3710_v19 = vld [vmem:[#allocation12 + $0x488] sm:$0xff]  ;;  %v3708_v14 = vld [vmem:[#allocation12 + $0x478] sm:$0xff] }
 0x43f   :  { %7381 = vmatpush1.bf16.msra.mxu0 %v7380_v5  ;;  %6493 = vmatmul.mubr.msk.f32.vlgmr.msra.gmra.mrb[26].mxu1 %vm2898_vm8, %v9615_v37  ;;  %v5345_v5 = vld [vmem:[#allocation12 + $0xd68] sm:$0xff]  ;;  %v5541_v59 = vld [vmem:[#allocation12 + $0xee0] sm:$0xff] }
 0x440   :  { %7665 = vmatpush1.bf16.msra.mxu1 %v7664_v10  ;;  %7383 = vmatprep.subr.bf16.mxu0 %v7382_v48  ;;  %v9626_v10 = vmax.f32 %v2937_v63, %v2953_v7  ;;  %v7696_v48 = vpack.c.bf16 %v5336_v12, %v5332_v3  ;;  %v7698_v44 = vpack.c.bf16 %v5345_v5, %v5341_v52  ;;  %v3701_v3 = vld [vmem:[#allocation12 + $0x440] sm:$0xff]  ;;  %v3714_v63 = vld [vmem:[#allocation12 + $0x4a8] sm:$0xff] }
 0x441   :  { %7667 = vmatprep.subr.bf16.mxu1 %v7666_v41  ;;  %5251 = vmatprep.mubr.f32.mxu1 %v9831_v49  ;;  %v5340_v41 = vld [vmem:[#allocation12 + $0xd40] sm:$0xff]  ;;  %v7726_v12 = vpack.c.bf16 %v5518_v20, %v5514_v45  ;;  %v5522_v7 = vld [vmem:[#allocation12 + $0xe48] sm:$0xff] }
 0x442   :  { %v9630_v58 = vsel %vm3038_vm9, %v5183_v36, %v9626_v10  ;;  %v7700_v60 = vpack.c.bf16 %v5344_v0, %v5340_v41  ;;  %v5364_v52 = vrot.slane %v9626_v10, 1  ;;  %v5525_v41 = vld [vmem:[#allocation12 + $0xe60] sm:$0xff]  ;;  %v5696_v15 = vld [vmem:[#allocation12 + $0xf08] sm:$0xff] }
 0x443   :  { %7385 = vmatpush1.bf16.msra.mxu0 %v7384_v4  ;;  %v5349_v4 = vld [vmem:[#allocation12 + $0xd88] sm:$0xff] }
 0x444   :  { %7669 = vmatpush1.bf16.msra.mxu1 %v7668_v21  ;;  %7387 = vmatprep.subr.bf16.mxu0 %v7386_v18  ;;  %v5353_v21 = vld [vmem:[#allocation12 + $0xda8] sm:$0xff]  ;;  %v7400_v18 = vpack.c.bf16 %v3533_v22, %v3529_v51  ;;  %v5521_v51 = vld [vmem:[#allocation12 + $0xe40] sm:$0xff]  ;;  %v9641_v0 = vsel %vm3038_vm9, %v9620_v6, %v5364_v52 }
 0x445   :  { %7671 = vmatprep.subr.bf16.mxu1 %v7670_v53  ;;  %v3541_v53 = vld [vmem:[#allocation12 + $0x3f0] sm:$0xff]  ;;  %v7702_v50 = vpack.c.bf16 %v5353_v21, %v5349_v4  ;;  %v7732_v21 = vpack.c.bf16 %v5525_v41, %v5521_v51  ;;  %v5700_v30 = vld [vmem:[#allocation12 + $0xf28] sm:$0xff]  ;;  %v3720_v41 = vld [vmem:[#allocation12 + $0x4d8] sm:$0xff] }
 0x446   :  { %v7404_v54 = vpack.c.bf16 %v3541_v53, %v3537_v27  ;;  %v5529_v27 = vld [vmem:[#allocation12 + $0xe80] sm:$0xff]  ;;  %v7734_v53 = vpack.c.bf16 %v5534_v56, %v5530_v13  ;;  %v5712_v13 = vld [vmem:[#allocation12 + $0xf88] sm:$0xff] }
 0x447   :  { %7389 = vmatpush1.bf16.msra.mxu0 %v7388_v33  ;;  %v5357_v33 = vld [vmem:[#allocation12 + $0xdc8] sm:$0xff] }
 0x448   :  { %7673 = vmatpush1.bf16.msra.mxu1 %v7672_v34  ;;  %7391 = vmatprep.subr.bf16.mxu0 %v7390_v8  ;;  %v7704_v34 = vpack.c.bf16 %v5352_v62, %v5348_v40  ;;  %v7406_v8 = vpack.c.bf16 %v3698_v23, %v3694_v47  ;;  %v5533_v40 = vld [vmem:[#allocation12 + $0xea0] sm:$0xff]  ;;  %v3700_v62 = vld [vmem:[#allocation12 + $0x438] sm:$0xff]  ;;  %v5538_v47 = vld [vmem:[#allocation12 + $0xec8] sm:$0xff] }
 0x449   :  { %7675 = vmatprep.subr.bf16.mxu1 %v7674_v17  ;;  %v7706_v17 = vpack.c.bf16 %v5361_v39, %v5357_v33  ;;  %v5542_v23 = vld [vmem:[#allocation12 + $0xee8] sm:$0xff]  ;;  %v7736_v39 = vpack.c.bf16 %v5533_v40, %v5529_v27  ;;  %v5711_v27 = vld [vmem:[#allocation12 + $0xf80] sm:$0xff] }
 0x44a   :  { %6477 = vmatmul.mubr.msk.f32.vlgmr.msra.gmra.mrb[72].mxu0 %vm2898_vm8, %v9538_v24  ;;  %v5716_v56 = vld [vmem:[#allocation12 + $0xfa8] sm:$0xff]  ;;  %v5715_v40 = vld [vmem:[#allocation12 + $0xfa0] sm:$0xff] }
 0x44b   :  { %7393 = vmatpush1.bf16.msra.mxu0 %v7392_v55  ;;  %3682 = vmatprep.mubr.f32.mxu0 %v9831_v49  ;;  %v7408_v55 = vpack.c.bf16 %v3697_v28, %v3693_v16  ;;  %v5537_v16 = vld [vmem:[#allocation12 + $0xec0] sm:$0xff]  ;;  %v7738_v28 = vpack.c.bf16 %v5542_v23, %v5538_v47  ;;  %v5720_v47 = vld [vmem:[#allocation12 + $0xfc8] sm:$0xff] }
 0x44c   :  { %7677 = vmatpush1.bf16.msra.mxu1 %v7676_v61  ;;  %7395 = vmatprep.subr.bf16.mxu0 %v7394_v43  ;;  %v3705_v61 = vld [vmem:[#allocation12 + $0x460] sm:$0xff]  ;;  %v7740_v20 = vpack.c.bf16 %v5541_v59, %v5537_v16  ;;  %v5724_v23 = vld [vmem:[#allocation12 + $0xfe8] sm:$0xff] }
 0x44d   :  { %7695 = vmatprep.subr.bf16.mxu1 %v7694_v32  ;;  %v5513_v43 = vld [vmem:[#allocation12 + $0xe00] sm:$0xff]  ;;  %v5526_v32 = vld [vmem:[#allocation12 + $0xe68] sm:$0xff]  ;;  %v7412_v36 = vpack.c.bf16 %v3705_v61, %v3701_v3  ;;  %v7758_v61 = vpack.c.bf16 %v5700_v30, %v5696_v15 }
 0x44e   :  { %v7728_v5 = vpack.c.bf16 %v5517_v46, %v5513_v43  ;;  %v7730_v22 = vpack.c.bf16 %v5526_v32, %v5522_v7  ;;  %v5695_v3 = vld [vmem:[#allocation12 + $0xf00] sm:$0xff]  ;;  %v3716_v46 = vld [vmem:[#allocation12 + $0x4b8] sm:$0xff]  ;;  %v5708_v7 = vld [vmem:[#allocation12 + $0xf68] sm:$0xff] }
 0x44f   :  { %7397 = vmatpush1.bf16.msra.mxu0 %v7396_v42  ;;  %6495 = vmatmul.mubr.msk.f32.vlgmr.msra.gmra.mrb[28].mxu1 %vm2898_vm8, %v9630_v58  ;;  %v7414_v42 = vpack.c.bf16 %v3714_v63, %v3710_v19  ;;  %v5699_v43 = vld [vmem:[#allocation12 + $0xf20] sm:$0xff]  ;;  %v5546_v19 = vrot.slane %v9620_v6, 1  ;;  %v5704_v63 = vld [vmem:[#allocation12 + $0xf48] sm:$0xff] }
 0x450   :  { %7697 = vmatpush1.bf16.msra.mxu1 %v7696_v48  ;;  %7399 = vmatprep.subr.bf16.mxu0 %v7398_v26  ;;  %v3709_v48 = vld [vmem:[#allocation12 + $0x480] sm:$0xff]  ;;  %v7760_v52 = vpack.c.bf16 %v5699_v43, %v5695_v3  ;;  %v7762_v51 = vpack.c.bf16 %v5708_v7, %v5704_v63  ;;  %v5728_v3 = vrot.slane %v9620_v6, 2  ;;  %v5727_v43 = vrot.slane %v9626_v10, 3  ;;  %v3901_v63 = vld [vmem:[#allocation12 + $0x5c8] sm:$0xff] }
 0x451   :  { %7699 = vmatprep.subr.bf16.mxu1 %v7698_v44  ;;  %5432 = vmatprep.mubr.f32.mxu1 %v9831_v49  ;;  %v3713_v26 = vld [vmem:[#allocation12 + $0x4a0] sm:$0xff]  ;;  %v3718_v44 = vld [vmem:[#allocation12 + $0x4c8] sm:$0xff] }
 0x452   :  { %v7416_v4 = vpack.c.bf16 %v3713_v26, %v3709_v48  ;;  %v3715_v48 = vld [vmem:[#allocation12 + $0x4b0] sm:$0xff]  ;;  %v5703_v26 = vld [vmem:[#allocation12 + $0xf40] sm:$0xff]  ;;  %v3905_v7 = vld [vmem:[#allocation12 + $0x5e8] sm:$0xff] }
 0x453   :  { %7401 = vmatpush1.bf16.msra.mxu0 %v7400_v18  ;;  %v5719_v16 = vld [vmem:[#allocation12 + $0xfc0] sm:$0xff]  ;;  %v7450_v6 = vpack.c.bf16 %v3905_v7, %v3901_v63  ;;  %v4083_v63 = vld [vmem:[#allocation12 + $0x6d0] sm:$0xff] }
 0x454   :  { %7701 = vmatpush1.bf16.msra.mxu1 %v7700_v60  ;;  %7403 = vmatprep.subr.bf16.mxu0 %v7402_v31  ;;  %v3717_v60 = vld [vmem:[#allocation12 + $0x4c0] sm:$0xff]  ;;  %v4087_v7 = vld [vmem:[#allocation12 + $0x6f0] sm:$0xff] }
 0x455   :  { %7703 = vmatprep.subr.bf16.mxu1 %v7702_v50  ;;  %v3721_v31 = vld [vmem:[#allocation12 + $0x4e0] sm:$0xff]  ;;  %v3696_v50 = vld [vmem:[#allocation12 + $0x418] sm:$0xff] }
 0x456   :  { %v7420_v33 = vpack.c.bf16 %v3721_v31, %v3717_v60  ;;  %v3719_v60 = vld [vmem:[#allocation12 + $0x4d0] sm:$0xff]  ;;  %v5723_v59 = vld [vmem:[#allocation12 + $0xfe0] sm:$0xff] }
 0x457   :  { %7405 = vmatpush1.bf16.msra.mxu0 %v7404_v54  ;;  %v7422_v54 = vpack.c.bf16 %v3700_v62, %v3696_v50  ;;  %v3723_v31 = vld [vmem:[#allocation12 + $0x4f0] sm:$0xff]  ;;  %v3877_v50 = vld [vmem:[#allocation12 + $0x508] sm:$0xff]  ;;  %v7772_v30 = vpack.c.bf16 %v5723_v59, %v5719_v16  ;;  %v4068_v59 = vld [vmem:[#allocation12 + $0x658] sm:$0xff] }
 0x458   :  { %7705 = vmatpush1.bf16.msra.mxu1 %v7704_v34  ;;  %7407 = vmatprep.subr.bf16.mxu0 %v7406_v8  ;;  %v3695_v34 = vld [vmem:[#allocation12 + $0x410] sm:$0xff]  ;;  %v3881_v62 = vld [vmem:[#allocation12 + $0x528] sm:$0xff] }
 0x459   :  { %7707 = vmatprep.subr.bf16.mxu1 %v7706_v17  ;;  %v3699_v8 = vld [vmem:[#allocation12 + $0x430] sm:$0xff]  ;;  %v3704_v17 = vld [vmem:[#allocation12 + $0x458] sm:$0xff] }
 0x45a   :  { %6478 = vmatmul.mubr.msk.f32.vlgmr.msra.gmra.mrb[66].mxu0 %vm2898_vm8, %v9538_v24  ;;  %v3722_v24 = vld [vmem:[#allocation12 + $0x4e8] sm:$0xff]  ;;  %v7424_v45 = vpack.c.bf16 %v3699_v8, %v3695_v34  ;;  %v3876_v34 = vld [vmem:[#allocation12 + $0x500] sm:$0xff]  ;;  %v4059_v16 = vld [vmem:[#allocation12 + $0x610] sm:$0xff] }
 0x45b   :  { %7409 = vmatpush1.bf16.msra.mxu0 %v7408_v55  ;;  %3795 = vmatprep.mubr.f32.mxu0 %v9831_v49  ;;  %v7418_v18 = vpack.c.bf16 %v3722_v24, %v3718_v44  ;;  %v7426_v55 = vpack.c.bf16 %v3708_v14, %v3704_v17  ;;  %v3724_v44 = vld [vmem:[#allocation12 + $0x4f8] sm:$0xff]  ;;  %v3880_v8 = vld [vmem:[#allocation12 + $0x520] sm:$0xff]  ;;  %v3885_v17 = vld [vmem:[#allocation12 + $0x548] sm:$0xff] }
 0x45c   :  { %7709 = vmatpush1.bf16.msra.mxu1 %v7708_v57  ;;  %7411 = vmatprep.subr.bf16.mxu0 %v7410_v11  ;;  %v3703_v57 = vld [vmem:[#allocation12 + $0x450] sm:$0xff]  ;;  %v3889_v14 = vld [vmem:[#allocation12 + $0x568] sm:$0xff]  ;;  %v7440_v15 = vpack.c.bf16 %v3880_v8, %v3876_v34 }
 0x45d   :  { %7727 = vmatprep.subr.bf16.mxu1 %v7726_v12  ;;  %v3707_v11 = vld [vmem:[#allocation12 + $0x470] sm:$0xff]  ;;  %v3712_v12 = vld [vmem:[#allocation12 + $0x498] sm:$0xff] }
 0x45e   :  { %v7428_v32 = vpack.c.bf16 %v3707_v11, %v3703_v57  ;;  %v3893_v57 = vld [vmem:[#allocation12 + $0x588] sm:$0xff] }
 0x45f   :  { %7413 = vmatpush1.bf16.msra.mxu0 %v7412_v36  ;;  %6497 = vmatmul.mubr.msk.f32.vlgmr.msra.gmra.mrb[30].mxu1 %vm2898_vm8, %v9641_v0  ;;  %v5545_v36 = vrot.slane %v9626_v10, 2  ;;  %v3897_v11 = vld [vmem:[#allocation12 + $0x5a8] sm:$0xff]  ;;  %v3879_v10 = vld [vmem:[#allocation12 + $0x518] sm:$0xff] }
 0x460   :  { %7729 = vmatpush1.bf16.msra.mxu1 %v7728_v5  ;;  %7415 = vmatprep.subr.bf16.mxu0 %v7414_v42  ;;  %v7430_v5 = vpack.c.bf16 %v3716_v46, %v3712_v12  ;;  %v3711_v42 = vld [vmem:[#allocation12 + $0x490] sm:$0xff]  ;;  %v7446_v12 = vpack.c.bf16 %v3897_v11, %v3893_v57  ;;  %v3892_v46 = vld [vmem:[#allocation12 + $0x580] sm:$0xff] }
 0x461   :  { %7731 = vmatprep.subr.bf16.mxu1 %v7730_v22  ;;  %5614 = vmatprep.mubr.f32.mxu1 %v9831_v49  ;;  %v5707_v22 = vld [vmem:[#allocation12 + $0xf60] sm:$0xff]  ;;  %v9652_v24 = vsel %vm3038_vm9, %v5546_v19, %v5545_v36 }
 0x462   :  { %v3896_v19 = vld [vmem:[#allocation12 + $0x5a0] sm:$0xff] }
 0x463   :  { %7417 = vmatpush1.bf16.msra.mxu0 %v7416_v4  ;;  %v7432_v4 = vpack.c.bf16 %v3715_v48, %v3711_v42  ;;  %v3900_v36 = vld [vmem:[#allocation12 + $0x5c0] sm:$0xff] }
 0x464   :  { %7733 = vmatpush1.bf16.msra.mxu1 %v7732_v21  ;;  %7419 = vmatprep.subr.bf16.mxu0 %v7418_v18  ;;  %v7764_v21 = vpack.c.bf16 %v5707_v22, %v5703_v26  ;;  %v7434_v18 = vpack.c.bf16 %v3724_v44, %v3720_v41  ;;  %v3878_v26 = vld [vmem:[#allocation12 + $0x510] sm:$0xff]  ;;  %v3887_v22 = vld [vmem:[#allocation12 + $0x558] sm:$0xff] }
 0x465   :  { %7735 = vmatprep.subr.bf16.mxu1 %v7734_v53  ;;  %v7766_v53 = vpack.c.bf16 %v5716_v56, %v5712_v13  ;;  %v3891_v41 = vld [vmem:[#allocation12 + $0x578] sm:$0xff]  ;;  %v3886_v56 = vld [vmem:[#allocation12 + $0x550] sm:$0xff] }
 0x466   :  { %v7458_v13 = vpack.c.bf16 %v3891_v41, %v3887_v22  ;;  %v4253_v22 = vld [vmem:[#allocation12 + $0x770] sm:$0xff]  ;;  %v4258_v41 = vld [vmem:[#allocation12 + $0x798] sm:$0xff] }
 0x467   :  { %7421 = vmatpush1.bf16.msra.mxu0 %v7420_v33  ;;  %v7436_v33 = vpack.c.bf16 %v3723_v31, %v3719_v60 }
 0x468   :  { %7737 = vmatpush1.bf16.msra.mxu1 %v7736_v39  ;;  %7423 = vmatprep.subr.bf16.mxu0 %v7422_v54  ;;  %v7768_v39 = vpack.c.bf16 %v5715_v40, %v5711_v27  ;;  %v7438_v54 = vpack.c.bf16 %v3881_v62, %v3877_v50  ;;  %v3894_v27 = vld [vmem:[#allocation12 + $0x590] sm:$0xff]  ;;  %v3903_v40 = vld [vmem:[#allocation12 + $0x5d8] sm:$0xff] }
 0x469   :  { %7739 = vmatprep.subr.bf16.mxu1 %v7738_v28  ;;  %v7770_v28 = vpack.c.bf16 %v5724_v23, %v5720_v47  ;;  %v3907_v50 = vld [vmem:[#allocation12 + $0x5f8] sm:$0xff]  ;;  %v3902_v23 = vld [vmem:[#allocation12 + $0x5d0] sm:$0xff] }
 0x46a   :  { %6479 = vmatmul.mubr.msk.f32.vlgmr.msra.gmra.mrb[74].mxu0 %vm2898_vm8, %v9554_v1  ;;  %v7466_v47 = vpack.c.bf16 %v3907_v50, %v3903_v40  ;;  %v4269_v40 = vld [vmem:[#allocation12 + $0x7f0] sm:$0xff]  ;;  %v4424_v50 = vld [vmem:[#allocation12 + $0x818] sm:$0xff] }
 0x46b   :  { %7425 = vmatpush1.bf16.msra.mxu0 %v7424_v45  ;;  %3865 = vmatprep.mubr.f32.mxu0 %v9831_v49  ;;  %v7442_v45 = vpack.c.bf16 %v3889_v14, %v3885_v17  ;;  %v4072_v17 = vld [vmem:[#allocation12 + $0x678] sm:$0xff] }
 0x46c   :  { %7741 = vmatpush1.bf16.msra.mxu1 %v7740_v20  ;;  %7427 = vmatprep.subr.bf16.mxu0 %v7426_v55  ;;  %v3884_v20 = vld [vmem:[#allocation12 + $0x540] sm:$0xff] }
 0x46d   :  { %7759 = vmatprep.subr.bf16.mxu1 %v7758_v61  ;;  %v3888_v55 = vld [vmem:[#allocation12 + $0x560] sm:$0xff] }
 0x46e   :  { %v7444_v61 = vpack.c.bf16 %v3888_v55, %v3884_v20  ;;  %v4076_v20 = vld [vmem:[#allocation12 + $0x698] sm:$0xff] }
 0x46f   :  { %7429 = vmatpush1.bf16.msra.mxu0 %v7428_v32  ;;  %6499 = vmatmul.mubr.msk.f32.vlgmr.msra.gmra.mrb[32].mxu1 %vm2898_vm8, %v9652_v24  ;;  %v9663_v32 = vsel %vm3038_vm9, %v5728_v3, %v5727_v43  ;;  %v4080_v55 = vld [vmem:[#allocation12 + $0x6b8] sm:$0xff]  ;;  %v4075_v3 = vld [vmem:[#allocation12 + $0x690] sm:$0xff] }
 0x470   :  { %7761 = vmatpush1.bf16.msra.mxu1 %v7760_v52  ;;  %7431 = vmatprep.subr.bf16.mxu0 %v7430_v5  ;;  %v3904_v52 = vld [vmem:[#allocation12 + $0x5e0] sm:$0xff]  ;;  %v3883_v5 = vld [vmem:[#allocation12 + $0x538] sm:$0xff]  ;;  %v7494_v11 = vpack.c.bf16 %v4080_v55, %v4076_v20 }
 0x471   :  { %7763 = vmatprep.subr.bf16.mxu1 %v7762_v51  ;;  %5796 = vmatprep.mubr.f32.mxu1 %v9831_v49  ;;  %v7452_v42 = vpack.c.bf16 %v3904_v52, %v3900_v36  ;;  %v7454_v48 = vpack.c.bf16 %v3883_v5, %v3879_v10  ;;  %v3882_v51 = vld [vmem:[#allocation12 + $0x530] sm:$0xff]  ;;  %v4084_v43 = vld [vmem:[#allocation12 + $0x6d8] sm:$0xff] }
 0x472   :  { %v7456_v44 = vpack.c.bf16 %v3882_v51, %v3878_v26  ;;  %v4241_v52 = vld [vmem:[#allocation12 + $0x710] sm:$0xff]  ;;  %v4250_v5 = vld [vmem:[#allocation12 + $0x758] sm:$0xff] }
 0x473   :  { %7433 = vmatpush1.bf16.msra.mxu0 %v7432_v4  ;;  %v3890_v4 = vld [vmem:[#allocation12 + $0x570] sm:$0xff]  ;;  %v4448_v55 = vld [vmem:[#allocation12 + $0x8d8] sm:$0xff] }
 0x474   :  { %7765 = vmatpush1.bf16.msra.mxu1 %v7764_v21  ;;  %7435 = vmatprep.subr.bf16.mxu0 %v7434_v18  ;;  %v3895_v21 = vld [vmem:[#allocation12 + $0x598] sm:$0xff]  ;;  %v7460_v60 = vpack.c.bf16 %v3890_v4, %v3886_v56  ;;  %v4245_v10 = vld [vmem:[#allocation12 + $0x730] sm:$0xff] }
 0x475   :  { %7767 = vmatprep.subr.bf16.mxu1 %v7766_v53  ;;  %v3899_v18 = vld [vmem:[#allocation12 + $0x5b8] sm:$0xff]  ;;  %v3898_v53 = vld [vmem:[#allocation12 + $0x5b0] sm:$0xff] }
 0x476   :  { %v7462_v31 = vpack.c.bf16 %v3899_v18, %v3895_v21  ;;  %v7464_v62 = vpack.c.bf16 %v3898_v53, %v3894_v27  ;;  %v4249_v51 = vld [vmem:[#allocation12 + $0x750] sm:$0xff]  ;;  %v4266_v18 = vld [vmem:[#allocation12 + $0x7d8] sm:$0xff] }
 0x477   :  { %7437 = vmatpush1.bf16.msra.mxu0 %v7436_v33  ;;  %v3906_v33 = vld [vmem:[#allocation12 + $0x5f0] sm:$0xff] }
 0x478   :  { %7769 = vmatpush1.bf16.msra.mxu1 %v7768_v39  ;;  %7439 = vmatprep.subr.bf16.mxu0 %v7438_v54  ;;  %v4060_v39 = vld [vmem:[#allocation12 + $0x618] sm:$0xff]  ;;  %v7468_v34 = vpack.c.bf16 %v3906_v33, %v3902_v23  ;;  %v4257_v4 = vld [vmem:[#allocation12 + $0x790] sm:$0xff] }
 0x479   :  { %7771 = vmatprep.subr.bf16.mxu1 %v7770_v28  ;;  %v4064_v54 = vld [vmem:[#allocation12 + $0x638] sm:$0xff]  ;;  %v4063_v28 = vld [vmem:[#allocation12 + $0x630] sm:$0xff] }
 0x47a   :  { %6480 = vmatmul.mubr.msk.f32.vlgmr.msra.gmra.mrb[66].mxu0 %vm2898_vm8, %v9554_v1  ;;  %v7448_v1 = vpack.c.bf16 %v3896_v19, %v3892_v46  ;;  %v7486_v8 = vpack.c.bf16 %v4064_v54, %v4060_v39  ;;  %v7488_v14 = vpack.c.bf16 %v4063_v28, %v4059_v16  ;;  %v4261_v21 = vld [vmem:[#allocation12 + $0x7b0] sm:$0xff]  ;;  %v4432_v39 = vld [vmem:[#allocation12 + $0x858] sm:$0xff] }
 0x47b   :  { %7441 = vmatpush1.bf16.msra.mxu0 %v7440_v15  ;;  %3976 = vmatprep.mubr.f32.mxu0 %v9831_v49  ;;  %v7490_v15 = vpack.c.bf16 %v4072_v17, %v4068_v59  ;;  %v4265_v53 = vld [vmem:[#allocation12 + $0x7d0] sm:$0xff]  ;;  %v4436_v54 = vld [vmem:[#allocation12 + $0x878] sm:$0xff] }
 0x47c   :  { %7773 = vmatpush1.bf16.msra.mxu1 %v7772_v30  ;;  %7443 = vmatprep.subr.bf16.mxu0 %v7442_v45  ;;  %v4067_v30 = vld [vmem:[#allocation12 + $0x650] sm:$0xff]  ;;  %v4440_v59 = vld [vmem:[#allocation12 + $0x898] sm:$0xff] }
 0x47d   :  { %v4071_v45 = vld [vmem:[#allocation12 + $0x670] sm:$0xff]  ;;  %v4444_v17 = vld [vmem:[#allocation12 + $0x8b8] sm:$0xff] }
 0x47e   :  { %v7492_v57 = vpack.c.bf16 %v4071_v45, %v4067_v30  ;;  %v4423_v23 = vld [vmem:[#allocation12 + $0x810] sm:$0xff] }
 0x47f   :  { %7445 = vmatpush1.bf16.msra.mxu0 %v7444_v61  ;;  %6501 = vmatmul.mubr.msk.f32.vlgmr.msra.gmra.mrb[34].mxu1 %vm2898_vm8, %v9663_v32  ;;  %v4079_v61 = vld [vmem:[#allocation12 + $0x6b0] sm:$0xff] }
 0x480   :  { %7447 = vmatprep.subr.bf16.mxu0 %v7446_v12  ;;  %6057 = vmatprep.mubr.f32.mxu1 %v9831_v49  ;;  %v4088_v12 = vld [vmem:[#allocation12 + $0x6f8] sm:$0xff]  ;;  %v7496_v46 = vpack.c.bf16 %v4079_v61, %v4075_v3  ;;  %v4427_v33 = vld [vmem:[#allocation12 + $0x830] sm:$0xff] }
 0x481   :  { %v7498_v19 = vpack.c.bf16 %v4088_v12, %v4084_v43  ;;  %v4431_v16 = vld [vmem:[#allocation12 + $0x850] sm:$0xff] }
 0x482   :  { %v4435_v28 = vld [vmem:[#allocation12 + $0x870] sm:$0xff] }
 0x483   :  { %7449 = vmatpush1.bf16.msra.mxu0 %v7448_v1  ;;  %v4242_v1 = vld [vmem:[#allocation12 + $0x718] sm:$0xff]  ;;  %v4439_v30 = vld [vmem:[#allocation12 + $0x890] sm:$0xff] }
 0x484   :  { %7451 = vmatprep.subr.bf16.mxu0 %v7450_v6  ;;  %v4246_v6 = vld [vmem:[#allocation12 + $0x738] sm:$0xff]  ;;  %v4443_v45 = vld [vmem:[#allocation12 + $0x8b0] sm:$0xff] }
 0x485   :  { %v7518_v36 = vpack.c.bf16 %v4246_v6, %v4242_v1  ;;  %v7560_v3 = vpack.c.bf16 %v4443_v45, %v4439_v30  ;;  %v4447_v43 = vld [vmem:[#allocation12 + $0x8d0] sm:$0xff]  ;;  %v4812_v45 = vld [vmem:[#allocation12 + $0xad8] sm:$0xff] }
 0x486   :  { %v4451_v12 = vld [vmem:[#allocation12 + $0x8f0] sm:$0xff] }
 0x487   :  { %7453 = vmatpush1.bf16.msra.mxu0 %v7452_v42  ;;  %v4254_v42 = vld [vmem:[#allocation12 + $0x778] sm:$0xff]  ;;  %v4606_v6 = vld [vmem:[#allocation12 + $0x910] sm:$0xff] }
 0x488   :  { %7455 = vmatprep.subr.bf16.mxu0 %v7454_v48  ;;  %v7520_v48 = vpack.c.bf16 %v4245_v10, %v4241_v52  ;;  %v7522_v26 = vpack.c.bf16 %v4254_v42, %v4250_v5  ;;  %v4619_v52 = vld [vmem:[#allocation12 + $0x978] sm:$0xff]  ;;  %v4614_v42 = vld [vmem:[#allocation12 + $0x950] sm:$0xff] }
 0x48a   :  { %6481 = vmatmul.mubr.msk.f32.vlgmr.msra.gmra.mrb[76].mxu0 %vm2898_vm8, %v9549_v25 }
 0x48b   :  { %7457 = vmatpush1.bf16.msra.mxu0 %v7456_v44  ;;  %4046 = vmatprep.mubr.f32.mxu0 %v9831_v49  ;;  %v4262_v44 = vld [vmem:[#allocation12 + $0x7b8] sm:$0xff] }
 0x48c   :  { %7459 = vmatprep.subr.bf16.mxu0 %v7458_v13  ;;  %v7524_v13 = vpack.c.bf16 %v4253_v22, %v4249_v51  ;;  %v7526_v56 = vpack.c.bf16 %v4262_v44, %v4258_v41  ;;  %v4627_v51 = vld [vmem:[#allocation12 + $0x9b8] sm:$0xff]  ;;  %v4622_v44 = vld [vmem:[#allocation12 + $0x990] sm:$0xff] }
 0x48f   :  { %7461 = vmatpush1.bf16.msra.mxu0 %v7460_v60  ;;  %v4270_v60 = vld [vmem:[#allocation12 + $0x7f8] sm:$0xff] }
 0x490   :  { %7463 = vmatprep.subr.bf16.mxu0 %v7462_v31  ;;  %v7528_v31 = vpack.c.bf16 %v4261_v21, %v4257_v4  ;;  %v7530_v27 = vpack.c.bf16 %v4270_v60, %v4266_v18  ;;  %v4635_v4 = vld [vmem:[#allocation12 + $0x9f8] sm:$0xff]  ;;  %v4630_v60 = vld [vmem:[#allocation12 + $0x9d0] sm:$0xff] }
 0x493   :  { %7465 = vmatpush1.bf16.msra.mxu0 %v7464_v62  ;;  %v4428_v62 = vld [vmem:[#allocation12 + $0x838] sm:$0xff] }
 0x494   :  { %7467 = vmatprep.subr.bf16.mxu0 %v7466_v47  ;;  %v7550_v47 = vpack.c.bf16 %v4428_v62, %v4424_v50 }
 0x497   :  { %7469 = vmatpush1.bf16.msra.mxu0 %v7468_v34  ;;  %v7552_v34 = vpack.c.bf16 %v4427_v33, %v4423_v23  ;;  %v4796_v23 = vld [vmem:[#allocation12 + $0xa58] sm:$0xff] }
 0x498   :  { %7487 = vmatprep.subr.bf16.mxu0 %v7486_v8  ;;  %v7554_v8 = vpack.c.bf16 %v4436_v54, %v4432_v39  ;;  %v4800_v33 = vld [vmem:[#allocation12 + $0xa78] sm:$0xff] }
 0x499   :  { %v7618_v54 = vpack.c.bf16 %v4800_v33, %v4796_v23  ;;  %v5164_v23 = vld [vmem:[#allocation12 + $0xc78] sm:$0xff] }
 0x49a   :  { %6482 = vmatmul.mubr.msk.f32.vlgmr.msra.gmra.mrb[66].mxu0 %vm2898_vm8, %v9549_v25  ;;  %v7500_v25 = vpack.c.bf16 %v4087_v7, %v4083_v63  ;;  %v7564_v7 = vpack.c.bf16 %v4451_v12, %v4447_v43  ;;  %v4815_v43 = vld [vmem:[#allocation12 + $0xaf0] sm:$0xff]  ;;  %v4970_v12 = vld [vmem:[#allocation12 + $0xb18] sm:$0xff] }
 0x49b   :  { %7489 = vmatpush1.bf16.msra.mxu0 %v7488_v14  ;;  %4228 = vmatprep.mubr.f32.mxu0 %v9831_v49  ;;  %v7556_v14 = vpack.c.bf16 %v4435_v28, %v4431_v16  ;;  %v4804_v16 = vld [vmem:[#allocation12 + $0xa98] sm:$0xff] }
 0x49c   :  { %7491 = vmatprep.subr.bf16.mxu0 %v7490_v15  ;;  %v7558_v15 = vpack.c.bf16 %v4444_v17, %v4440_v59  ;;  %v4808_v28 = vld [vmem:[#allocation12 + $0xab8] sm:$0xff] }
 0x49d   :  { %v7622_v17 = vpack.c.bf16 %v4808_v28, %v4804_v16  ;;  %v5172_v16 = vld [vmem:[#allocation12 + $0xcb8] sm:$0xff] }
 0x49f   :  { %7493 = vmatpush1.bf16.msra.mxu0 %v7492_v57  ;;  %v4452_v57 = vld [vmem:[#allocation12 + $0x8f8] sm:$0xff] }
 0x4a0   :  { %7495 = vmatprep.subr.bf16.mxu0 %v7494_v11  ;;  %v7562_v61 = vpack.c.bf16 %v4452_v57, %v4448_v55  ;;  %v4816_v55 = vld [vmem:[#allocation12 + $0xaf8] sm:$0xff] }
 0x4a3   :  { %7497 = vmatpush1.bf16.msra.mxu0 %v7496_v46  ;;  %v4611_v46 = vld [vmem:[#allocation12 + $0x938] sm:$0xff] }
 0x4a4   :  { %7499 = vmatprep.subr.bf16.mxu0 %v7498_v19 }
 0x4a7   :  { %7501 = vmatpush1.bf16.msra.mxu0 %v7500_v25  ;;  %v4610_v25 = vld [vmem:[#allocation12 + $0x930] sm:$0xff] }
 0x4a8   :  { %7519 = vmatprep.subr.bf16.mxu0 %v7518_v36  ;;  %v4615_v36 = vld [vmem:[#allocation12 + $0x958] sm:$0xff]  ;;  %v7584_v10 = vpack.c.bf16 %v4610_v25, %v4606_v6  ;;  %v4969_v6 = vld [vmem:[#allocation12 + $0xb10] sm:$0xff] }
 0x4a9   :  { %v7586_v5 = vpack.c.bf16 %v4619_v52, %v4615_v36  ;;  %v4973_v25 = vld [vmem:[#allocation12 + $0xb30] sm:$0xff]  ;;  %v4982_v36 = vld [vmem:[#allocation12 + $0xb78] sm:$0xff] }
 0x4aa   :  { %6484 = vmatmul.mubr.msk.f32.vlgmr.msra.gmra.mrb[66].mxu0 %vm2898_vm8, %v9542_v38  ;;  %v7532_v38 = vpack.c.bf16 %v4269_v40, %v4265_v53  ;;  %v4792_v53 = vld [vmem:[#allocation12 + $0xa38] sm:$0xff]  ;;  %v7648_v52 = vpack.c.bf16 %v4973_v25, %v4969_v6  ;;  %v5334_v6 = vld [vmem:[#allocation12 + $0xd10] sm:$0xff] }
 0x4ab   :  { %7521 = vmatpush1.bf16.msra.mxu0 %v7520_v48  ;;  %4410 = vmatprep.mubr.f32.mxu0 %v9831_v49  ;;  %v4618_v48 = vld [vmem:[#allocation12 + $0x970] sm:$0xff] }
 0x4ac   :  { %7523 = vmatprep.subr.bf16.mxu0 %v7522_v26  ;;  %v4623_v26 = vld [vmem:[#allocation12 + $0x998] sm:$0xff]  ;;  %v7588_v22 = vpack.c.bf16 %v4618_v48, %v4614_v42  ;;  %v4981_v42 = vld [vmem:[#allocation12 + $0xb70] sm:$0xff] }
 0x4ad   :  { %v7590_v41 = vpack.c.bf16 %v4627_v51, %v4623_v26  ;;  %v4986_v48 = vld [vmem:[#allocation12 + $0xb98] sm:$0xff]  ;;  %v5338_v25 = vld [vmem:[#allocation12 + $0xd30] sm:$0xff] }
 0x4ae   :  { %v4990_v26 = vld [vmem:[#allocation12 + $0xbb8] sm:$0xff] }
 0x4af   :  { %7525 = vmatpush1.bf16.msra.mxu0 %v7524_v13  ;;  %v4626_v13 = vld [vmem:[#allocation12 + $0x9b0] sm:$0xff] }
 0x4b0   :  { %7527 = vmatprep.subr.bf16.mxu0 %v7526_v56  ;;  %v4631_v56 = vld [vmem:[#allocation12 + $0x9d8] sm:$0xff]  ;;  %v7592_v21 = vpack.c.bf16 %v4626_v13, %v4622_v44  ;;  %v4989_v44 = vld [vmem:[#allocation12 + $0xbb0] sm:$0xff] }
 0x4b1   :  { %v7594_v18 = vpack.c.bf16 %v4635_v4, %v4631_v56  ;;  %v4994_v13 = vld [vmem:[#allocation12 + $0xbd8] sm:$0xff] }
 0x4b2   :  { %v4998_v56 = vld [vmem:[#allocation12 + $0xbf8] sm:$0xff] }
 0x4b3   :  { %7529 = vmatpush1.bf16.msra.mxu0 %v7528_v31  ;;  %v4634_v31 = vld [vmem:[#allocation12 + $0x9f0] sm:$0xff] }
 0x4b4   :  { %7531 = vmatprep.subr.bf16.mxu0 %v7530_v27  ;;  %v4788_v27 = vld [vmem:[#allocation12 + $0xa18] sm:$0xff]  ;;  %v7596_v50 = vpack.c.bf16 %v4634_v31, %v4630_v60  ;;  %v4997_v60 = vld [vmem:[#allocation12 + $0xbf0] sm:$0xff] }
 0x4b5   :  { %v7614_v62 = vpack.c.bf16 %v4792_v53, %v4788_v27  ;;  %v5152_v31 = vld [vmem:[#allocation12 + $0xc18] sm:$0xff] }
 0x4b6   :  { %v5156_v27 = vld [vmem:[#allocation12 + $0xc38] sm:$0xff] }
 0x4b7   :  { %7533 = vmatpush1.bf16.msra.mxu0 %v7532_v38  ;;  %v4787_v38 = vld [vmem:[#allocation12 + $0xa10] sm:$0xff] }
 0x4b8   :  { %7551 = vmatprep.subr.bf16.mxu0 %v7550_v47  ;;  %v4791_v47 = vld [vmem:[#allocation12 + $0xa30] sm:$0xff] }
 0x4b9   :  { %v7616_v39 = vpack.c.bf16 %v4791_v47, %v4787_v38  ;;  %v5155_v38 = vld [vmem:[#allocation12 + $0xc30] sm:$0xff]  ;;  %v5160_v47 = vld [vmem:[#allocation12 + $0xc58] sm:$0xff] }
 0x4ba   :  { %6486 = vmatmul.mubr.msk.f32.vlgmr.msra.gmra.mrb[66].mxu0 %vm2898_vm8, %v9562_v35  ;;  %v4607_v35 = vld [vmem:[#allocation12 + $0x918] sm:$0xff] }
 0x4bb   :  { %7553 = vmatpush1.bf16.msra.mxu0 %v7552_v34  ;;  %4593 = vmatprep.mubr.f32.mxu0 %v9831_v49  ;;  %v7582_v1 = vpack.c.bf16 %v4611_v46, %v4607_v35  ;;  %v4795_v34 = vld [vmem:[#allocation12 + $0xa50] sm:$0xff]  ;;  %v4974_v35 = vld [vmem:[#allocation12 + $0xb38] sm:$0xff] }
 0x4bc   :  { %7555 = vmatprep.subr.bf16.mxu0 %v7554_v8  ;;  %v4799_v8 = vld [vmem:[#allocation12 + $0xa70] sm:$0xff] }
 0x4bd   :  { %v9680_v20 = vpop.f32.mrb[64].mxu0  ;;  %v7620_v59 = vpack.c.bf16 %v4799_v8, %v4795_v34  ;;  %v5163_v34 = vld [vmem:[#allocation12 + $0xc70] sm:$0xff]  ;;  %v5168_v8 = vld [vmem:[#allocation12 + $0xc98] sm:$0xff] }
 0x4be   :  { %v3110_v11 = vpop.f32.mrb[65].mxu0 }
 0x4bf   :  { %7557 = vmatpush1.bf16.msra.mxu0 %v7556_v14  ;;  %v4803_v14 = vld [vmem:[#allocation12 + $0xa90] sm:$0xff] }
 0x4c0   :  { %7559 = vmatprep.subr.bf16.mxu0 %v7558_v15  ;;  %v4807_v15 = vld [vmem:[#allocation12 + $0xab0] sm:$0xff] }
 0x4c2   :  { %v9682_v19 = vpop.f32.mrb[16].mxu1 }
 0x4c3   :  { %7561 = vmatpush1.bf16.msra.mxu0 %v7560_v3  ;;  %v4162_v63 = vpop.f32.mrb[17].mxu1  ;;  %v7624_v3 = vpack.c.bf16 %v4807_v15, %v4803_v14  ;;  %v5171_v14 = vld [vmem:[#allocation12 + $0xcb0] sm:$0xff] }
 0x4c4   :  { %7563 = vmatprep.subr.bf16.mxu0 %v7562_v61  ;;  %v7626_v61 = vpack.c.bf16 %v4816_v55, %v4812_v45  ;;  %v5180_v45 = vld [vmem:[#allocation12 + $0xcf8] sm:$0xff] }
 0x4c7   :  { %7565 = vmatpush1.bf16.msra.mxu0 %v7564_v7 }
 0x4c8   :  { %7583 = vmatprep.subr.bf16.mxu0 %v7582_v1  ;;  %v7646_v1 = vpack.c.bf16 %v4974_v35, %v4970_v12  ;;  %v5339_v12 = vld [vmem:[#allocation12 + $0xd38] sm:$0xff] }
 0x4ca   :  { %6488 = vmatmul.mubr.msk.f32.vlgmr.msra.gmra.mrb[66].mxu0 %vm2898_vm8, %v9582_v2 }
 0x4cb   :  { %7585 = vmatpush1.bf16.msra.mxu0 %v7584_v10  ;;  %4774 = vmatprep.mubr.f32.mxu0 %v9831_v49 }
 0x4cc   :  { %7587 = vmatprep.subr.bf16.mxu0 %v7586_v5  ;;  %v4977_v5 = vld [vmem:[#allocation12 + $0xb50] sm:$0xff] }
 0x4cd   :  { %v7652_v51 = vpack.c.bf16 %v4981_v42, %v4977_v5  ;;  %v5346_v5 = vld [vmem:[#allocation12 + $0xd70] sm:$0xff]  ;;  %v5351_v42 = vld [vmem:[#allocation12 + $0xd98] sm:$0xff] }
 0x4cf   :  { %7589 = vmatpush1.bf16.msra.mxu0 %v7588_v22  ;;  %v7654_v22 = vpack.c.bf16 %v4990_v26, %v4986_v48  ;;  %v5355_v48 = vld [vmem:[#allocation12 + $0xdb8] sm:$0xff] }
 0x4d0   :  { %7591 = vmatprep.subr.bf16.mxu0 %v7590_v41  ;;  %v4985_v41 = vld [vmem:[#allocation12 + $0xb90] sm:$0xff] }
 0x4d1   :  { %v7656_v4 = vpack.c.bf16 %v4989_v44, %v4985_v41  ;;  %v5354_v41 = vld [vmem:[#allocation12 + $0xdb0] sm:$0xff]  ;;  %v5359_v44 = vld [vmem:[#allocation12 + $0xdd8] sm:$0xff] }
 0x4d2   :  { %v9687_v40 = vpop.f32.mrb[18].mxu1 }
 0x4d3   :  { %7593 = vmatpush1.bf16.msra.mxu0 %v7592_v21  ;;  %v4344_v2 = vpop.f32.mrb[19].mxu1  ;;  %v7658_v21 = vpack.c.bf16 %v4998_v56, %v4994_v13  ;;  %v5363_v13 = vld [vmem:[#allocation12 + $0xdf8] sm:$0xff] }
 0x4d4   :  { %7595 = vmatprep.subr.bf16.mxu0 %v7594_v18  ;;  %v4993_v18 = vld [vmem:[#allocation12 + $0xbd0] sm:$0xff] }
 0x4d5   :  { %v7660_v2 = vpack.c.bf16 %v4997_v60, %v4993_v18  ;;  %v5362_v18 = vld [vmem:[#allocation12 + $0xdf0] sm:$0xff]  ;;  %v5516_v60 = vld [vmem:[#allocation12 + $0xe18] sm:$0xff] }
 0x4d7   :  { %7597 = vmatpush1.bf16.msra.mxu0 %v7596_v50  ;;  %v7678_v50 = vpack.c.bf16 %v5156_v27, %v5152_v31  ;;  %v5520_v31 = vld [vmem:[#allocation12 + $0xe38] sm:$0xff] }
 0x4d8   :  { %7615 = vmatprep.subr.bf16.mxu0 %v7614_v62  ;;  %v5151_v62 = vld [vmem:[#allocation12 + $0xc10] sm:$0xff] }
 0x4d9   :  { %v7680_v33 = vpack.c.bf16 %v5155_v38, %v5151_v62  ;;  %v5519_v62 = vld [vmem:[#allocation12 + $0xe30] sm:$0xff]  ;;  %v5524_v38 = vld [vmem:[#allocation12 + $0xe58] sm:$0xff] }
 0x4da   :  { %6490 = vmatmul.mubr.msk.f32.vlgmr.msra.gmra.mrb[66].mxu0 %vm2898_vm8, %v9593_v29  ;;  %v4811_v29 = vld [vmem:[#allocation12 + $0xad0] sm:$0xff] }
 0x4db   :  { %7617 = vmatpush1.bf16.msra.mxu0 %v7616_v39  ;;  %4956 = vmatprep.mubr.f32.mxu0 %v9831_v49  ;;  %v7628_v7 = vpack.c.bf16 %v4815_v43, %v4811_v29  ;;  %v7682_v39 = vpack.c.bf16 %v5164_v23, %v5160_v47  ;;  %v5179_v29 = vld [vmem:[#allocation12 + $0xcf0] sm:$0xff]  ;;  %v5335_v43 = vld [vmem:[#allocation12 + $0xd18] sm:$0xff] }
 0x4dc   :  { %7619 = vmatprep.subr.bf16.mxu0 %v7618_v54  ;;  %v5159_v54 = vld [vmem:[#allocation12 + $0xc50] sm:$0xff]  ;;  %v5528_v47 = vld [vmem:[#allocation12 + $0xe78] sm:$0xff] }
 0x4dd   :  { %v3253_v30 = vpop.f32.mrb[68].mxu0  ;;  %v7684_v28 = vpack.c.bf16 %v5163_v34, %v5159_v54  ;;  %v5527_v54 = vld [vmem:[#allocation12 + $0xe70] sm:$0xff]  ;;  %v5532_v34 = vld [vmem:[#allocation12 + $0xe98] sm:$0xff] }
 0x4de   :  { %v9693_v57 = vadd.f32 %v3253_v30, %v9680_v20  ;;  %v3255_v11 = vpop.f32.mrb[69].mxu0  ;;  %v4978_v20 = vld [vmem:[#allocation12 + $0xb58] sm:$0xff] }
 0x4df   :  { %7621 = vmatpush1.bf16.msra.mxu0 %v7620_v59  ;;  %v7650_v10 = vpack.c.bf16 %v4982_v36, %v4978_v20  ;;  %v7686_v59 = vpack.c.bf16 %v5172_v16, %v5168_v8  ;;  %v5176_v30 = vld [vmem:[#allocation12 + $0xcd8] sm:$0xff]  ;;  %v7712_v36 = vpack.c.bf16 %v5338_v25, %v5334_v6  ;;  %v5697_v6 = vld [vmem:[#allocation12 + $0xf10] sm:$0xff] }
 0x4e0   :  { %7623 = vmatprep.subr.bf16.mxu0 %v7622_v17  ;;  %v5167_v17 = vld [vmem:[#allocation12 + $0xc90] sm:$0xff]  ;;  %v5347_v20 = vld [vmem:[#allocation12 + $0xd78] sm:$0xff] }
 0x4e1   :  { %v5536_v8 = vld [vmem:[#allocation12 + $0xeb8] sm:$0xff]  ;;  %v5701_v25 = vld [vmem:[#allocation12 + $0xf30] sm:$0xff] }
 0x4e2   :  { %v9695_v46 = vpop.f32.mrb[20].mxu1 }
 0x4e3   :  { %7625 = vmatpush1.bf16.msra.mxu0 %v7624_v3  ;;  %v4527_v63 = vpop.f32.mrb[21].mxu1  ;;  %v7688_v3 = vpack.c.bf16 %v5171_v14, %v5167_v17  ;;  %v5535_v17 = vld [vmem:[#allocation12 + $0xeb0] sm:$0xff] }
 0x4e4   :  { %7627 = vmatprep.subr.bf16.mxu0 %v7626_v61  ;;  %v7690_v61 = vpack.c.bf16 %v5180_v45, %v5176_v30  ;;  %v5544_v30 = vld [vmem:[#allocation12 + $0xef8] sm:$0xff] }
 0x4e7   :  { %7629 = vmatpush1.bf16.msra.mxu0 %v7628_v7 }
 0x4e8   :  { %7647 = vmatprep.subr.bf16.mxu0 %v7646_v1  ;;  %v7710_v1 = vpack.c.bf16 %v5339_v12, %v5335_v43  ;;  %v5702_v43 = vld [vmem:[#allocation12 + $0xf38] sm:$0xff] }
 0x4ea   :  { %6492 = vmatmul.mubr.msk.f32.vlgmr.msra.gmra.mrb[66].mxu0 %vm2898_vm8, %v9604_v9 }
 0x4eb   :  { %7649 = vmatpush1.bf16.msra.mxu0 %v7648_v52  ;;  %5138 = vmatprep.mubr.f32.mxu0 %v9831_v49 }
 0x4ec   :  { %7651 = vmatprep.subr.bf16.mxu0 %v7650_v10  ;;  %v5342_v10 = vld [vmem:[#allocation12 + $0xd50] sm:$0xff] }
 0x4ed   :  { %v7716_v26 = vpack.c.bf16 %v5346_v5, %v5342_v10  ;;  %v5709_v10 = vld [vmem:[#allocation12 + $0xf70] sm:$0xff]  ;;  %v5714_v5 = vld [vmem:[#allocation12 + $0xf98] sm:$0xff] }
 0x4ef   :  { %7653 = vmatpush1.bf16.msra.mxu0 %v7652_v51  ;;  %v7718_v51 = vpack.c.bf16 %v5355_v48, %v5351_v42  ;;  %v5718_v42 = vld [vmem:[#allocation12 + $0xfb8] sm:$0xff] }
 0x4f0   :  { %7655 = vmatprep.subr.bf16.mxu0 %v7654_v22  ;;  %v5350_v22 = vld [vmem:[#allocation12 + $0xd90] sm:$0xff] }
 0x4f1   :  { %v7720_v56 = vpack.c.bf16 %v5354_v41, %v5350_v22  ;;  %v5717_v22 = vld [vmem:[#allocation12 + $0xfb0] sm:$0xff]  ;;  %v5722_v41 = vld [vmem:[#allocation12 + $0xfd8] sm:$0xff] }
 0x4f2   :  { %v9700_v53 = vpop.f32.mrb[22].mxu1 }
 0x4f3   :  { %7657 = vmatpush1.bf16.msra.mxu0 %v7656_v4  ;;  %v4708_v9 = vpop.f32.mrb[23].mxu1  ;;  %v7722_v4 = vpack.c.bf16 %v5363_v13, %v5359_v44  ;;  %v5726_v44 = vld [vmem:[#allocation12 + $0xff8] sm:$0xff] }
 0x4f4   :  { %7659 = vmatprep.subr.bf16.mxu0 %v7658_v21  ;;  %v5358_v21 = vld [vmem:[#allocation12 + $0xdd0] sm:$0xff] }
 0x4f5   :  { %v7724_v9 = vpack.c.bf16 %v5362_v18, %v5358_v21  ;;  %v5725_v21 = vld [vmem:[#allocation12 + $0xff0] sm:$0xff] }
 0x4f7   :  { %7661 = vmatpush1.bf16.msra.mxu0 %v7660_v2  ;;  %v7742_v2 = vpack.c.bf16 %v5520_v31, %v5516_v60 }
 0x4f8   :  { %7679 = vmatprep.subr.bf16.mxu0 %v7678_v50  ;;  %v5515_v50 = vld [vmem:[#allocation12 + $0xe10] sm:$0xff] }
 0x4f9   :  { %v7744_v23 = vpack.c.bf16 %v5519_v62, %v5515_v50 }
 0x4fa   :  { %6494 = vmatmul.mubr.msk.f32.vlgmr.msra.gmra.mrb[66].mxu0 %vm2898_vm8, %v9615_v37  ;;  %v5175_v37 = vld [vmem:[#allocation12 + $0xcd0] sm:$0xff] }
 0x4fb   :  { %7681 = vmatpush1.bf16.msra.mxu0 %v7680_v33  ;;  %5321 = vmatprep.mubr.f32.mxu0 %v9831_v49  ;;  %v7692_v7 = vpack.c.bf16 %v5179_v29, %v5175_v37  ;;  %v7746_v33 = vpack.c.bf16 %v5528_v47, %v5524_v38  ;;  %v5539_v37 = vld [vmem:[#allocation12 + $0xed0] sm:$0xff]  ;;  %v5698_v29 = vld [vmem:[#allocation12 + $0xf18] sm:$0xff] }
 0x4fc   :  { %7683 = vmatprep.subr.bf16.mxu0 %v7682_v39  ;;  %v5523_v39 = vld [vmem:[#allocation12 + $0xe50] sm:$0xff] }
 0x4fd   :  { %v3432_v15 = vpop.f32.mrb[70].mxu0  ;;  %v7748_v16 = vpack.c.bf16 %v5527_v54, %v5523_v39 }
 0x4fe   :  { %v9706_v55 = vadd.f32 %v3432_v15, %v9693_v57  ;;  %v3434_v11 = vpop.f32.mrb[71].mxu0  ;;  %v5343_v57 = vld [vmem:[#allocation12 + $0xd58] sm:$0xff] }
 0x4ff   :  { %7685 = vmatpush1.bf16.msra.mxu0 %v7684_v28  ;;  %v7714_v52 = vpack.c.bf16 %v5347_v20, %v5343_v57  ;;  %v7750_v28 = vpack.c.bf16 %v5536_v8, %v5532_v34  ;;  %v5540_v15 = vld [vmem:[#allocation12 + $0xed8] sm:$0xff] }
 0x500   :  { %7687 = vmatprep.subr.bf16.mxu0 %v7686_v59  ;;  %v5531_v59 = vld [vmem:[#allocation12 + $0xe90] sm:$0xff]  ;;  %v5706_v57 = vld [vmem:[#allocation12 + $0xf58] sm:$0xff] }
 0x501   :  { %v5710_v20 = vld [vmem:[#allocation12 + $0xf78] sm:$0xff] }
 0x502   :  { %v9708_v35 = vpop.f32.mrb[24].mxu1 }
 0x503   :  { %7689 = vmatpush1.bf16.msra.mxu0 %v7688_v3  ;;  %v4890_v63 = vpop.f32.mrb[25].mxu1  ;;  %v7752_v3 = vpack.c.bf16 %v5535_v17, %v5531_v59 }
 0x504   :  { %7691 = vmatprep.subr.bf16.mxu0 %v7690_v61  ;;  %v7754_v61 = vpack.c.bf16 %v5544_v30, %v5540_v15  ;;  %v5913_v15 = vld [vmem:[#allocation15 + $0x8] sm:$0xff] }
 0x505   :  { %v5917_v30 = vld [vmem:[#allocation15 + $0x28] sm:$0xff] }
 0x507   :  { %7693 = vmatpush1.bf16.msra.mxu0 %v7692_v7 }
 0x508   :  { %7711 = vmatprep.subr.bf16.mxu0 %v7710_v1  ;;  %v7774_v1 = vpack.c.bf16 %v5702_v43, %v5698_v29  ;;  %v5923_v29 = vld [vmem:[#allocation15 + $0x58] sm:$0xff] }
 0x50a   :  { %6496 = vmatmul.mubr.msk.f32.vlgmr.msra.gmra.mrb[66].mxu0 %vm2898_vm8, %v9630_v58 }
 0x50b   :  { %7713 = vmatpush1.bf16.msra.mxu0 %v7712_v36  ;;  %5502 = vmatprep.mubr.f32.mxu0 %v9831_v49  ;;  %v7778_v36 = vpack.c.bf16 %v5710_v20, %v5706_v57  ;;  %v5926_v57 = vld [vmem:[#allocation15 + $0x70] sm:$0xff] }
 0x50c   :  { %7715 = vmatprep.subr.bf16.mxu0 %v7714_v52  ;;  %v5705_v52 = vld [vmem:[#allocation12 + $0xf50] sm:$0xff] }
 0x50d   :  { %v7780_v48 = vpack.c.bf16 %v5709_v10, %v5705_v52  ;;  %v5931_v52 = vld [vmem:[#allocation15 + $0x98] sm:$0xff] }
 0x50f   :  { %7717 = vmatpush1.bf16.msra.mxu0 %v7716_v26  ;;  %v7782_v26 = vpack.c.bf16 %v5718_v42, %v5714_v5  ;;  %v5935_v5 = vld [vmem:[#allocation15 + $0xb8] sm:$0xff]  ;;  %v5928_v42 = vld [vmem:[#allocation15 + $0x80] sm:$0xff] }
 0x510   :  { %7719 = vmatprep.subr.bf16.mxu0 %v7718_v51  ;;  %v5713_v51 = vld [vmem:[#allocation12 + $0xf90] sm:$0xff] }
 0x511   :  { %v7784_v13 = vpack.c.bf16 %v5717_v22, %v5713_v51  ;;  %v5930_v22 = vld [vmem:[#allocation15 + $0x90] sm:$0xff] }
 0x512   :  { %v9713_v27 = vpop.f32.mrb[26].mxu1 }
 0x513   :  { %7721 = vmatpush1.bf16.msra.mxu0 %v7720_v56  ;;  %v5072_v58 = vpop.f32.mrb[27].mxu1  ;;  %v7786_v56 = vpack.c.bf16 %v5726_v44, %v5722_v41  ;;  %v5934_v41 = vld [vmem:[#allocation15 + $0xb0] sm:$0xff] }
 0x514   :  { %7723 = vmatprep.subr.bf16.mxu0 %v7722_v4  ;;  %v5721_v4 = vld [vmem:[#allocation12 + $0xfd0] sm:$0xff]  ;;  %v7832_v44 = vpack.c.bf16 %v5934_v41, %v5930_v22  ;;  %v5878_v41 = vlaneseq }
 0x517   :  { %7725 = vmatpush1.bf16.msra.mxu0 %v7724_v9 }
 0x518   :  { %7743 = vmatprep.subr.bf16.mxu0 %v7742_v2 }
 0x51a   :  { %6498 = vmatmul.mubr.msk.f32.vlgmr.msra.gmra.mrb[66].mxu0 %vm2898_vm8, %v9641_v0  ;;  %v5543_v0 = vld [vmem:[#allocation12 + $0xef0] sm:$0xff] }
 0x51b   :  { %7745 = vmatpush1.bf16.msra.mxu0 %v7744_v23  ;;  %5684 = vmatprep.mubr.f32.mxu0 %v9831_v49  ;;  %v7756_v7 = vpack.c.bf16 %v5543_v0, %v5539_v37  ;;  %v5914_v37 = vld [vmem:[#allocation15 + $0x10] sm:$0xff]  ;;  %v5925_v0 = vld [vmem:[#allocation15 + $0x68] sm:$0xff] }
 0x51c   :  { %7747 = vmatprep.subr.bf16.mxu0 %v7746_v33 }
 0x51d   :  { %v3614_v14 = vpop.f32.mrb[72].mxu0 }
 0x51e   :  { %v3689_v45 = vadd.f32 %v3614_v14, %v9706_v55  ;;  %v3616_v11 = vpop.f32.mrb[73].mxu0  ;;  %v7776_v55 = vpack.c.bf16 %v5701_v25, %v5697_v6  ;;  %v5922_v25 = vld [vmem:[#allocation15 + $0x50] sm:$0xff] }
 0x51f   :  { %7749 = vmatpush1.bf16.msra.mxu0 %v7748_v16  ;;  %v7790_v11 = vpack.c.bf16 %v5917_v30, %v5913_v15  ;;  %v7828_v20 = vpack.c.bf16 %v5926_v57, %v5922_v25  ;;  %v5955_v30 = vld [vmem:[#allocation15 + $0x158] sm:$0xff]  ;;  %v5973_v25 = vld [vmem:[#allocation15 + $0x1e8] sm:$0xff] }
 0x520   :  { %7751 = vmatprep.subr.bf16.mxu0 %v7750_v28  ;;  %v5971_v57 = vld [vmem:[#allocation15 + $0x1d8] sm:$0xff] }
 0x521   :  { %7791 = vmatprep.subr.bf16.mxu1 %v7790_v11  ;;  %v5952_v11 = vld [vmem:[#allocation15 + $0x140] sm:$0xff] }
 0x522   :  { %v5253_v12 = vpop.f32.mrb[28].mxu1 }
 0x523   :  { %7753 = vmatpush1.bf16.msra.mxu0 %v7752_v3  ;;  %v5255_v63 = vpop.f32.mrb[29].mxu1  ;;  %v5912_v3 = vld [vmem:[#allocation15] sm:$0xff] }
 0x524   :  { %7755 = vmatprep.subr.bf16.mxu0 %v7754_v61  ;;  %v5920_v63 = vld [vmem:[#allocation15 + $0x40] sm:$0xff] }
 0x527   :  { %7757 = vmatpush1.bf16.msra.mxu0 %v7756_v7  ;;  %v5924_v7 = vld [vmem:[#allocation15 + $0x60] sm:$0xff] }
 0x528   :  { %7775 = vmatprep.subr.bf16.mxu0 %v7774_v1  ;;  %v7796_v6 = vpack.c.bf16 %v5924_v7, %v5920_v63  ;;  %v5962_v7 = vld [vmem:[#allocation15 + $0x190] sm:$0xff] }
 0x52a   :  { %6500 = vmatmul.mubr.msk.f32.vlgmr.msra.gmra.mrb[66].mxu0 %vm2898_vm8, %v9652_v24  ;;  %v7788_v24 = vpack.c.bf16 %v5725_v21, %v5721_v4  ;;  %v5939_v4 = vld [vmem:[#allocation15 + $0xd8] sm:$0xff] }
 0x52b   :  { %7777 = vmatpush1.bf16.msra.mxu0 %v7776_v55  ;;  %5866 = vmatprep.mubr.f32.mxu0 %v9831_v49  ;;  %v5929_v55 = vld [vmem:[#allocation15 + $0x88] sm:$0xff] }
 0x52c   :  { %7779 = vmatprep.subr.bf16.mxu0 %v7778_v36  ;;  %v5933_v36 = vld [vmem:[#allocation15 + $0xa8] sm:$0xff] }
 0x52d   :  { %v7798_v10 = vpack.c.bf16 %v5933_v36, %v5929_v55 }
 0x52f   :  { %7781 = vmatpush1.bf16.msra.mxu0 %v7780_v48  ;;  %v5932_v48 = vld [vmem:[#allocation15 + $0xa0] sm:$0xff] }
 0x530   :  { %7783 = vmatprep.subr.bf16.mxu0 %v7782_v26  ;;  %v7830_v26 = vpack.c.bf16 %v5935_v5, %v5931_v52  ;;  %v7800_v51 = vpack.c.bf16 %v5932_v48, %v5928_v42  ;;  %v5972_v5 = vld [vmem:[#allocation15 + $0x1e0] sm:$0xff]  ;;  %v5970_v48 = vld [vmem:[#allocation15 + $0x1d0] sm:$0xff] }
 0x532   :  { %v5434_v18 = vpop.f32.mrb[30].mxu1 }
 0x533   :  { %7785 = vmatpush1.bf16.msra.mxu0 %v7784_v13  ;;  %v5436_v60 = vpop.f32.mrb[31].mxu1  ;;  %v5937_v13 = vld [vmem:[#allocation15 + $0xc8] sm:$0xff] }
 0x534   :  { %7787 = vmatprep.subr.bf16.mxu0 %v7786_v56  ;;  %v5941_v56 = vld [vmem:[#allocation15 + $0xe8] sm:$0xff]  ;;  %v5936_v60 = vld [vmem:[#allocation15 + $0xc0] sm:$0xff] }
 0x535   :  { %v7802_v21 = vpack.c.bf16 %v5941_v56, %v5937_v13  ;;  %v5876_v56 = vld [vmem:[#allocation13] sm:$0xf] }
 0x537   :  { %7789 = vmatpush1.bf16.msra.mxu0 %v7788_v24  ;;  %v5940_v24 = vld [vmem:[#allocation15 + $0xe0] sm:$0xff] }
 0x53a   :  { %6502 = vmatmul.mubr.msk.f32.vlgmr.msra.gmra.mrb[66].mxu0 %vm2898_vm8, %v9663_v32 }
 0x53b   :  { %6127 = vmatprep.mubr.f32.mxu0 %v9831_v49 }
 0x53d   :  { %v3797_v31 = vpop.f32.mrb[74].mxu0 }
 0x53e   :  { %v3872_v58 = vadd.f32 %v3797_v31, %v3689_v45  ;;  %v3799_v9 = vpop.f32.mrb[75].mxu0  ;;  %v5915_v45 = vld [vmem:[#allocation15 + $0x18] sm:$0xff] }
 0x53f   :  { %v5938_v9 = vld [vmem:[#allocation15 + $0xd0] sm:$0xff] }
 0x542   :  { %v5616_v2 = vpop.f32.mrb[32].mxu1 }
 0x543   :  { %v5618_v50 = vpop.f32.mrb[33].mxu1 }
 0x544   :  { %v5945_v50 = vld [vmem:[#allocation15 + $0x108] sm:$0xff] }
 0x552   :  { %v5798_v62 = vpop.f32.mrb[34].mxu1 }
 0x553   :  { %v5800_v38 = vpop.f32.mrb[35].mxu1 }
 0x554   :  { %v5949_v38 = vld [vmem:[#allocation15 + $0x128] sm:$0xff] }
 0x55d   :  { %v3978_v47 = vpop.f32.mrb[76].mxu0 }
 0x55e   :  { %v4053_v23 = vadd.f32 %v3978_v47, %v3872_v58  ;;  %v3980_v33 = vpop.f32.mrb[77].mxu0  ;;  %v7804_v58 = vpack.c.bf16 %v5940_v24, %v5936_v60  ;;  %v5947_v47 = vld [vmem:[#allocation15 + $0x118] sm:$0xff] }
 0x55f   :  { %v7806_v33 = vpack.c.bf16 %v5949_v38, %v5945_v50 }
 0x560   :  { %v4235_v39 = vadd.f32 %v9682_v19, %v4053_v23  ;;  %v5919_v19 = vld [vmem:[#allocation15 + $0x38] sm:$0xff] }
 0x561   :  { %v7822_v61 = vpack.c.bf16 %v5919_v19, %v5915_v45  ;;  %v5951_v23 = vld [vmem:[#allocation15 + $0x138] sm:$0xff] }
 0x562   :  { %v4417_v54 = vadd.f32 %v9687_v40, %v4235_v39  ;;  %v5916_v40 = vld [vmem:[#allocation15 + $0x20] sm:$0xff]  ;;  %v7838_v39 = vpack.c.bf16 %v5951_v23, %v5947_v47  ;;  %v5959_v45 = vld [vmem:[#allocation15 + $0x178] sm:$0xff] }
 0x563   :  { %7823 = vmatprep.subr.bf16.mxu0 %v7822_v61  ;;  %v7842_v19 = vpack.c.bf16 %v5959_v45, %v5955_v30  ;;  %v5958_v61 = vld [vmem:[#allocation15 + $0x170] sm:$0xff]  ;;  %v8325_v45 = vmov 0.0|0.0  }
 0x564   :  { %v4600_v34 = vadd.f32 %v9695_v46, %v4417_v54  ;;  %v7792_v46 = vpack.c.bf16 %v5916_v40, %v5912_v3  ;;  %v5944_v54 = vld [vmem:[#allocation15 + $0x100] sm:$0xff]  ;;  %v5954_v40 = vld [vmem:[#allocation15 + $0x150] sm:$0xff] }
 0x565   :  { %v5956_v3 = vld [vmem:[#allocation15 + $0x160] sm:$0xff] }
 0x566   :  { %v4781_v32 = vadd.f32 %v9700_v53, %v4600_v34  ;;  %v5918_v53 = vld [vmem:[#allocation15 + $0x30] sm:$0xff]  ;;  %7793 = vmatpush1.bf16.msra.mxu1 %v7792_v46  ;;  %v5948_v34 = vld [vmem:[#allocation15 + $0x120] sm:$0xff]  ;;  %v7812_v46 = vpack.c.bf16 %v5956_v3, %v5952_v11  ;;  %v6152_v11 = vld [vmem:[%s9821_s9 + $0x10] sm:$0xff] }
 0x568   :  { %v4963_v8 = vadd.f32 %v9708_v35, %v4781_v32  ;;  %v7824_v35 = vpack.c.bf16 %v5918_v53, %v5914_v37  ;;  %v5946_v32 = vld [vmem:[#allocation15 + $0x110] sm:$0xff]  ;;  %v5961_v37 = vld [vmem:[#allocation15 + $0x188] sm:$0xff] }
 0x569   :  { %v5965_v53 = vld [vmem:[#allocation15 + $0x1a8] sm:$0xff] }
 0x56a   :  { %v5145_v16 = vadd.f32 %v9713_v27, %v4963_v8  ;;  %v5921_v27 = vld [vmem:[#allocation15 + $0x48] sm:$0xff]  ;;  %7825 = vmatpush1.bf16.msra.mxu0 %v7824_v35  ;;  %v7808_v8 = vpack.c.bf16 %v5948_v34, %v5944_v54  ;;  %v5963_v35 = vld [vmem:[#allocation15 + $0x198] sm:$0xff] }
 0x56b   :  { %v7794_v43 = vpack.c.bf16 %v5925_v0, %v5921_v27  ;;  %v7844_v27 = vpack.c.bf16 %v5958_v61, %v5954_v40  ;;  %v7814_v0 = vpack.c.bf16 %v5965_v53, %v5961_v37  ;;  %v6154_v40 = vld [vmem:[%s9821_s9 + $0x20] sm:$0xff]  ;;  %v6155_v61 = vld [vmem:[%s9821_s9 + $0x28] sm:$0xff]  ;;  %v6156_v37 = vld [vmem:[%s9821_s9 + $0x30] sm:$0xff] }
 0x56c   :  { %v5328_v28 = vadd.f32 %v5253_v12, %v5145_v16  ;;  %v5927_v12 = vld [vmem:[#allocation15 + $0x78] sm:$0xff]  ;;  %v5950_v16 = vld [vmem:[#allocation15 + $0x130] sm:$0xff] }
 0x56d   :  { %v7826_v1 = vpack.c.bf16 %v5927_v12, %v5923_v29  ;;  %7795 = vmatprep.subr.bf16.mxu1 %v7794_v43  ;;  %v5967_v29 = vld [vmem:[#allocation15 + $0x1b8] sm:$0xff]  ;;  %v5960_v43 = vld [vmem:[#allocation15 + $0x180] sm:$0xff]  ;;  %v6157_v53 = vld [vmem:[%s9821_s9 + $0x38] sm:$0xff] }
 0x56e   :  { %v5509_v59 = vadd.f32 %v5434_v18, %v5328_v28  ;;  %7797 = vmatpush1.bf16.msra.mxu1 %v7796_v6  ;;  %v5943_v18 = vld [vmem:[#allocation15 + $0xf8] sm:$0xff]  ;;  %v5953_v28 = vld [vmem:[#allocation15 + $0x148] sm:$0xff]  ;;  %v5964_v12 = vld [vmem:[#allocation15 + $0x1a0] sm:$0xff]  ;;  %v7846_v63 = vpack.c.bf16 %v5967_v29, %v5963_v35  ;;  %v7864_v35 = vpack.c.bf16 %v6157_v53, %v6156_v37 }
 0x56f   :  { %7827 = vmatprep.subr.bf16.mxu0 %v7826_v1  ;;  %7799 = vmatprep.subr.bf16.mxu1 %v7798_v10  ;;  %v7834_v31 = vpack.c.bf16 %v5943_v18, %v5939_v4  ;;  %v5966_v1 = vld [vmem:[#allocation15 + $0x1b0] sm:$0xff]  ;;  %v5969_v6 = vld [vmem:[#allocation15 + $0x1c8] sm:$0xff]  ;;  %v7816_v55 = vpack.c.bf16 %v5964_v12, %v5960_v43  ;;  %v5968_v10 = vld [vmem:[#allocation15 + $0x1c0] sm:$0xff] }
 0x570   :  { %v5691_v17 = vadd.f32 %v5616_v2, %v5509_v59  ;;  %7829 = vmatpush1.bf16.msra.mxu0 %v7828_v20  ;;  %v5942_v2 = vld [vmem:[#allocation15 + $0xf0] sm:$0xff]  ;;  %v5957_v59 = vld [vmem:[#allocation15 + $0x168] sm:$0xff]  ;;  %v5975_v20 = vld [vmem:[#allocation15 + $0x1f8] sm:$0xff]  ;;  %v7848_v36 = vpack.c.bf16 %v5966_v1, %v5962_v7  ;;  %v7818_v52 = vpack.c.bf16 %v5973_v25, %v5969_v6 }
 0x571   :  { %7831 = vmatprep.subr.bf16.mxu0 %v7830_v26  ;;  %v7810_v15 = vpack.c.bf16 %v5957_v59, %v5953_v28  ;;  %v7850_v42 = vpack.c.bf16 %v5975_v20, %v5971_v57  ;;  %v5974_v26 = vld [vmem:[#allocation15 + $0x1f0] sm:$0xff]  ;;  %v6160_v43 = vld [vmem:[%s9821_s9 + $0x50] sm:$0xff]  ;;  %v6162_v7 = vld [vmem:[%s9821_s9 + $0x60] sm:$0xff] }
 0x572   :  { %v9731_v14 = vadd.f32 %v5798_v62, %v5691_v17  ;;  %7801 = vmatpush1.bf16.msra.mxu1 %v7800_v51  ;;  %v7836_v62 = vpack.c.bf16 %v5942_v2, %v5938_v9  ;;  %v7840_v17 = vpack.c.bf16 %v5950_v16, %v5946_v32  ;;  %v7820_v51 = vpack.c.bf16 %v5972_v5, %v5968_v10  ;;  %v6161_v12 = vld [vmem:[%s9821_s9 + $0x58] sm:$0xff]  ;;  %v6164_v6 = vld [vmem:[%s9821_s9 + $0x70] sm:$0xff]  ;;  %v5976_v20 = vld [vmem:[#allocation16] sm:$0xf] }
 0x573   :  { %7803 = vmatprep.subr.bf16.mxu1 %v7802_v21  ;;  %v7852_v22 = vpack.c.bf16 %v5974_v26, %v5970_v48  ;;  %v6165_v25 = vld [vmem:[%s9821_s9 + $0x78] sm:$0xff] }
 0x574   :  { %7833 = vmatpush1.bf16.msra.mxu0 %v7832_v44  ;;  %v9733_v44 = vshrl.u32 %v5878_v41, 7  ;;  %v7876_v57 = vpack.c.bf16 %v6165_v25, %v6164_v6 }
 0x575   :  { %7835 = vmatprep.subr.bf16.mxu0 %v7834_v31 }
 0x576   :  { %7805 = vmatpush1.bf16.msra.mxu1 %v7804_v58  ;;  %v5880_v13 = vsub.s32 0, %v9733_v44  ;;  %v5884_v24 = vsub.s32 2, %v9733_v44  ;;  %v5888_v31 = vsub.s32 3, %v9733_v44  ;;  %v6503_v44 = vld [vmem:[#allocation18] ss:$0 sm:$0xff] }
 0x577   :  { %7807 = vmatprep.subr.bf16.mxu1 %v7806_v33 }
 0x578   :  { %7837 = vmatpush1.bf16.msra.mxu0 %v7836_v62  ;;  %v5881_v4 = vrot.slane %v5876_v56, %v5880_v13  ;;  %v5885_v9 = vrot.slane %v5876_v56, %v5884_v24  ;;  %v5889_v50 = vrot.slane %v5876_v56, %v5888_v31  ;;  %v5985_v56 = vrot.slane %v5976_v20, %v5884_v24 }
 0x579   :  { %7839 = vmatprep.subr.bf16.mxu0 %v7838_v39 }
 0x57a   :  { %7809 = vmatpush1.bf16.msra.mxu1 %v7808_v8  ;;  %v5893_v21 = vadd.f32 %v5881_v4, %v9731_v14 }
 0x57b   :  { %7811 = vmatprep.subr.bf16.mxu1 %v7810_v15  ;;  %v6151_v15 = vld [vmem:[%s9821_s9 + $0x8] sm:$0xff] }
 0x57c   :  { %7841 = vmatpush1.bf16.msra.mxu0 %v7840_v17  ;;  %v5896_v18 = vsub.f32 0.0, %v5893_v21  ;;  %v6150_v17 = vld [vmem:[%s9821_s9] sm:$0xff] }
 0x57d   :  { %7843 = vmatprep.subr.bf16.mxu0 %v7842_v19  ;;  %v7855_v30 = vpack.c.bf16 %v6151_v15, %v6150_v17  ;;  %v6153_v19 = vld [vmem:[%s9821_s9 + $0x18] sm:$0xff] }
 0x57e   :  { %7813 = vmatpush1.bf16.msra.mxu1 %v7812_v46  ;;  %v5897_v60 = vmul.f32 1.442695, %v5896_v18  ;;  %v7858_v3 = vpack.c.bf16 %v6153_v19, %v6152_v11  ;;  %v7861_v46 = vpack.c.bf16 %v6155_v61, %v6154_v40 }
 0x57f   :  { %7815 = vmatprep.subr.bf16.mxu1 %v7814_v0  ;;  %v6159_v0 = vld [vmem:[%s9821_s9 + $0x48] sm:$0xff] }
 0x580   :  { %7845 = vmatpush1.bf16.msra.mxu0 %v7844_v27  ;;  %8054 = vpow2.f32 %v5897_v60  ;;  %v6158_v27 = vld [vmem:[%s9821_s9 + $0x40] sm:$0xff] }
 0x581   :  { %7847 = vmatprep.subr.bf16.mxu0 %v7846_v63  ;;  %v7867_v29 = vpack.c.bf16 %v6159_v0, %v6158_v27  ;;  %v7870_v63 = vpack.c.bf16 %v6161_v12, %v6160_v43 }
 0x582   :  { %7817 = vmatpush1.bf16.msra.mxu1 %v7816_v55  ;;  %v5981_v55 = vrot.slane %v5976_v20, %v5880_v13 }
 0x583   :  { %7819 = vmatprep.subr.bf16.mxu1 %v7818_v52 }
 0x584   :  { %7849 = vmatpush1.bf16.msra.mxu0 %v7848_v36  ;;  %v5989_v36 = vrot.slane %v5976_v20, %v5888_v31 }
 0x585   :  { %7851 = vmatprep.subr.bf16.mxu0 %v7850_v42 }
 0x586   :  { %7821 = vmatpush1.bf16.msra.mxu1 %v7820_v51 }
 0x587   :  { %7854 = vmatprep.subr.bf16.mxu1 %v8325_v45 }
 0x588   :  { %7853 = vmatpush1.bf16.msra.mxu0 %v7852_v22 }
 0x58a   :  { %v8055_v58 = vpop.eup %8054 }
 0x58b   :  { %v5899_v2 = vadd.f32 1.0, %v8055_v58 }
 0x58d   :  { %8056 = vrcp.f32 %v5899_v2 }
 0x597   :  { %v8057_v39 = vpop.eup %8056 }
 0x60d   :  { %v5868_v62 = vpop.f32.mrb[66].mxu0 }
 0x60e   :  { %v5894_v38 = vadd.f32 %v5885_v9, %v5868_v62  ;;  %v5870_v47 = vpop.f32.mrb[67].mxu0 }
 0x60f   :  { %v5895_v14 = vadd.f32 %v5889_v50, %v5870_v47 }
 0x610   :  { %8058 = vtanh.f32 %v5894_v38 }
 0x611   :  { %v5903_v23 = vsub.f32 0.0, %v5895_v14 }
 0x613   :  { %v5904_v33 = vmul.f32 1.442695, %v5903_v23 }
 0x615   :  { %8060 = vpow2.f32 %v5904_v33 }
 0x61a   :  { %v8059_v54 = vpop.eup %8058 }
 0x61b   :  { %v5909_v34 = vmul.f32 %v8059_v54, %v8057_v39 }
 0x61d   :  { %8062 = vtanh.f32 %v5909_v34 }
 0x61f   :  { %v8061_v32 = vpop.eup %8060 }
 0x620   :  { %v5906_v8 = vadd.f32 1.0, %v8061_v32 }
 0x622   :  { %8064 = vrcp.f32 %v5906_v8 }
 0x627   :  { %v8063_v16 = vpop.eup %8062 }
 0x62c   :  { %v8065_v28 = vpop.eup %8064 }
 0x62d   :  { %v5911_v59 = vmul.f32 %v8065_v28, %v8063_v16 }
 0x62f   :  { %6058 = vmatmul.mubr.f32.vlgmr.msra.gmra.mrb[36].mxu1 %v5911_v59  ;;  %6128 = vmatmul.mubr.f32.vlgmr.msra.gmra.mrb[78].mxu0 %v5911_v59 }
 0x630   :  { %7856 = vmatpush3.bf16.msra.mxu1 %v7855_v30  ;;  %7193 = vmatprep.mubr.msk.f32.mxu1 %vm8326_vm10, %v9831_v49  ;;  %v6163_v49 = vld [vmem:[%s9821_s9 + $0x68] sm:$0xff]  ;;  %s8327_s9 = smov [#allocation19]  }
 0x631   :  { %7857 = vmatprep.subr.bf16.mxu1 %v8325_v45  ;;  %v7873_v1 = vpack.c.bf16 %v6163_v49, %v6162_v7  ;;  %s6251_s13 = sshll.u32 %s8327_s9, 4  ;;  %s6252_s13 = int_to_ptr.vmem [resolvable:$true] %s6251_s13 }
 0x632   :  { %s8276_s14 = scalar_lea.vmem %s6252_s13, 32  ;;  %p8281_p3 = scmp.lt.s32.totalorder %s6252_s13, %s6252_s13 }
 0x633   :  { %p8277_p2 = scmp.ne.s32.totalorder %s6252_s13, %s8276_s14  ;;  %p8282_p4 = scmp.lt.s32.totalorder %s8276_s14, %s8276_s14 }
 0x634   :  { %7859 = vmatpush3.bf16.msra.mxu1 %v7858_v3 }
 0x635   :  { %7860 = vmatprep.subr.bf16.mxu1 %v8325_v45  ;;  %p8283_p5 = por %p8282_p4, %p8281_p3 }
 0x637   :  { %p8284_p6 = pnand %p8283_p5, %p8277_p2 }
 0x638   :  { %7862 = vmatpush3.bf16.msra.mxu1 %v7861_v46 }
 0x639   :  { %7863 = vmatprep.subr.bf16.mxu1 %v8325_v45 }
 0x63c   :  { %7865 = vmatpush3.bf16.msra.mxu1 %v7864_v35 }
 0x63d   :  { %7866 = vmatprep.subr.bf16.mxu1 %v8325_v45 }
 0x640   :  { %7868 = vmatpush3.bf16.msra.mxu1 %v7867_v29 }
 0x641   :  { %7869 = vmatprep.subr.bf16.mxu1 %v8325_v45 }
 0x644   :  { %7871 = vmatpush3.bf16.msra.mxu1 %v7870_v63 }
 0x645   :  { %7872 = vmatprep.subr.bf16.mxu1 %v8325_v45 }
 0x648   :  { %7874 = vmatpush3.bf16.msra.mxu1 %v7873_v1 }
 0x649   :  { %7875 = vmatprep.subr.bf16.mxu1 %v8325_v45 }
 0x64c   :  { %7877 = vmatpush3.bf16.msra.mxu1 %v7876_v57 }
 0x702   :  { %v6059_v52 = vpop.f32.mrb[36].mxu1  ;;  %v6129_v10 = vpop.f32.mrb[78].mxu0 }
 0x703   :  { %v6060_v5 = vadd.f32 %v6059_v52, %v5981_v55  ;;  %v6061_v42 = vpop.f32.mrb[37].mxu1  ;;  %v6131_v48 = vpop.f32.mrb[79].mxu0  ;;  %v6130_v21 = vadd.f32 %v6129_v10, %v5985_v56 }
 0x704   :  { %v6132_v51 = vadd.f32 %v6131_v48, %v5989_v36 }
 0x705   :  { %v6134_v26 = vsub.f32 0.0, %v6060_v5 }
 0x706   :  { %v6141_v41 = vsub.f32 0.0, %v6132_v51 }
 0x707   :  { %v6135_v22 = vmul.f32 1.442695, %v6134_v26 }
 0x708   :  { %v6142_v4 = vmul.f32 1.442695, %v6141_v41 }
 0x709   :  { %8066 = vpow2.f32 %v6135_v22 }
 0x70a   :  { %8068 = vpow2.f32 %v6142_v4 }
 0x70b   :  { %8070 = vtanh.f32 %v6130_v21 }
 0x713   :  { %v8067_v13 = vpop.eup %8066 }
 0x714   :  { %v6137_v18 = vadd.f32 1.0, %v8067_v13  ;;  %v8069_v60 = vpop.eup %8068 }
 0x715   :  { %v6144_v31 = vadd.f32 1.0, %v8069_v60  ;;  %v8071_v58 = vpop.eup %8070 }
 0x716   :  { %8072 = vrcp.f32 %v6137_v18 }
 0x717   :  { %8074 = vrcp.f32 %v6144_v31 }
 0x720   :  { %v8073_v9 = vpop.eup %8072 }
 0x721   :  { %v6147_v2 = vmul.f32 %v8073_v9, %v8071_v58  ;;  %v8075_v50 = vpop.eup %8074 }
 0x723   :  { %8076 = vtanh.f32 %v6147_v2 }
 0x72d   :  { %v8077_v62 = vpop.eup %8076 }
 0x72e   :  { %v6149_v38 = vmul.f32 %v8077_v62, %v8075_v50 }
 0x730   :  { %7194 = vmatmul.mubr.f32.vlgmr.msra.gmra.mrb[38].mxu1 %v6149_v38 }
 0x803   :  { %v6239_v24 = vpop.f32.mrb[38].mxu1 }
 0x804   :  { %v6240_v47 = vadd.f32 %v6503_v44, %v6239_v24  ;;  %v7195_v14 = vpop.f32.mrb[39].mxu1 }
 0x806   :  { %6244 = vst.msk [vmem:[#allocation19] sm:$0x3] %vm6243_vm11, %v6240_v47 }
 0x807   :  { %8287 = shalt.err (!%p8284_p6)
}
 0x808   :  { %s8288_s20 = scalar_lea.hbm %s9823_s11, 32 }
 0x809   :  { %p8289_p7 = scmp.ne.s32.totalorder %s9823_s11, %s8288_s20  ;;  %p8292_p8 = scmp.lt.u32.totalorder %s8288_s20, %s9823_s11 }
 0x80b   :  { %p8294_p9 = pnand %p8292_p8, %p8289_p7 }
 0x80d   :  { %8297 = shalt.err (!%p8294_p9)
}
 0x80e   :  { %6254 = dma.vmem_to_hbm [thread:$0]  %s6252_s13, 32, %s9823_s11, [#allocation6]  }
 0x80f   :  { %8308 = dma.done.wait [#allocation6], 32  }
 0x810   :  { %8309 = vsyncadd [#allocation6], 4294967264 }
 0x811   :  { %6258 = vsyncpa [#allocation5], 1 }
 0x812   :  { %6259 = vsyncpa [#allocation8], 1 }
 0x813   :  { %6260 = vsyncpa [#allocation11], 1 }
 0x814   :  { %6261 = vsyncpa [#allocation14], 1 }
 0x815   :  { %6262 = vsyncpa [#allocation17], 1 }
 0x816   :  { %6263 = vsyncpa [#allocation6], 1 }

</bundles_post_ra>
